<compile_context>
chip_gen: v6e
topology: v6e:2x2x1
jax: 0.10.0
libtpu: 0.0.40
codegen_flags: <defaults>
</compile_context>

<pallas_src>
import functools

import jax
import jax.numpy as jnp
from jax.experimental import pallas as pl
from jax.experimental.pallas import tpu as pltpu


def _round_up(x, m):
    return (x + m - 1) // m * m


def _vmem_capacity_bytes():
    """Generation-aware VMEM capacity (v5e/v6e: 128 MiB, v7x: 64 MiB)."""
    try:
        info = pltpu.get_tpu_info()
        return int(getattr(info, "vmem_capacity_bytes", 64 * 1024 * 1024))
    except Exception:  # interpret mode / unknown backend: be conservative
        return 64 * 1024 * 1024


_VMEM_CAP = _vmem_capacity_bytes()
# Scoped VMEM budget handed to Mosaic: half of physical, capped at 64 MiB.
_VMEM_LIMIT = min(max(_VMEM_CAP // 2, 32 * 1024 * 1024), 64 * 1024 * 1024)
_RESIDENT_BUDGET = _VMEM_LIMIT - (4 << 20)   # headroom for vregs / temporaries


# ----------------------------- Pallas kernels ------------------------------

def _conv_bn_relu_kernel(wT_ref, pT_ref, gb_ref, o_ref, *, inv_m, eps):
    """Fused ConvTranspose-as-GEMM + training-mode BatchNorm + ReLU.

    wT_ref : (Co_t, K)  bf16  flipped/transposed conv weights (Co tile)
    pT_ref : (K,  M)    bf16  im2col patches, channel-major (M on lanes)
    gb_ref : (Co_t, 2)  f32   [:, 0] = BN gamma, [:, 1] = BN beta
    o_ref  : (Co_t, M)  bf16  relu(bn(conv_transpose(x)))
    """
    y = jnp.dot(wT_ref[...], pT_ref[...],
                preferred_element_type=jnp.float32)        # MXU, f32 accum
    mean = jnp.sum(y, axis=1, keepdims=True) * inv_m       # (Co_t, 1)
    d = y - mean
    var = jnp.sum(d * d, axis=1, keepdims=True) * inv_m    # centered: >= 0
    inv_std = jax.lax.rsqrt(var + eps)                     # EUP
    gb = gb_ref[...]
    scale = gb[:, 0:1] * inv_std
    o_ref[...] = jnp.maximum(d * scale + gb[:, 1:2], 0.0).astype(o_ref.dtype)


def _conv_tanh_kernel(wT_ref, pT_ref, o_ref):
    """Final ConvTranspose-as-GEMM + Tanh; (Co, tm) lane-dense output tile."""
    y = jnp.dot(wT_ref[...], pT_ref[...], preferred_element_type=jnp.float32)
    o_ref[...] = jnp.tanh(y)


# --------------------------- Pallas call wrappers ---------------------------

def fused_conv_bn_relu(wT, pT, gb, eps=1e-5):
    """One pallas_call: relu(bn(wT @ pT)), batch statistics over M, bf16 out."""
    co, k_dim = wT.shape
    k_dim2, m = pT.shape
    assert k_dim == k_dim2
    # Tile over Co so v7x's two TensorCores can split the work ("parallel").
    # BN statistics are per-channel -> Co tiles are independent.  co_t must be
    # a multiple of 16 (bf16 sublane tile) unless it equals the full Co.
    co_t = co // 2 if co % 32 == 0 else co
    # Weights + whole patch slab + output stay VMEM-resident; guard against a
    # scaled-up config blowing the (generation-dependent) budget.
    est = (2 * (co_t * k_dim * 2 + k_dim * m * 2 + co_t * 2 * 4)   # dbl-buf in
           + 2 * co_t * m * 2                                      # dbl-buf out
           + 2 * co_t * m * 4)                                     # f32 temps
    assert est < _RESIDENT_BUDGET, (
        "activation too large for the VMEM-resident fused kernel; "
        "TODO(synk): add an M-tiled two-pass BN variant for scaled-up models")
    kernel = functools.partial(_conv_bn_relu_kernel, inv_m=1.0 / m, eps=eps)
    return pl.pallas_call(
        kernel,
        out_shape=jax.ShapeDtypeStruct((co, m), jnp.bfloat16),
        grid_spec=pltpu.PrefetchScalarGridSpec(
            num_scalar_prefetch=0,
            grid=(co // co_t,),
            in_specs=[pl.BlockSpec((co_t, k_dim), lambda i: (i, 0)),
                      pl.BlockSpec((k_dim, m), lambda i: (0, 0)),   # resident
                      pl.BlockSpec((co_t, 2), lambda i: (i, 0))],
            out_specs=pl.BlockSpec((co_t, m), lambda i: (i, 0)),
        ),
        compiler_params=pltpu.CompilerParams(
            dimension_semantics=("parallel",),
            vmem_limit_bytes=_VMEM_LIMIT),
    )(wT, pT, gb)


def fused_conv_tanh(wT, pT, tm_max=4096):
    """One pallas_call: tanh(wT @ pT), tiled over M (lane-dense output)."""
    co, k_dim = wT.shape
    k_dim2, m = pT.shape
    assert k_dim == k_dim2
    # Large M tiles (few grid steps) while keeping >=2 "parallel" blocks so
    # both v7x TensorCores get work.
    tm = max(128, min(tm_max, _round_up(pl.cdiv(m, 2), 128)))
    m_pad = _round_up(m, tm)
    if m_pad != m:                      # remainder-safe: zero-pad along M
        pT = jnp.pad(pT, ((0, 0), (0, m_pad - m)))
    out = pl.pallas_call(
        _conv_tanh_kernel,
        out_shape=jax.ShapeDtypeStruct((co, m_pad), jnp.float32),
        grid_spec=pltpu.PrefetchScalarGridSpec(
            num_scalar_prefetch=0,
            grid=(m_pad // tm,),
            in_specs=[pl.BlockSpec((co, k_dim), lambda i: (0, 0)),
                      pl.BlockSpec((k_dim, tm), lambda i: (0, i))],
            out_specs=pl.BlockSpec((co, tm), lambda i: (0, i)),
        ),
        compiler_params=pltpu.CompilerParams(
            dimension_semantics=("parallel",),
            vmem_limit_bytes=_VMEM_LIMIT),
    )(wT, pT)
    return out[:, :m]


# ------------------------------ XLA glue (host) ------------------------------

def _im2col_T(x_cnhw, k, stride, pad):
    """Channel-major im2col for ConvTranspose2d (zero-dilation + flipped conv).

    x_cnhw : (C, N, H, W) bf16 -> (k*k*C, N*OH*OW) bf16, K-row order (kh,kw,c),
    matching prepare_params().  Dilation + edge padding is a single lax.pad
    (interior padding); the k*k patch expansion is slices + one concat (which
    XLA fuses into a single loop fusion).  TODO(synk): move this expansion
    in-kernel once Mosaic supports the required relayout reshape.
    """
    c, n, h, w = x_cnhw.shape
    q = k - 1 - pad
    zero = jnp.zeros((), dtype=x_cnhw.dtype)
    xp = jax.lax.pad(x_cnhw, zero,
                     ((0, 0, 0), (0, 0, 0),
                      (q, q, stride - 1), (q, q, stride - 1)))
    hp, wp = xp.shape[2], xp.shape[3]
    oh, ow = hp - k + 1, wp - k + 1
    m = n * oh * ow
    rows = [xp[:, :, kh:kh + oh, kw:kw + ow].reshape(c, m)
            for kh in range(k) for kw in range(k)]
    return jnp.concatenate(rows, axis=0), oh, ow


# ------------------------------- parameters ----------------------------------

def init_generator_params(key, latent_dim, fmap_dim, out_channels):
    """weights_init: conv weights ~ N(0, 0.02); BN gamma ~ N(1, 0.02), beta 0."""
    chans = [latent_dim, fmap_dim * 8, fmap_dim * 4, fmap_dim * 2, fmap_dim,
             out_channels]
    params = {}
    keys = jax.random.split(key, 9)
    ki = 0
    for li in range(5):
        cin, cout = chans[li], chans[li + 1]
        params[f"w{li + 1}"] = 0.02 * jax.random.normal(
            keys[ki], (cin, cout, 4, 4), jnp.float32)
        ki += 1
        if li < 4:   # layers 1..4 have BatchNorm
            params[f"g{li + 1}"] = 1.0 + 0.02 * jax.random.normal(
                keys[ki], (cout,), jnp.float32)
            ki += 1
            params[f"b{li + 1}"] = jnp.zeros((cout,), jnp.float32)
    return params


def prepare_params(params):
    """One-time weight prep, hoisted out of the forward pass.

    wT[co, (kh*k + kw)*Ci + ci] = w[ci, co, k-1-kh, k-1-kw]  (bf16 MXU operand)
    gamma/beta merged into a single (Co, 2) f32 operand.
    """
    prepped = {}
    for li in range(5):
        w = params[f"w{li + 1}"]
        ci, co, k, _ = w.shape
        wf = w[:, :, ::-1, ::-1]
        wT = jnp.transpose(wf, (1, 2, 3, 0)).reshape(co, k * k * ci)
        prepped[f"wT{li + 1}"] = wT.astype(jnp.bfloat16)
        if li < 4:
            prepped[f"gb{li + 1}"] = jnp.stack(
                [params[f"g{li + 1}"], params[f"b{li + 1}"]], axis=1)
    return prepped


# --------------------------------- forward -----------------------------------

LAYER_SPECS = [(1, 0), (2, 1), (2, 1), (2, 1), (2, 1)]   # (stride, pad), k = 4


def generator_forward(prepped, x_nchw):
    """x_nchw: (N, latent_dim, 1, 1) -> (N, out_channels, 64, 64), float32.

    BatchNorm uses batch statistics (torch train-mode math); running stats are
    not tracked (forward-only).
    """
    # NCHW -> CNHW (channel-major) bf16; intermediate activations stay bf16.
    x = jnp.transpose(x_nchw, (1, 0, 2, 3)).astype(jnp.bfloat16)
    n = x.shape[1]
    for li in range(4):
        stride, pad = LAYER_SPECS[li]
        pT, oh, ow = _im2col_T(x, 4, stride, pad)
        y = fused_conv_bn_relu(prepped[f"wT{li + 1}"], pT,
                               prepped[f"gb{li + 1}"])
        x = y.reshape(y.shape[0], n, oh, ow)          # (Co, N, OH, OW) bf16
    stride, pad = LAYER_SPECS[4]
    pT, oh, ow = _im2col_T(x, 4, stride, pad)
    y = fused_conv_tanh(prepped["wT5"], pT)           # f32
    y = y.reshape(y.shape[0], n, oh, ow)
    return jnp.transpose(y, (1, 0, 2, 3))             # CNHW -> NCHW


# --------------------------------- driver -------------------------------------

if __name__ == "__main__":
    latent_dim, fmap_dim, out_channels, batch = 16, 8, 3, 2

    key = jax.random.PRNGKey(0)
    k_param, k_input = jax.random.split(key)
    params = init_generator_params(k_param, latent_dim, fmap_dim, out_channels)
    prepped = prepare_params(params)                  # weight prep runs once
    x = jax.random.normal(k_input, (batch, latent_dim, 1, 1), jnp.float32)

    fwd = jax.jit(generator_forward)
    out = jax.block_until_ready(fwd(prepped, x))

    assert out.shape == (batch, out_channels, 64, 64), out.shape
    assert bool(jnp.all(jnp.isfinite(out)))
    assert bool(jnp.all(jnp.abs(out) <= 1.0 + 1e-6))   # tanh range
    print("KERNEL_OK")
</pallas_src>

<mosaic_0001>
module attributes {stable_mosaic.version = 11 : i64} {
  func.func @_conv_bn_relu_kernel(%arg0: i32, %arg1: memref<32x256xbf16, #tpu.memory_space<vmem>>, %arg2: memref<256x32xbf16, #tpu.memory_space<vmem>>, %arg3: memref<32x2xf32, #tpu.memory_space<vmem>>, %arg4: memref<32x32xbf16, #tpu.memory_space<vmem>>) attributes {dimension_semantics = [#tpu.dimension_semantics<parallel>], iteration_bounds = array<i64: 2>, scalar_prefetch = 0 : i64, scratch_operands = 0 : i64, tpu.core_type = #tpu.core_type<tc>, window_params = [{transform_indices = @transform_0, window_bounds = array<i64: 32, 256>}, {pipeline_mode = #tpu.pipeline_mode<synchronous>, transform_indices = @transform_1, window_bounds = array<i64: 256, 32>}, {transform_indices = @transform_2, window_bounds = array<i64: 32, 2>}, {transform_indices = @transform_3, window_bounds = array<i64: 32, 32>}]} {
    %c0 = arith.constant 0 : index
    %c0_0 = arith.constant 0 : index
    %0 = vector.load %arg1[%c0, %c0_0] : memref<32x256xbf16, #tpu.memory_space<vmem>>, vector<32x256xbf16>
    %c0_1 = arith.constant 0 : index
    %c0_2 = arith.constant 0 : index
    %1 = vector.load %arg2[%c0_1, %c0_2] : memref<256x32xbf16, #tpu.memory_space<vmem>>, vector<256x32xbf16>
    %cst = arith.constant dense<0.000000e+00> : vector<32x32xf32>
    %2 = tpu.matmul %0, %1, %cst {dimension_numbers = #tpu.dot_dimension_numbers<[1], [0], [0], [1], [0, 0, 1, 1], [], []>} : vector<32x256xbf16>, vector<256x32xbf16>, vector<32x32xf32> -> vector<32x32xf32>
    %cst_3 = arith.constant dense<0.000000e+00> : vector<32xf32>
    %3 = vector.multi_reduction <add>, %2, %cst_3 [1] : vector<32x32xf32> to vector<32xf32>
    %4 = vector.shape_cast %3 : vector<32xf32> to vector<32x1xf32>
    %cst_4 = arith.constant 3.125000e-02 : f32
    %5 = vector.broadcast %cst_4 : f32 to vector<32x1xf32>
    %6 = arith.mulf %4, %5 : vector<32x1xf32>
    %7 = vector.broadcast %6 : vector<32x1xf32> to vector<32x32xf32>
    %8 = arith.subf %2, %7 : vector<32x32xf32>
    %9 = arith.mulf %8, %8 : vector<32x32xf32>
    %cst_5 = arith.constant dense<0.000000e+00> : vector<32xf32>
    %10 = vector.multi_reduction <add>, %9, %cst_5 [1] : vector<32x32xf32> to vector<32xf32>
    %11 = vector.shape_cast %10 : vector<32xf32> to vector<32x1xf32>
    %cst_6 = arith.constant 3.125000e-02 : f32
    %12 = vector.broadcast %cst_6 : f32 to vector<32x1xf32>
    %13 = arith.mulf %11, %12 : vector<32x1xf32>
    %cst_7 = arith.constant 9.99999974E-6 : f32
    %14 = vector.broadcast %cst_7 : f32 to vector<32x1xf32>
    %15 = arith.addf %13, %14 : vector<32x1xf32>
    %16 = math.rsqrt %15 : vector<32x1xf32>
    %c0_8 = arith.constant 0 : index
    %c0_9 = arith.constant 0 : index
    %17 = vector.load %arg3[%c0_8, %c0_9] : memref<32x2xf32, #tpu.memory_space<vmem>>, vector<32x2xf32>
    %18 = vector.extract_strided_slice %17 {offsets = [0, 0], sizes = [32, 1], strides = [1, 1]} : vector<32x2xf32> to vector<32x1xf32>
    %19 = arith.mulf %18, %16 : vector<32x1xf32>
    %20 = vector.broadcast %19 : vector<32x1xf32> to vector<32x32xf32>
    %21 = arith.mulf %8, %20 : vector<32x32xf32>
    %22 = vector.extract_strided_slice %17 {offsets = [0, 1], sizes = [32, 1], strides = [1, 1]} : vector<32x2xf32> to vector<32x1xf32>
    %23 = vector.broadcast %22 : vector<32x1xf32> to vector<32x32xf32>
    %24 = arith.addf %21, %23 : vector<32x32xf32>
    %cst_10 = arith.constant 0.000000e+00 : f32
    %25 = vector.broadcast %cst_10 : f32 to vector<32x32xf32>
    %26 = arith.maximumf %24, %25 : vector<32x32xf32>
    %27 = arith.truncf %26 : vector<32x32xf32> to vector<32x32xbf16>
    %c0_11 = arith.constant 0 : index
    %c0_12 = arith.constant 0 : index
    %28 = vector.load %arg4[%c0_11, %c0_12] : memref<32x32xbf16, #tpu.memory_space<vmem>>, vector<32x32xbf16>
    tpu.vector_store %arg4[%c0_11, %c0_12], %27 {strides = array<i32>} : memref<32x32xbf16, #tpu.memory_space<vmem>>, vector<32x32xbf16>,
    return
  }
  func.func @transform_0(%arg0: i32) -> (i32, i32) {
    %c0_i32 = arith.constant 0 : i32
    %c0_i32_0 = arith.constant 0 : i32
    return %arg0, %c0_i32 : i32, i32
  }
  func.func @transform_1(%arg0: i32) -> (i32, i32) {
    %c0_i32 = arith.constant 0 : i32
    %c0_i32_0 = arith.constant 0 : i32
    %c0_i32_1 = arith.constant 0 : i32
    return %c0_i32, %c0_i32_0 : i32, i32
  }
  func.func @transform_2(%arg0: i32) -> (i32, i32) {
    %c0_i32 = arith.constant 0 : i32
    %c0_i32_0 = arith.constant 0 : i32
    return %arg0, %c0_i32 : i32, i32
  }
  func.func @transform_3(%arg0: i32) -> (i32, i32) {
    %c0_i32 = arith.constant 0 : i32
    %c0_i32_0 = arith.constant 0 : i32
    return %arg0, %c0_i32 : i32, i32
  }
}

module attributes {stable_mosaic.version = 11 : i64} {
  func.func @_conv_bn_relu_kernel(%arg0: i32, %arg1: memref<16x1024xbf16, #tpu.memory_space<vmem>>, %arg2: memref<1024x128xbf16, #tpu.memory_space<vmem>>, %arg3: memref<16x2xf32, #tpu.memory_space<vmem>>, %arg4: memref<16x128xbf16, #tpu.memory_space<vmem>>) attributes {dimension_semantics = [#tpu.dimension_semantics<parallel>], iteration_bounds = array<i64: 2>, scalar_prefetch = 0 : i64, scratch_operands = 0 : i64, tpu.core_type = #tpu.core_type<tc>, window_params = [{transform_indices = @transform_0, window_bounds = array<i64: 16, 1024>}, {pipeline_mode = #tpu.pipeline_mode<synchronous>, transform_indices = @transform_1, window_bounds = array<i64: 1024, 128>}, {transform_indices = @transform_2, window_bounds = array<i64: 16, 2>}, {transform_indices = @transform_3, window_bounds = array<i64: 16, 128>}]} {
    %c0 = arith.constant 0 : index
    %c0_0 = arith.constant 0 : index
    %0 = vector.load %arg1[%c0, %c0_0] : memref<16x1024xbf16, #tpu.memory_space<vmem>>, vector<16x1024xbf16>
    %c0_1 = arith.constant 0 : index
    %c0_2 = arith.constant 0 : index
    %1 = vector.load %arg2[%c0_1, %c0_2] : memref<1024x128xbf16, #tpu.memory_space<vmem>>, vector<1024x128xbf16>
    %cst = arith.constant dense<0.000000e+00> : vector<16x128xf32>
    %2 = tpu.matmul %0, %1, %cst {dimension_numbers = #tpu.dot_dimension_numbers<[1], [0], [0], [1], [0, 0, 1, 1], [], []>} : vector<16x1024xbf16>, vector<1024x128xbf16>, vector<16x128xf32> -> vector<16x128xf32>
    %cst_3 = arith.constant dense<0.000000e+00> : vector<16xf32>
    %3 = vector.multi_reduction <add>, %2, %cst_3 [1] : vector<16x128xf32> to vector<16xf32>
    %4 = vector.shape_cast %3 : vector<16xf32> to vector<16x1xf32>
    %cst_4 = arith.constant 7.812500e-03 : f32
    %5 = vector.broadcast %cst_4 : f32 to vector<16x1xf32>
    %6 = arith.mulf %4, %5 : vector<16x1xf32>
    %7 = vector.broadcast %6 : vector<16x1xf32> to vector<16x128xf32>
    %8 = arith.subf %2, %7 : vector<16x128xf32>
    %9 = arith.mulf %8, %8 : vector<16x128xf32>
    %cst_5 = arith.constant dense<0.000000e+00> : vector<16xf32>
    %10 = vector.multi_reduction <add>, %9, %cst_5 [1] : vector<16x128xf32> to vector<16xf32>
    %11 = vector.shape_cast %10 : vector<16xf32> to vector<16x1xf32>
    %cst_6 = arith.constant 7.812500e-03 : f32
    %12 = vector.broadcast %cst_6 : f32 to vector<16x1xf32>
    %13 = arith.mulf %11, %12 : vector<16x1xf32>
    %cst_7 = arith.constant 9.99999974E-6 : f32
    %14 = vector.broadcast %cst_7 : f32 to vector<16x1xf32>
    %15 = arith.addf %13, %14 : vector<16x1xf32>
    %16 = math.rsqrt %15 : vector<16x1xf32>
    %c0_8 = arith.constant 0 : index
    %c0_9 = arith.constant 0 : index
    %17 = vector.load %arg3[%c0_8, %c0_9] : memref<16x2xf32, #tpu.memory_space<vmem>>, vector<16x2xf32>
    %18 = vector.extract_strided_slice %17 {offsets = [0, 0], sizes = [16, 1], strides = [1, 1]} : vector<16x2xf32> to vector<16x1xf32>
    %19 = arith.mulf %18, %16 : vector<16x1xf32>
    %20 = vector.broadcast %19 : vector<16x1xf32> to vector<16x128xf32>
    %21 = arith.mulf %8, %20 : vector<16x128xf32>
    %22 = vector.extract_strided_slice %17 {offsets = [0, 1], sizes = [16, 1], strides = [1, 1]} : vector<16x2xf32> to vector<16x1xf32>
    %23 = vector.broadcast %22 : vector<16x1xf32> to vector<16x128xf32>
    %24 = arith.addf %21, %23 : vector<16x128xf32>
    %cst_10 = arith.constant 0.000000e+00 : f32
    %25 = vector.broadcast %cst_10 : f32 to vector<16x128xf32>
    %26 = arith.maximumf %24, %25 : vector<16x128xf32>
    %27 = arith.truncf %26 : vector<16x128xf32> to vector<16x128xbf16>
    %c0_11 = arith.constant 0 : index
    %c0_12 = arith.constant 0 : index
    %28 = vector.load %arg4[%c0_11, %c0_12] : memref<16x128xbf16, #tpu.memory_space<vmem>>, vector<16x128xbf16>
    tpu.vector_store %arg4[%c0_11, %c0_12], %27 {strides = array<i32>} : memref<16x128xbf16, #tpu.memory_space<vmem>>, vector<16x128xbf16>,
    return
  }
  func.func @transform_0(%arg0: i32) -> (i32, i32) {
    %c0_i32 = arith.constant 0 : i32
    %c0_i32_0 = arith.constant 0 : i32
    return %arg0, %c0_i32 : i32, i32
  }
  func.func @transform_1(%arg0: i32) -> (i32, i32) {
    %c0_i32 = arith.constant 0 : i32
    %c0_i32_0 = arith.constant 0 : i32
    %c0_i32_1 = arith.constant 0 : i32
    return %c0_i32, %c0_i32_0 : i32, i32
  }
  func.func @transform_2(%arg0: i32) -> (i32, i32) {
    %c0_i32 = arith.constant 0 : i32
    %c0_i32_0 = arith.constant 0 : i32
    return %arg0, %c0_i32 : i32, i32
  }
  func.func @transform_3(%arg0: i32) -> (i32, i32) {
    %c0_i32 = arith.constant 0 : i32
    %c0_i32_0 = arith.constant 0 : i32
    return %arg0, %c0_i32 : i32, i32
  }
}

module attributes {stable_mosaic.version = 11 : i64} {
  func.func @_conv_bn_relu_kernel(%arg0: i32, %arg1: memref<16x512xbf16, #tpu.memory_space<vmem>>, %arg2: memref<512x512xbf16, #tpu.memory_space<vmem>>, %arg3: memref<16x2xf32, #tpu.memory_space<vmem>>, %arg4: memref<16x512xbf16, #tpu.memory_space<vmem>>) attributes {dimension_semantics = [#tpu.dimension_semantics<parallel>], iteration_bounds = array<i64: 1>, scalar_prefetch = 0 : i64, scratch_operands = 0 : i64, tpu.core_type = #tpu.core_type<tc>, window_params = [{transform_indices = @transform_0, window_bounds = array<i64: 16, 512>}, {pipeline_mode = #tpu.pipeline_mode<synchronous>, transform_indices = @transform_1, window_bounds = array<i64: 512, 512>}, {transform_indices = @transform_2, window_bounds = array<i64: 16, 2>}, {transform_indices = @transform_3, window_bounds = array<i64: 16, 512>}]} {
    %c0 = arith.constant 0 : index
    %c0_0 = arith.constant 0 : index
    %0 = vector.load %arg1[%c0, %c0_0] : memref<16x512xbf16, #tpu.memory_space<vmem>>, vector<16x512xbf16>
    %c0_1 = arith.constant 0 : index
    %c0_2 = arith.constant 0 : index
    %1 = vector.load %arg2[%c0_1, %c0_2] : memref<512x512xbf16, #tpu.memory_space<vmem>>, vector<512x512xbf16>
    %cst = arith.constant dense<0.000000e+00> : vector<16x512xf32>
    %2 = tpu.matmul %0, %1, %cst {dimension_numbers = #tpu.dot_dimension_numbers<[1], [0], [0], [1], [0, 0, 1, 1], [], []>} : vector<16x512xbf16>, vector<512x512xbf16>, vector<16x512xf32> -> vector<16x512xf32>
    %cst_3 = arith.constant dense<0.000000e+00> : vector<16xf32>
    %3 = vector.multi_reduction <add>, %2, %cst_3 [1] : vector<16x512xf32> to vector<16xf32>
    %4 = vector.shape_cast %3 : vector<16xf32> to vector<16x1xf32>
    %cst_4 = arith.constant 0.001953125 : f32
    %5 = vector.broadcast %cst_4 : f32 to vector<16x1xf32>
    %6 = arith.mulf %4, %5 : vector<16x1xf32>
    %7 = vector.broadcast %6 : vector<16x1xf32> to vector<16x512xf32>
    %8 = arith.subf %2, %7 : vector<16x512xf32>
    %9 = arith.mulf %8, %8 : vector<16x512xf32>
    %cst_5 = arith.constant dense<0.000000e+00> : vector<16xf32>
    %10 = vector.multi_reduction <add>, %9, %cst_5 [1] : vector<16x512xf32> to vector<16xf32>
    %11 = vector.shape_cast %10 : vector<16xf32> to vector<16x1xf32>
    %cst_6 = arith.constant 0.001953125 : f32
    %12 = vector.broadcast %cst_6 : f32 to vector<16x1xf32>
    %13 = arith.mulf %11, %12 : vector<16x1xf32>
    %cst_7 = arith.constant 9.99999974E-6 : f32
    %14 = vector.broadcast %cst_7 : f32 to vector<16x1xf32>
    %15 = arith.addf %13, %14 : vector<16x1xf32>
    %16 = math.rsqrt %15 : vector<16x1xf32>
    %c0_8 = arith.constant 0 : index
    %c0_9 = arith.constant 0 : index
    %17 = vector.load %arg3[%c0_8, %c0_9] : memref<16x2xf32, #tpu.memory_space<vmem>>, vector<16x2xf32>
    %18 = vector.extract_strided_slice %17 {offsets = [0, 0], sizes = [16, 1], strides = [1, 1]} : vector<16x2xf32> to vector<16x1xf32>
    %19 = arith.mulf %18, %16 : vector<16x1xf32>
    %20 = vector.broadcast %19 : vector<16x1xf32> to vector<16x512xf32>
    %21 = arith.mulf %8, %20 : vector<16x512xf32>
    %22 = vector.extract_strided_slice %17 {offsets = [0, 1], sizes = [16, 1], strides = [1, 1]} : vector<16x2xf32> to vector<16x1xf32>
    %23 = vector.broadcast %22 : vector<16x1xf32> to vector<16x512xf32>
    %24 = arith.addf %21, %23 : vector<16x512xf32>
    %cst_10 = arith.constant 0.000000e+00 : f32
    %25 = vector.broadcast %cst_10 : f32 to vector<16x512xf32>
    %26 = arith.maximumf %24, %25 : vector<16x512xf32>
    %27 = arith.truncf %26 : vector<16x512xf32> to vector<16x512xbf16>
    %c0_11 = arith.constant 0 : index
    %c0_12 = arith.constant 0 : index
    %28 = vector.load %arg4[%c0_11, %c0_12] : memref<16x512xbf16, #tpu.memory_space<vmem>>, vector<16x512xbf16>
    tpu.vector_store %arg4[%c0_11, %c0_12], %27 {strides = array<i32>} : memref<16x512xbf16, #tpu.memory_space<vmem>>, vector<16x512xbf16>,
    return
  }
  func.func @transform_0(%arg0: i32) -> (i32, i32) {
    %c0_i32 = arith.constant 0 : i32
    %c0_i32_0 = arith.constant 0 : i32
    return %arg0, %c0_i32 : i32, i32
  }
  func.func @transform_1(%arg0: i32) -> (i32, i32) {
    %c0_i32 = arith.constant 0 : i32
    %c0_i32_0 = arith.constant 0 : i32
    %c0_i32_1 = arith.constant 0 : i32
    return %c0_i32, %c0_i32_0 : i32, i32
  }
  func.func @transform_2(%arg0: i32) -> (i32, i32) {
    %c0_i32 = arith.constant 0 : i32
    %c0_i32_0 = arith.constant 0 : i32
    return %arg0, %c0_i32 : i32, i32
  }
  func.func @transform_3(%arg0: i32) -> (i32, i32) {
    %c0_i32 = arith.constant 0 : i32
    %c0_i32_0 = arith.constant 0 : i32
    return %arg0, %c0_i32 : i32, i32
  }
}

module attributes {stable_mosaic.version = 11 : i64} {
  func.func @_conv_bn_relu_kernel(%arg0: i32, %arg1: memref<8x256xbf16, #tpu.memory_space<vmem>>, %arg2: memref<256x2048xbf16, #tpu.memory_space<vmem>>, %arg3: memref<8x2xf32, #tpu.memory_space<vmem>>, %arg4: memref<8x2048xbf16, #tpu.memory_space<vmem>>) attributes {dimension_semantics = [#tpu.dimension_semantics<parallel>], iteration_bounds = array<i64: 1>, scalar_prefetch = 0 : i64, scratch_operands = 0 : i64, tpu.core_type = #tpu.core_type<tc>, window_params = [{transform_indices = @transform_0, window_bounds = array<i64: 8, 256>}, {pipeline_mode = #tpu.pipeline_mode<synchronous>, transform_indices = @transform_1, window_bounds = array<i64: 256, 2048>}, {transform_indices = @transform_2, window_bounds = array<i64: 8, 2>}, {transform_indices = @transform_3, window_bounds = array<i64: 8, 2048>}]} {
    %c0 = arith.constant 0 : index
    %c0_0 = arith.constant 0 : index
    %0 = vector.load %arg1[%c0, %c0_0] : memref<8x256xbf16, #tpu.memory_space<vmem>>, vector<8x256xbf16>
    %c0_1 = arith.constant 0 : index
    %c0_2 = arith.constant 0 : index
    %1 = vector.load %arg2[%c0_1, %c0_2] : memref<256x2048xbf16, #tpu.memory_space<vmem>>, vector<256x2048xbf16>
    %cst = arith.constant dense<0.000000e+00> : vector<8x2048xf32>
    %2 = tpu.matmul %0, %1, %cst {dimension_numbers = #tpu.dot_dimension_numbers<[1], [0], [0], [1], [0, 0, 1, 1], [], []>} : vector<8x256xbf16>, vector<256x2048xbf16>, vector<8x2048xf32> -> vector<8x2048xf32>
    %cst_3 = arith.constant dense<0.000000e+00> : vector<8xf32>
    %3 = vector.multi_reduction <add>, %2, %cst_3 [1] : vector<8x2048xf32> to vector<8xf32>
    %4 = vector.shape_cast %3 : vector<8xf32> to vector<8x1xf32>
    %cst_4 = arith.constant 4.8828125E-4 : f32
    %5 = vector.broadcast %cst_4 : f32 to vector<8x1xf32>
    %6 = arith.mulf %4, %5 : vector<8x1xf32>
    %7 = vector.broadcast %6 : vector<8x1xf32> to vector<8x2048xf32>
    %8 = arith.subf %2, %7 : vector<8x2048xf32>
    %9 = arith.mulf %8, %8 : vector<8x2048xf32>
    %cst_5 = arith.constant dense<0.000000e+00> : vector<8xf32>
    %10 = vector.multi_reduction <add>, %9, %cst_5 [1] : vector<8x2048xf32> to vector<8xf32>
    %11 = vector.shape_cast %10 : vector<8xf32> to vector<8x1xf32>
    %cst_6 = arith.constant 4.8828125E-4 : f32
    %12 = vector.broadcast %cst_6 : f32 to vector<8x1xf32>
    %13 = arith.mulf %11, %12 : vector<8x1xf32>
    %cst_7 = arith.constant 9.99999974E-6 : f32
    %14 = vector.broadcast %cst_7 : f32 to vector<8x1xf32>
    %15 = arith.addf %13, %14 : vector<8x1xf32>
    %16 = math.rsqrt %15 : vector<8x1xf32>
    %c0_8 = arith.constant 0 : index
    %c0_9 = arith.constant 0 : index
    %17 = vector.load %arg3[%c0_8, %c0_9] : memref<8x2xf32, #tpu.memory_space<vmem>>, vector<8x2xf32>
    %18 = vector.extract_strided_slice %17 {offsets = [0, 0], sizes = [8, 1], strides = [1, 1]} : vector<8x2xf32> to vector<8x1xf32>
    %19 = arith.mulf %18, %16 : vector<8x1xf32>
    %20 = vector.broadcast %19 : vector<8x1xf32> to vector<8x2048xf32>
    %21 = arith.mulf %8, %20 : vector<8x2048xf32>
    %22 = vector.extract_strided_slice %17 {offsets = [0, 1], sizes = [8, 1], strides = [1, 1]} : vector<8x2xf32> to vector<8x1xf32>
    %23 = vector.broadcast %22 : vector<8x1xf32> to vector<8x2048xf32>
    %24 = arith.addf %21, %23 : vector<8x2048xf32>
    %cst_10 = arith.constant 0.000000e+00 : f32
    %25 = vector.broadcast %cst_10 : f32 to vector<8x2048xf32>
    %26 = arith.maximumf %24, %25 : vector<8x2048xf32>
    %27 = arith.truncf %26 : vector<8x2048xf32> to vector<8x2048xbf16>
    %c0_11 = arith.constant 0 : index
    %c0_12 = arith.constant 0 : index
    %28 = vector.load %arg4[%c0_11, %c0_12] : memref<8x2048xbf16, #tpu.memory_space<vmem>>, vector<8x2048xbf16>
    tpu.vector_store %arg4[%c0_11, %c0_12], %27 {strides = array<i32>} : memref<8x2048xbf16, #tpu.memory_space<vmem>>, vector<8x2048xbf16>,
    return
  }
  func.func @transform_0(%arg0: i32) -> (i32, i32) {
    %c0_i32 = arith.constant 0 : i32
    %c0_i32_0 = arith.constant 0 : i32
    return %arg0, %c0_i32 : i32, i32
  }
  func.func @transform_1(%arg0: i32) -> (i32, i32) {
    %c0_i32 = arith.constant 0 : i32
    %c0_i32_0 = arith.constant 0 : i32
    %c0_i32_1 = arith.constant 0 : i32
    return %c0_i32, %c0_i32_0 : i32, i32
  }
  func.func @transform_2(%arg0: i32) -> (i32, i32) {
    %c0_i32 = arith.constant 0 : i32
    %c0_i32_0 = arith.constant 0 : i32
    return %arg0, %c0_i32 : i32, i32
  }
  func.func @transform_3(%arg0: i32) -> (i32, i32) {
    %c0_i32 = arith.constant 0 : i32
    %c0_i32_0 = arith.constant 0 : i32
    return %arg0, %c0_i32 : i32, i32
  }
}

module attributes {stable_mosaic.version = 11 : i64} {
  func.func @_conv_tanh_kernel(%arg0: i32, %arg1: memref<3x128xbf16, #tpu.memory_space<vmem>>, %arg2: memref<128x4096xbf16, #tpu.memory_space<vmem>>, %arg3: memref<3x4096xf32, #tpu.memory_space<vmem>>) attributes {dimension_semantics = [#tpu.dimension_semantics<parallel>], iteration_bounds = array<i64: 2>, scalar_prefetch = 0 : i64, scratch_operands = 0 : i64, tpu.core_type = #tpu.core_type<tc>, window_params = [{pipeline_mode = #tpu.pipeline_mode<synchronous>, transform_indices = @transform_0, window_bounds = array<i64: 3, 128>}, {transform_indices = @transform_1, window_bounds = array<i64: 128, 4096>}, {transform_indices = @transform_2, window_bounds = array<i64: 3, 4096>}]} {
    %c0 = arith.constant 0 : index
    %c0_0 = arith.constant 0 : index
    %0 = vector.load %arg1[%c0, %c0_0] : memref<3x128xbf16, #tpu.memory_space<vmem>>, vector<3x128xbf16>
    %c0_1 = arith.constant 0 : index
    %c0_2 = arith.constant 0 : index
    %1 = vector.load %arg2[%c0_1, %c0_2] : memref<128x4096xbf16, #tpu.memory_space<vmem>>, vector<128x4096xbf16>
    %cst = arith.constant dense<0.000000e+00> : vector<3x4096xf32>
    %2 = tpu.matmul %0, %1, %cst {dimension_numbers = #tpu.dot_dimension_numbers<[1], [0], [0], [1], [0, 0, 1, 1], [], []>} : vector<3x128xbf16>, vector<128x4096xbf16>, vector<3x4096xf32> -> vector<3x4096xf32>
    %3 = math.tanh %2 : vector<3x4096xf32>
    %c0_3 = arith.constant 0 : index
    %c0_4 = arith.constant 0 : index
    %4 = vector.load %arg3[%c0_3, %c0_4] : memref<3x4096xf32, #tpu.memory_space<vmem>>, vector<3x4096xf32>
    tpu.vector_store %arg3[%c0_3, %c0_4], %3 {strides = array<i32>} : memref<3x4096xf32, #tpu.memory_space<vmem>>, vector<3x4096xf32>,
    return
  }
  func.func @transform_0(%arg0: i32) -> (i32, i32) {
    %c0_i32 = arith.constant 0 : i32
    %c0_i32_0 = arith.constant 0 : i32
    %c0_i32_1 = arith.constant 0 : i32
    return %c0_i32, %c0_i32_0 : i32, i32
  }
  func.func @transform_1(%arg0: i32) -> (i32, i32) {
    %c0_i32 = arith.constant 0 : i32
    %c0_i32_0 = arith.constant 0 : i32
    return %c0_i32, %arg0 : i32, i32
  }
  func.func @transform_2(%arg0: i32) -> (i32, i32) {
    %c0_i32 = arith.constant 0 : i32
    %c0_i32_0 = arith.constant 0 : i32
    return %c0_i32, %arg0 : i32, i32
  }
}

</mosaic_0001>

<bundles_post_ra>
// kernel: generator_forward.5
= control target key start
LH: loop header
LB: loop body
LE: loop exit
PB: predicated region body
PF: predicated region fallthrough
CT: control target
= control target key end

     0   :  { %8 = vsyncpa [#allocation3], 0  ;;  %s1083_s0 = inlined_call_operand.hbm [shape: bf16[64,256], index: 0, kind: input, shape index: {}]   ;;  %s1084_s1 = inlined_call_operand.vmem [shape: bf16[256,32], index: 1, kind: input, shape index: {}]   ;;  %s1085_s2 = inlined_call_operand.vmem [shape: f32[64,2], index: 2, kind: input, shape index: {}]   ;;  %s1086_s3 = inlined_call_operand.vmem [shape: bf16[64,32], index: 3, kind: output, shape index: {}]  }
   0x1   :  { %10 = vsyncpa [#allocation3 + $0x1], 0  ;;  %s884_s12 = smov 0   ;;  %s886_s13 = smov 0  }
   0x2   :  { %s888_s14 = smov 0   ;;  %s890_s15 = smov 0  }
   0x3 LB: > { %s627_s16 = sadd.s32 4294967295, %s857_s15   ;;  %s904_s17 = sadd.s32 1, %s857_s15   ;;  %s857_s15 = sphi %s890_s15, %s1095_s15   ;;  %s853_s14 = sphi %s888_s14, %s1094_s14   ;;  %s849_s13 = sphi %s886_s13, %s1093_s13   ;;  %s845_s12 = sphi %s884_s12, %s1092_s12  }
   0x4   : > { %s20_s18 = ssub.s32 %s857_s15, %s904_s17  ;;  %s23_s19 = sadd.s32 1, %s853_s14 }
   0x5   : > { %p21_p0 = scmp.eq.s32.totalorder %s20_s18, 0  ;;  %p30_p1 = scmp.ne.s32.totalorder %s853_s14, %s849_s13 }
   0x6   : > { %p31_p2 = scmp.eq.s32.totalorder %s857_s15, 0  ;;  %p36_p3 = scmp.ne.s32.totalorder %s849_s13, %s845_s12 }
   0x7   : > { %s914_s20 = scalar_select %p21_p0, %s853_s14, %s23_s19  }
   0x8   : > { %p32_p4 = por %p31_p2, %p30_p1  ;;  %p37_p5 = scmp.eq.s32.totalorder %s627_s16, 0 }
   0x9   : > { %p723_p6 = scmp.lt.s32.totalorder %s857_s15, 2  ;;  %s136_s22 = sand.u32 1, %s853_s14  }
   0xa   : > { %p919_p7 = por %p37_p5, %p36_p3  ;;  %s631_s23 = sshll.u32 %s136_s22, 5 }
   0xb   : > { %s668_s24 = sshll.u32 %s857_s15, 9  ;;  %s140_s28 = scalar_lea.vmem [#allocation2], %s631_s23 }
   0xc   : > { %s1088_s21 = scalar_select %p919_p7, 1, 0 }
   0xd   : > { %s928_s27 = scalar_lea.hbm %s1083_s0, %s668_s24  ;;  %s148_s29 = sshll.u32 %s140_s28, 4  ;;  %s930_s29 = int_to_ptr.vmem [resolvable:$true] %s148_s29 }
   0xe   : > { %p932_p8 = pnand %p723_p6, %p32_p4  ;;  %s937_s4 = scalar_lea.sflag [#allocation3], %s136_s22 }
   0xf   : > { %s795_s5 = scalar_lea.hbm %s928_s27, 512  ;;  %s800_s8 = scalar_lea.hbm %s1083_s0, 1024 }
  0x10   : > { %p796_p10 = scmp.ne.s32.totalorder %s928_s27, %s795_s5  ;;  %p797_p11 = pneg %p932_p8 }
  0x11   : > { %p801_p0 = scmp.lt.s32.totalorder %s928_s27, %s1083_s0  ;;  %p802_p1 = scmp.lt.s32.totalorder %s800_s8, %s795_s5 }
  0x12   : > { %p798_p12 = pnand %p797_p11, %p796_p10 }
  0x13   : > { %p803_p2 = por %p802_p1, %p801_p0 }
  0x14   : > { %p799_p13 = pneg %p798_p12 }
  0x16   : > { %p804_p3 = pnand %p803_p2, %p799_p13 }
  0x18   : > { %807 = shalt.err (!%p804_p3)
}
  0x19   : > { %s808_s11 = scalar_lea.vmem %s930_s29, 512  ;;  %s859_s12 = smov [#allocation2]  }
  0x1a   : > { %p809_p4 = scmp.ne.s32.totalorder %s930_s29, %s808_s11  ;;  %s813_s18 = sshll.u32 %s859_s12, 4  ;;  %s814_s18 = int_to_ptr.vmem [resolvable:$false] %s813_s18 }
  0x1b   : > { %s815_s19 = scalar_lea.vmem %s814_s18, 1024  ;;  %p816_p10 = scmp.lt.s32.totalorder %s930_s29, %s814_s18 }
  0x1c   : > { %p811_p5 = pnand %p809_p4, %p797_p11  ;;  %p817_p12 = scmp.lt.s32.totalorder %s815_s19, %s808_s11 }
  0x1e   : > { %p812_p6 = pneg %p811_p5  ;;  %p818_p9 = por %p817_p12, %p816_p10 }
  0x20   : > { %p819_p7 = pnand %p818_p9, %p812_p6 }
  0x22   : > { %822 = shalt.err (!%p819_p7)
}
  0x23   : > { %s860_s22 = smov 128   ;;  %s861_s23 = smov 8  }
  0x24   : > { %722 = dma.hbm_to_vmem [thread:$0]  (!%p932_p8), %s928_s27, 512, %s930_s29, %s937_s4, %s860_s22, %s860_s22, %s861_s23  }
  0x25   : > { %p165_p11 = scmp.lt.s32.totalorder %s857_s15, 3  ;;  %p1090_p13 = scmp.ge.s32.totalorder %s857_s15, 1 }
  0x27   : > { %p166_p0 = pnand %p1090_p13, %p165_p11 }
  0x28   : > { %s171_s24 = sand.u32 (!%p166_p0), 1, %s849_s13   ;;  %p1091_p7 = scmp.ne.s32.totalorder (!%p166_p0), %s1088_s21, 0 }
  0x29   : > { %169 = sbr.rel (%p166_p0) target bundleno = 729 (0x2d9), region = 32  ;;  %s636_s25 = sshll.u32 (!%p166_p0), %s171_s24, 5 }
  0x2a   : > { %s172_s26 = scalar_lea.sflag (!%p166_p0), [#allocation3], %s171_s24  ;;  %s962_s28 = scalar_lea.vmem (!%p166_p0), [#allocation2], %s636_s25 }
  0x2e   : > { %840 = dma.done.wait (%p1091_p7), %s172_s26, 512  }
  0x2f   : > { %842 = vsyncadd (%p1091_p7), %s172_s26, 4294966784  ;;  %v765_v0 = vld [vmem:[%s1084_s1 + $0x78] sm:$0xff]   ;;  %v767_v2 = vld [vmem:[%s1084_s1 + $0x70] sm:$0xff]   ;;  %vm418_vm0 = vcmask 261120   ;;  %v862_v56 = vmov 1   ;;  %v863_v60 = vmov 0  }
  0x30   : > { %v766_v1 = vld [vmem:[%s1084_s1 + $0x38] sm:$0xff]   ;;  %673 = vmatprep.subr.bf16.mxu0 %v765_v0  ;;  %701 = vmatprep.subr.bf16.mxu1 %v765_v0  ;;  %v768_v3 = vld [vmem:[%s1084_s1 + $0x30] sm:$0xff]   ;;  %v769_v4 = vld [vmem:[%s1084_s1 + $0x68] sm:$0xff]   ;;  %vm543_vm1 = vcmask 257024  }
  0x31   : > { %674 = vmatpush3.bf16.msra.mxu0 %v766_v1  ;;  %709 = vmatpush3.bf16.msra.mxu1 %v766_v1  ;;  %v770_v5 = vld [vmem:[%s1084_s1 + $0x28] sm:$0xff]   ;;  %v771_v6 = vld [vmem:[%s1084_s1 + $0x60] sm:$0xff]   ;;  %v773_v8 = vld [vmem:[%s1084_s1 + $0x58] sm:$0xff]  }
  0x32   : > { %675 = vmatprep.subr.bf16.mxu0 %v767_v2  ;;  %702 = vmatprep.subr.bf16.mxu1 %v767_v2  ;;  %v772_v7 = vld [vmem:[%s1084_s1 + $0x20] sm:$0xff]   ;;  %v774_v9 = vld [vmem:[%s1084_s1 + $0x18] sm:$0xff]   ;;  %v775_v10 = vld [vmem:[%s1084_s1 + $0x50] sm:$0xff]  }
  0x33   : > { %v783_v11 = vld [vmem:[%s962_s28 + $0x4] ss:$8 sps:$4 sm:$0xff]   ;;  %v786_v12 = vld [vmem:[%s962_s28 + $0x14] ss:$8 sps:$4 sm:$0xff]   ;;  %v781_v18 = vld [vmem:[%s962_s28] ss:$8 sps:$4 sm:$0xff]   ;;  %761 = vset.pattern.permute.xlu1 %v862_v56  ;;  %760 = vset.pattern.permute.xlu0 %v863_v60 }
  0x34   : > { %v776_v13 = vld [vmem:[%s1084_s1 + $0x10] sm:$0xff]   ;;  %v777_v14 = vld [vmem:[%s1084_s1 + $0x48] sm:$0xff]   ;;  %401 = vmatprep.mubr.bf16.mxu0 %v783_v11  ;;  %409 = vmatprep.mubr.bf16.mxu1 %v786_v12  ;;  %v779_v16 = vld [vmem:[%s1084_s1 + $0x40] sm:$0xff]  }
  0x35   : > { %676 = vmatpush3.bf16.msra.mxu0 %v768_v3  ;;  %710 = vmatpush3.bf16.msra.mxu1 %v768_v3  ;;  %v778_v15 = vld [vmem:[%s1084_s1 + $0x8] sm:$0xff]   ;;  %v780_v17 = vld [vmem:[%s1084_s1] sm:$0xff]   ;;  %v784_v19 = vld [vmem:[%s962_s28 + $0x10] ss:$8 sps:$4 sm:$0xff]   ;;  %s637_s28 = sshll.u32 %s627_s16, 2 }
  0x36   : > { %677 = vmatprep.subr.bf16.mxu0 %v769_v4  ;;  %703 = vmatprep.subr.bf16.mxu1 %v769_v4  ;;  %p205_p8 = scmp.lt.s32.totalorder %s637_s28, 7 }
  0x38   : > { %s1097_s28 = smov (!%p205_p8, %s637_s28), 7 }
  0x39   : > { %678 = vmatpush3.bf16.msra.mxu0 %v770_v5  ;;  %711 = vmatpush3.bf16.msra.mxu1 %v770_v5  ;;  %s638_s12 = sshll.u32 %s1097_s28, 3  ;;  %s640_s15 = sshll.u32 %s1097_s28, 2 }
  0x3a   : > { %679 = vmatprep.subr.bf16.mxu0 %v771_v6  ;;  %704 = vmatprep.subr.bf16.mxu1 %v771_v6  ;;  %s1052_s22 = scalar_lea.vmem %s1085_s2, %s638_s12  ;;  %s214_s24 = scalar_lea.vmem %s1086_s3, %s640_s15 }
  0x3b   : > { %v467_v57 = vld [vmem:[%s1052_s22] sm:$0xff]  ;;  %v468_v58 = vld [vmem:[%s1052_s22 + $0x8] sm:$0xff]  ;;  %v469_v59 = vld [vmem:[%s1052_s22 + $0x10] sm:$0xff] }
  0x3d   : > { %680 = vmatpush3.bf16.msra.mxu0 %v772_v7  ;;  %712 = vmatpush3.bf16.msra.mxu1 %v772_v7 }
  0x3e   : > { %681 = vmatprep.subr.bf16.mxu0 %v773_v8  ;;  %705 = vmatprep.subr.bf16.mxu1 %v773_v8 }
  0x41   : > { %682 = vmatpush3.bf16.msra.mxu0 %v774_v9  ;;  %713 = vmatpush3.bf16.msra.mxu1 %v774_v9 }
  0x42   : > { %683 = vmatprep.subr.bf16.mxu0 %v775_v10  ;;  %706 = vmatprep.subr.bf16.mxu1 %v775_v10 }
  0x45   : > { %684 = vmatpush3.bf16.msra.mxu0 %v776_v13  ;;  %714 = vmatpush3.bf16.msra.mxu1 %v776_v13 }
  0x46   : > { %685 = vmatprep.subr.bf16.mxu0 %v777_v14  ;;  %707 = vmatprep.subr.bf16.mxu1 %v777_v14 }
  0x49   : > { %686 = vmatpush3.bf16.msra.mxu0 %v778_v15  ;;  %715 = vmatpush3.bf16.msra.mxu1 %v778_v15 }
  0x4a   : > { %687 = vmatprep.subr.bf16.mxu0 %v779_v16  ;;  %708 = vmatprep.subr.bf16.mxu1 %v779_v16  ;;  %v470_v16 = vld [vmem:[%s1052_s22 + $0x18] sm:$0xff] }
  0x4d   : > { %688 = vmatpush3.bf16.msra.mxu0 %v780_v17  ;;  %716 = vmatpush3.bf16.msra.mxu1 %v780_v17 }
  0x50   : > { %402 = vmatmul.mubr.bf16.vlgmr.msra.gmra.mxu0 %v781_v18  ;;  %410 = vmatmul.mubr.bf16.vlgmr.msra.gmra.mxu1 %v784_v19 }
 0x110   : > { %v689_v20 = vpop.f32.mrf.mxu0  ;;  %v695_v21 = vpop.f32.mrf.mxu1 }
 0x112   : > { %v690_v22 = vpop.f32.mrf.mxu0  ;;  %v696_v23 = vpop.f32.mrf.mxu1 }
 0x113   : > { %v691_v24 = vadd.f32 %v690_v22, %v689_v20  ;;  %v697_v25 = vadd.f32 %v696_v23, %v695_v21 }
 0x114   : > { %v692_v26 = vpop.f32.mrf.mxu0  ;;  %v698_v27 = vpop.f32.mrf.mxu1 }
 0x115   : > { %v425_v28 = vsel %vm418_vm0, %v697_v25, 0.0  ;;  %v419_v29 = vsel %vm418_vm0, %v691_v24, 0.0 }
 0x116   : > { %v699_v30 = vpop.f32.mrf.mxu1  ;;  %426 = vadd.xlane.f32.xlu1 %v425_v28  ;;  %v693_v31 = vpop.f32.mrf.mxu0  ;;  %420 = vadd.xlane.f32.xlu0 %v419_v29 }
 0x117   : > { %v700_v32 = vadd.f32 %v699_v30, %v698_v27  ;;  %v694_v33 = vadd.f32 %v693_v31, %v692_v26 }
 0x119   : > { %v428_v34 = vsel %vm418_vm0, %v700_v32, 0.0  ;;  %v422_v35 = vsel %vm418_vm0, %v694_v33, 0.0 }
 0x11a   : > { %429 = vadd.xlane.f32.xlu1 %v428_v34  ;;  %423 = vadd.xlane.f32.xlu0 %v422_v35 }
 0x19f   : > { %v427_v36 = vpop.xlane.xlu1 %426  ;;  %v421_v37 = vpop.xlane.xlu0 %420 }
 0x1a0   : > { %v433_v38 = vmul.f32 0.03125, %v427_v36  ;;  %v431_v39 = vmul.f32 0.03125, %v421_v37 }
 0x1a2   : > { %v1024_v40 = vsub.f32 %v697_v25, %v433_v38  ;;  %v1026_v41 = vsub.f32 %v691_v24, %v431_v39 }
 0x1a3   : > { %v430_v42 = vpop.xlane.xlu1 %429  ;;  %v424_v43 = vpop.xlane.xlu0 %423 }
 0x1a4   : > { %v434_v44 = vmul.f32 0.03125, %v430_v42  ;;  %v432_v45 = vmul.f32 0.03125, %v424_v43  ;;  %v439_v46 = vmul.f32 %v1026_v41, %v1026_v41  ;;  %v441_v50 = vmul.f32 %v1024_v40, %v1024_v40 }
 0x1a6   : > { %v1030_v47 = vsub.f32 %v700_v32, %v434_v44  ;;  %v1032_v48 = vsub.f32 %v694_v33, %v432_v45  ;;  %v443_v49 = vsel %vm418_vm0, %v439_v46, 0.0  ;;  %v449_v52 = vsel %vm418_vm0, %v441_v50, 0.0 }
 0x1a7   : > { %444 = vadd.xlane.f32.xlu0 %v443_v49 }
 0x1a8   : > { %v440_v51 = vmul.f32 %v1032_v48, %v1032_v48  ;;  %v442_v54 = vmul.f32 %v1030_v47, %v1030_v47 }
 0x1aa   : > { %v446_v53 = vsel %vm418_vm0, %v440_v51, 0.0  ;;  %v452_v55 = vsel %vm418_vm0, %v442_v54, 0.0 }
 0x1ab   : > { %450 = vadd.xlane.f32.xlu0 %v449_v52  ;;  %447 = vadd.xlane.f32.xlu1 %v446_v53 }
 0x1af   : > { %453 = vadd.xlane.f32.xlu1 %v452_v55 }
 0x1c0   : > { %501 = vperm.xlu1 %761, %v467_v57  }
 0x1c4   : > { %506 = vperm.xlu1 %761, %v468_v58  }
 0x1c8   : > { %511 = vperm.xlu1 %761, %v469_v59  }
 0x1cc   : > { %762 = vset.pattern.permute.xlu1 %v863_v60 }
 0x230   : > { %v445_v61 = vpop.xlane.xlu0 %444 }
 0x231   : > { %v455_v62 = vmul.f32 0.03125, %v445_v61 }
 0x233   : > { %v459_v63 = vadd.f32 1e-05, %v455_v62 }
 0x234   : > { %v448_v0 = vpop.xlane.xlu1 %447  ;;  %v451_v1 = vpop.xlane.xlu0 %450 }
 0x235   : > { %787 = vrsqrt.f32 %v459_v63  ;;  %v456_v2 = vmul.f32 0.03125, %v448_v0  ;;  %v457_v3 = vmul.f32 0.03125, %v451_v1 }
 0x237   : > { %v461_v4 = vadd.f32 1e-05, %v457_v3  ;;  %v460_v5 = vadd.f32 1e-05, %v456_v2 }
 0x238   : > { %v454_v6 = vpop.xlane.xlu1 %453 }
 0x239   : > { %v458_v7 = vmul.f32 0.03125, %v454_v6  ;;  %789 = vrsqrt.f32 %v461_v4 }
 0x23a   : > { %791 = vrsqrt.f32 %v460_v5 }
 0x23b   : > { %v462_v8 = vadd.f32 1e-05, %v458_v7 }
 0x23c   : > { %v502_v18 = vpop.permute.xlu1 %501 }
 0x23d   : > { %793 = vrsqrt.f32 %v462_v8 }
 0x240   : > { %v507_v19 = vpop.permute.xlu1 %506 }
 0x242   : > { %v788_v9 = vpop.eup %787 }
 0x243   : > { %v471_v10 = vmul.f32 %v788_v9, %v467_v57 }
 0x244   : > { %v512_v21 = vpop.permute.xlu1 %511 }
 0x245   : > { %477 = vperm.xlu0 %760, %v471_v10  }
 0x246   : > { %v790_v11 = vpop.eup %789 }
 0x247   : > { %v473_v12 = vmul.f32 %v790_v11, %v469_v59  ;;  %v792_v13 = vpop.eup %791 }
 0x248   : > { %v472_v14 = vmul.f32 %v792_v13, %v468_v58 }
 0x249   : > { %764 = vset.pattern.permute.xlu0 %v862_v56  ;;  %487 = vperm.xlu1 %762, %v473_v12  }
 0x24a   : > { %v794_v15 = vpop.eup %793 }
 0x24b   : > { %v474_v17 = vmul.f32 %v794_v15, %v470_v16 }
 0x24d   : > { %482 = vperm.xlu1 %762, %v472_v14  }
 0x251   : > { %492 = vperm.xlu1 %762, %v474_v17  }
 0x255   : > { %763 = vset.pattern.permute.xlu1 %v862_v56 }
 0x256   : > { %516 = vperm.xlu1 %763, %v470_v16  }
 0x2c0   : > { %v478_v20 = vpop.permute.xlu0 %477 }
 0x2c1   : > { %v495_v22 = vmul.f32 %v478_v20, %v1026_v41 }
 0x2c3   : > { %v519_v23 = vadd.f32 %v502_v18, %v495_v22 }
 0x2c4   : > { %v488_v25 = vpop.permute.xlu1 %487 }
 0x2c5   : > { %v523_v24 = vmax.f32 %v519_v23, 0.0  ;;  %v497_v26 = vmul.f32 %v488_v25, %v1024_v40 }
 0x2c7   : > { %v669_v27 = vpack.c.bf16 %v523_v24, %v523_v24  ;;  %v521_v28 = vadd.f32 %v512_v21, %v497_v26 }
 0x2c8   : > { %v483_v29 = vpop.permute.xlu1 %482 }
 0x2c9   : > { %544 = vst.msk [vmem:[%s214_s24] sm:$0xf] %vm543_vm1, %v669_v27  ;;  %v496_v30 = vmul.f32 %v483_v29, %v1032_v48  ;;  %v525_v32 = vmax.f32 %v521_v28, 0.0 }
 0x2cb   : > { %v520_v31 = vadd.f32 %v507_v19, %v496_v30  ;;  %v671_v36 = vpack.c.bf16 %v525_v32, %v525_v32 }
 0x2cc   : > { %v493_v33 = vpop.permute.xlu1 %492 }
 0x2cd   : > { %v524_v34 = vmax.f32 %v520_v31, 0.0  ;;  %v498_v37 = vmul.f32 %v493_v33, %v1030_v47  ;;  %546 = vst.msk [vmem:[%s214_s24 + $0x8] sm:$0xf] %vm543_vm1, %v671_v36 }
 0x2cf   : > { %v670_v35 = vpack.c.bf16 %v524_v34, %v524_v34 }
 0x2d1   : > { %545 = vst.msk [vmem:[%s214_s24 + $0x4] sm:$0xf] %vm543_vm1, %v670_v35  ;;  %v517_v38 = vpop.permute.xlu1 %516 }
 0x2d2   : > { %v522_v39 = vadd.f32 %v517_v38, %v498_v37 }
 0x2d4   : > { %v526_v40 = vmax.f32 %v522_v39, 0.0 }
 0x2d6   : > { %v672_v41 = vpack.c.bf16 %v526_v40, %v526_v40 }
 0x2d8   : > { %547 = vst.msk [vmem:[%s214_s24 + $0xc] sm:$0xf] %vm543_vm1, %v672_v41 }
 0x2d9 PF: > { %p13_p9 = scmp.ge.s32.totalorder %s904_s17, 4   ;;  %s1092_s12 = smov %s849_s13 }
 0x2da   : > { %s1093_s13 = smov %s853_s14  ;;  %s1094_s14 = smov %s914_s20 }
 0x2db   : > { %s1095_s15 = smov %s904_s17  ;;  %15 = sbr.rel (!%p13_p9) target bundleno = 3 (0x3), region = 75 }
 0x2e0   :  { %570 = vsyncpa [#allocation3], 1 }
 0x2e1   :  { %572 = vsyncpa [#allocation3 + $0x1], 1 }

// kernel: generator_forward.6
= control target key start
LH: loop header
LB: loop body
LE: loop exit
PB: predicated region body
PF: predicated region fallthrough
CT: control target
= control target key end

     0   :  { %s1349_s12 = smov 0   ;;  %s1578_s0 = inlined_call_operand.vmem [shape: bf16[32,1024], index: 0, kind: input, shape index: {}]   ;;  %s1579_s1 = inlined_call_operand.vmem [shape: bf16[1024,128], index: 1, kind: input, shape index: {}]   ;;  %s1580_s2 = inlined_call_operand.vmem [shape: f32[32,2], index: 2, kind: input, shape index: {}]   ;;  %s1581_s3 = inlined_call_operand.vmem [shape: bf16[32,128], index: 3, kind: output, shape index: {}]  }
   0x1 LB: > { %s1052_s13 = sadd.s32 4294967295, %s1325_s12   ;;  %p1056_p0 = scmp.ge.s32.totalorder %s1325_s12, 1  ;;  %s1325_s12 = sphi %s1349_s12, %s13_s12  }
   0x2   : > { %p150_p1 = scmp.lt.s32.totalorder %s1325_s12, 3 }
   0x4   : > { %p151_p2 = pnand %p1056_p0, %p150_p1 }
   0x5   : > { %s1057_s21 = sshll.u32 (!%p151_p2), %s1052_s13, 1 }
   0x6   : > { %154 = sbr.rel (%p151_p2) target bundleno = 720 (0x2d0), region = 32  ;;  %p181_p3 = scmp.lt.s32.totalorder (!%p151_p2), %s1057_s21, 3 }
   0xb   : > { %v1251_v0 = vld [vmem:[%s1579_s1 + $0x78] sm:$0xff]   ;;  %v1255_v4 = vld [vmem:[%s1579_s1 + $0x70] sm:$0xff]   ;;  %v1259_v8 = vld [vmem:[%s1579_s1 + $0x68] sm:$0xff]   ;;  %s1583_s21 = smov (!%p181_p3, %s1057_s21), 3 }
   0xc   : > { %v1252_v1 = vld [vmem:[%s1579_s1 + $0xf8] sm:$0xff]   ;;  %1148 = vmatprep.subr.bf16.mxu0 %v1251_v0  ;;  %v1256_v5 = vld [vmem:[%s1579_s1 + $0xf0] sm:$0xff]   ;;  %v1260_v9 = vld [vmem:[%s1579_s1 + $0xe8] sm:$0xff]   ;;  %s1140_s18 = sshll.u32 %s1583_s21, 5  ;;  %s1063_s27 = sshll.u32 %s1583_s21, 2 }
   0xd   : > { %v1253_v2 = vld [vmem:[%s1579_s1 + $0x38] sm:$0xff]   ;;  %1170 = vmatprep.subr.bf16.mxu1 %v1252_v1  ;;  %v1257_v6 = vld [vmem:[%s1579_s1 + $0x30] sm:$0xff]   ;;  %v1261_v10 = vld [vmem:[%s1579_s1 + $0x28] sm:$0xff]   ;;  %s1455_s28 = scalar_lea.vmem %s1578_s0, %s1140_s18  ;;  %s197_s30 = scalar_lea.vmem %s1581_s3, %s1063_s27 }
   0xe   : > { %v1254_v3 = vld [vmem:[%s1579_s1 + $0xb8] sm:$0xff]   ;;  %1149 = vmatpush3.bf16.msra.mxu0 %v1253_v2  ;;  %v1258_v7 = vld [vmem:[%s1579_s1 + $0xb0] sm:$0xff]   ;;  %v1262_v11 = vld [vmem:[%s1579_s1 + $0xa8] sm:$0xff]  }
   0xf   : > { %1171 = vmatpush3.bf16.msra.mxu1 %v1254_v3  ;;  %1150 = vmatprep.subr.bf16.mxu0 %v1255_v4  ;;  %v1263_v12 = vld [vmem:[%s1579_s1 + $0x60] sm:$0xff]   ;;  %v1267_v16 = vld [vmem:[%s1579_s1 + $0x58] sm:$0xff]   ;;  %v1271_v20 = vld [vmem:[%s1579_s1 + $0x50] sm:$0xff]  }
  0x10   : > { %1172 = vmatprep.subr.bf16.mxu1 %v1256_v5  ;;  %v1264_v13 = vld [vmem:[%s1579_s1 + $0xe0] sm:$0xff]   ;;  %v1268_v17 = vld [vmem:[%s1579_s1 + $0xd8] sm:$0xff]   ;;  %v1272_v21 = vld [vmem:[%s1579_s1 + $0xd0] sm:$0xff]  }
  0x11   : > { %v1265_v14 = vld [vmem:[%s1579_s1 + $0x20] sm:$0xff]   ;;  %v1269_v18 = vld [vmem:[%s1579_s1 + $0x18] sm:$0xff]   ;;  %v1273_v22 = vld [vmem:[%s1579_s1 + $0x10] sm:$0xff]  }
  0x12   : > { %1151 = vmatpush3.bf16.msra.mxu0 %v1257_v6  ;;  %v1266_v15 = vld [vmem:[%s1579_s1 + $0xa0] sm:$0xff]   ;;  %v1270_v19 = vld [vmem:[%s1579_s1 + $0x98] sm:$0xff]   ;;  %v1274_v23 = vld [vmem:[%s1579_s1 + $0x90] sm:$0xff]  }
  0x13   : > { %1173 = vmatpush3.bf16.msra.mxu1 %v1258_v7  ;;  %1152 = vmatprep.subr.bf16.mxu0 %v1259_v8  ;;  %v1275_v24 = vld [vmem:[%s1579_s1 + $0x48] sm:$0xff]   ;;  %v1279_v28 = vld [vmem:[%s1579_s1 + $0x40] sm:$0xff]   ;;  %v1283_v40 = vld [vmem:[%s1579_s1 + $0x178] sm:$0xff]  }
  0x14   : > { %1174 = vmatprep.subr.bf16.mxu1 %v1260_v9  ;;  %v1276_v25 = vld [vmem:[%s1579_s1 + $0xc8] sm:$0xff]   ;;  %v1280_v29 = vld [vmem:[%s1579_s1 + $0xc0] sm:$0xff]   ;;  %v1284_v41 = vld [vmem:[%s1579_s1 + $0x1f8] sm:$0xff]  }
  0x15   : > { %v1277_v26 = vld [vmem:[%s1579_s1 + $0x8] sm:$0xff]   ;;  %v1281_v30 = vld [vmem:[%s1579_s1] sm:$0xff]   ;;  %v1285_v42 = vld [vmem:[%s1579_s1 + $0x138] sm:$0xff]  }
  0x16   : > { %1153 = vmatpush3.bf16.msra.mxu0 %v1261_v10  ;;  %v1278_v27 = vld [vmem:[%s1579_s1 + $0x88] sm:$0xff]   ;;  %v1282_v31 = vld [vmem:[%s1579_s1 + $0x80] sm:$0xff]   ;;  %v1286_v43 = vld [vmem:[%s1579_s1 + $0x1b8] sm:$0xff]  }
  0x17   : > { %1175 = vmatpush3.bf16.msra.mxu1 %v1262_v11  ;;  %1154 = vmatprep.subr.bf16.mxu0 %v1263_v12  ;;  %v200_v32 = vld [vmem:[%s1455_s28] sm:$0xff]  ;;  %v201_v34 = vld [vmem:[%s1455_s28 + $0x8] sm:$0xff]  ;;  %v1287_v44 = vld [vmem:[%s1579_s1 + $0x170] sm:$0xff]  }
  0x18   : > { %1176 = vmatprep.subr.bf16.mxu1 %v1264_v13  ;;  %v204_v33 = vld [vmem:[%s1455_s28 + $0x20] sm:$0xff]  ;;  %v205_v37 = vld [vmem:[%s1455_s28 + $0x28] sm:$0xff]  ;;  %v1288_v45 = vld [vmem:[%s1579_s1 + $0x1f0] sm:$0xff]  }
  0x19   : > { %v1064_v35 = vcombine.low %v200_v32, %v204_v33  ;;  %v1065_v36 = vcombine.high %v200_v32, %v204_v33  ;;  %v1066_v38 = vcombine.low %v201_v34, %v205_v37  ;;  %v1067_v39 = vcombine.high %v201_v34, %v205_v37  ;;  %v1289_v46 = vld [vmem:[%s1579_s1 + $0x130] sm:$0xff]   ;;  %v1291_v48 = vld [vmem:[%s1579_s1 + $0x168] sm:$0xff]   ;;  %v1295_v52 = vld [vmem:[%s1579_s1 + $0x160] sm:$0xff]  }
  0x1a   : > { %1155 = vmatpush3.bf16.msra.mxu0 %v1265_v14  ;;  %v1290_v47 = vld [vmem:[%s1579_s1 + $0x1b0] sm:$0xff]   ;;  %v1292_v49 = vld [vmem:[%s1579_s1 + $0x1e8] sm:$0xff]   ;;  %v1296_v53 = vld [vmem:[%s1579_s1 + $0x1e0] sm:$0xff]  }
  0x1b   : > { %1177 = vmatpush3.bf16.msra.mxu1 %v1266_v15  ;;  %1156 = vmatprep.subr.bf16.mxu0 %v1267_v16  ;;  %v1293_v50 = vld [vmem:[%s1579_s1 + $0x128] sm:$0xff]   ;;  %v1297_v54 = vld [vmem:[%s1579_s1 + $0x120] sm:$0xff]   ;;  %v1299_v56 = vld [vmem:[%s1579_s1 + $0x158] sm:$0xff]  }
  0x1c   : > { %1178 = vmatprep.subr.bf16.mxu1 %v1268_v17  ;;  %792 = vmatprep.mubr.bf16.mxu0 %v1065_v36  ;;  %v1294_v51 = vld [vmem:[%s1579_s1 + $0x1a8] sm:$0xff]   ;;  %v1298_v55 = vld [vmem:[%s1579_s1 + $0x1a0] sm:$0xff]   ;;  %v1300_v57 = vld [vmem:[%s1579_s1 + $0x1d8] sm:$0xff]  }
  0x1d   : > { %833 = vmatprep.mubr.bf16.mxu1 %v1067_v39  ;;  %v1301_v58 = vld [vmem:[%s1579_s1 + $0x118] sm:$0xff]   ;;  %v1303_v60 = vld [vmem:[%s1579_s1 + $0x150] sm:$0xff]   ;;  %v1307_v0 = vld [vmem:[%s1579_s1 + $0x148] sm:$0xff]  }
  0x1e   : > { %1157 = vmatpush3.bf16.msra.mxu0 %v1269_v18  ;;  %v1302_v59 = vld [vmem:[%s1579_s1 + $0x198] sm:$0xff]   ;;  %v1304_v61 = vld [vmem:[%s1579_s1 + $0x1d0] sm:$0xff]   ;;  %v1308_v1 = vld [vmem:[%s1579_s1 + $0x1c8] sm:$0xff]  }
  0x1f   : > { %1179 = vmatpush3.bf16.msra.mxu1 %v1270_v19  ;;  %1158 = vmatprep.subr.bf16.mxu0 %v1271_v20  ;;  %v1305_v62 = vld [vmem:[%s1579_s1 + $0x110] sm:$0xff]   ;;  %v1309_v2 = vld [vmem:[%s1579_s1 + $0x108] sm:$0xff]   ;;  %v1311_v4 = vld [vmem:[%s1579_s1 + $0x140] sm:$0xff]  }
  0x20   : > { %1180 = vmatprep.subr.bf16.mxu1 %v1272_v21  ;;  %v1306_v63 = vld [vmem:[%s1579_s1 + $0x190] sm:$0xff]   ;;  %v1310_v3 = vld [vmem:[%s1579_s1 + $0x188] sm:$0xff]   ;;  %v1312_v5 = vld [vmem:[%s1579_s1 + $0x1c0] sm:$0xff]  }
  0x21   : > { %v1313_v6 = vld [vmem:[%s1579_s1 + $0x100] sm:$0xff]   ;;  %v202_v8 = vld [vmem:[%s1455_s28 + $0x10] sm:$0xff]  ;;  %v203_v12 = vld [vmem:[%s1455_s28 + $0x18] sm:$0xff] }
  0x22   : > { %1159 = vmatpush3.bf16.msra.mxu0 %v1273_v22  ;;  %v1314_v7 = vld [vmem:[%s1579_s1 + $0x180] sm:$0xff]   ;;  %v206_v9 = vld [vmem:[%s1455_s28 + $0x30] sm:$0xff]  ;;  %v207_v13 = vld [vmem:[%s1455_s28 + $0x38] sm:$0xff]  ;;  %s1061_s28 = sshll.u32 %s1583_s21, 3 }
  0x23   : > { %1181 = vmatpush3.bf16.msra.mxu1 %v1274_v23  ;;  %1160 = vmatprep.subr.bf16.mxu0 %v1275_v24  ;;  %v1068_v10 = vcombine.low %v202_v8, %v206_v9  ;;  %v1069_v11 = vcombine.high %v202_v8, %v206_v9  ;;  %v1070_v14 = vcombine.low %v203_v12, %v207_v13  ;;  %s191_s26 = scalar_lea.vmem %s1580_s2, %s1061_s28 }
  0x24   : > { %1182 = vmatprep.subr.bf16.mxu1 %v1276_v25  ;;  %v1071_v15 = vcombine.high %v203_v12, %v207_v13 }
  0x26   : > { %1161 = vmatpush3.bf16.msra.mxu0 %v1277_v26 }
  0x27   : > { %1183 = vmatpush3.bf16.msra.mxu1 %v1278_v27  ;;  %1162 = vmatprep.subr.bf16.mxu0 %v1279_v28 }
  0x28   : > { %1184 = vmatprep.subr.bf16.mxu1 %v1280_v29 }
  0x2a   : > { %1163 = vmatpush3.bf16.msra.mxu0 %v1281_v30 }
  0x2b   : > { %1185 = vmatpush3.bf16.msra.mxu1 %v1282_v31  ;;  %1192 = vmatprep.subr.bf16.mxu0 %v1283_v40 }
  0x2c   : > { %1214 = vmatprep.subr.bf16.mxu1 %v1284_v41 }
  0x2d   : > { %793 = vmatmul.mubr.bf16.vlgmr.msra.gmra.mxu0 %v1064_v35 }
  0x2e   : > { %834 = vmatmul.mubr.bf16.vlgmr.msra.gmra.mxu1 %v1066_v38  ;;  %1193 = vmatpush3.bf16.msra.mxu0 %v1285_v42 }
  0x2f   : > { %1215 = vmatpush3.bf16.msra.mxu1 %v1286_v43  ;;  %1194 = vmatprep.subr.bf16.mxu0 %v1287_v44 }
  0x30   : > { %1216 = vmatprep.subr.bf16.mxu1 %v1288_v45  ;;  %874 = vmatprep.mubr.bf16.mxu0 %v1069_v11 }
  0x31   : > { %915 = vmatprep.mubr.bf16.mxu1 %v1071_v15 }
  0x32   : > { %1195 = vmatpush3.bf16.msra.mxu0 %v1289_v46 }
  0x33   : > { %1217 = vmatpush3.bf16.msra.mxu1 %v1290_v47  ;;  %1196 = vmatprep.subr.bf16.mxu0 %v1291_v48 }
  0x34   : > { %1218 = vmatprep.subr.bf16.mxu1 %v1292_v49 }
  0x36   : > { %1197 = vmatpush3.bf16.msra.mxu0 %v1293_v50 }
  0x37   : > { %1219 = vmatpush3.bf16.msra.mxu1 %v1294_v51  ;;  %1198 = vmatprep.subr.bf16.mxu0 %v1295_v52 }
  0x38   : > { %1220 = vmatprep.subr.bf16.mxu1 %v1296_v53 }
  0x3a   : > { %1199 = vmatpush3.bf16.msra.mxu0 %v1297_v54  ;;  %v1327_v54 = vmov 1  }
  0x3b   : > { %1221 = vmatpush3.bf16.msra.mxu1 %v1298_v55  ;;  %1200 = vmatprep.subr.bf16.mxu0 %v1299_v56  ;;  %v1328_v55 = vmov 0   ;;  %v944_v56 = vld [vmem:[%s191_s26] sm:$0xff] }
  0x3c   : > { %1222 = vmatprep.subr.bf16.mxu1 %v1300_v57  ;;  %1247 = vset.pattern.permute.xlu1 %v1327_v54 }
  0x3d   : > { %1246 = vset.pattern.permute.xlu0 %v1328_v55 }
  0x3e   : > { %1201 = vmatpush3.bf16.msra.mxu0 %v1301_v58 }
  0x3f   : > { %1223 = vmatpush3.bf16.msra.mxu1 %v1302_v59  ;;  %1202 = vmatprep.subr.bf16.mxu0 %v1303_v60 }
  0x40   : > { %1224 = vmatprep.subr.bf16.mxu1 %v1304_v61 }
  0x42   : > { %1203 = vmatpush3.bf16.msra.mxu0 %v1305_v62 }
  0x43   : > { %1225 = vmatpush3.bf16.msra.mxu1 %v1306_v63  ;;  %1204 = vmatprep.subr.bf16.mxu0 %v1307_v0 }
  0x44   : > { %1226 = vmatprep.subr.bf16.mxu1 %v1308_v1  ;;  %v945_v1 = vld [vmem:[%s191_s26 + $0x8] sm:$0xff] }
  0x46   : > { %1205 = vmatpush3.bf16.msra.mxu0 %v1309_v2 }
  0x47   : > { %1227 = vmatpush3.bf16.msra.mxu1 %v1310_v3  ;;  %1206 = vmatprep.subr.bf16.mxu0 %v1311_v4 }
  0x48   : > { %1228 = vmatprep.subr.bf16.mxu1 %v1312_v5 }
  0x4a   : > { %1207 = vmatpush3.bf16.msra.mxu0 %v1313_v6 }
  0x4b   : > { %1229 = vmatpush3.bf16.msra.mxu1 %v1314_v7 }
  0x4d   : > { %875 = vmatmul.mubr.bf16.vlgmr.msra.gmra.mxu0 %v1068_v10 }
  0x4e   : > { %916 = vmatmul.mubr.bf16.vlgmr.msra.gmra.mxu1 %v1070_v14 }
  0xed   : > { %v1164_v16 = vpop.f32.mrf.mxu0 }
  0xee   : > { %v1186_v17 = vpop.f32.mrf.mxu1 }
  0xef   : > { %v1165_v18 = vpop.f32.mrf.mxu0 }
  0xf0   : > { %v1187_v19 = vpop.f32.mrf.mxu1  ;;  %v1166_v23 = vadd.f32 %v1165_v18, %v1164_v16 }
  0xf1   : > { %v1167_v20 = vpop.f32.mrf.mxu0  ;;  %v1188_v24 = vadd.f32 %v1187_v19, %v1186_v17 }
  0xf2   : > { %v1189_v21 = vpop.f32.mrf.mxu1 }
  0xf3   : > { %v1168_v22 = vpop.f32.mrf.mxu0  ;;  %v836_v29 = vadd.f32 %v1188_v24, %v1166_v23 }
  0xf4   : > { %v1190_v25 = vpop.f32.mrf.mxu1  ;;  %v1169_v30 = vadd.f32 %v1168_v22, %v1167_v20 }
  0xf5   : > { %v1191_v31 = vadd.f32 %v1190_v25, %v1189_v21 }
  0xf7   : > { %v839_v39 = vadd.f32 %v1191_v31, %v1169_v30 }
 0x10d   : > { %v1208_v26 = vpop.f32.mrf.mxu0 }
 0x10e   : > { %v1230_v27 = vpop.f32.mrf.mxu1 }
 0x10f   : > { %v1209_v28 = vpop.f32.mrf.mxu0 }
 0x110   : > { %v1210_v32 = vadd.f32 %v1209_v28, %v1208_v26  ;;  %v1231_v33 = vpop.f32.mrf.mxu1 }
 0x111   : > { %v1211_v34 = vpop.f32.mrf.mxu0  ;;  %v1232_v36 = vadd.f32 %v1231_v33, %v1230_v27 }
 0x112   : > { %v877_v35 = vadd.f32 %v1210_v32, %v836_v29  ;;  %v1233_v37 = vpop.f32.mrf.mxu1 }
 0x113   : > { %v1212_v38 = vpop.f32.mrf.mxu0 }
 0x114   : > { %v1213_v40 = vadd.f32 %v1212_v38, %v1211_v34  ;;  %v1234_v41 = vpop.f32.mrf.mxu1  ;;  %v918_v42 = vadd.f32 %v1232_v36, %v877_v35 }
 0x115   : > { %v1235_v44 = vadd.f32 %v1234_v41, %v1233_v37 }
 0x116   : > { %v880_v43 = vadd.f32 %v1213_v40, %v839_v39  ;;  %924 = vadd.xlane.f32.xlu0 %v918_v42 }
 0x118   : > { %v921_v45 = vadd.f32 %v1235_v44, %v880_v43 }
 0x11a   : > { %926 = vadd.xlane.f32.xlu0 %v921_v45 }
 0x19f   : > { %v925_v46 = vpop.xlane.xlu0 %924 }
 0x1a0   : > { %v928_v47 = vmul.f32 0.0078125, %v925_v46 }
 0x1a2   : > { %v930_v48 = vsub.f32 %v918_v42, %v928_v47 }
 0x1a3   : > { %v927_v49 = vpop.xlane.xlu0 %926 }
 0x1a4   : > { %v929_v50 = vmul.f32 0.0078125, %v927_v49  ;;  %v932_v51 = vmul.f32 %v930_v48, %v930_v48 }
 0x1a6   : > { %v931_v52 = vsub.f32 %v921_v45, %v929_v50  ;;  %934 = vadd.xlane.f32.xlu1 %v932_v51 }
 0x1a8   : > { %v933_v53 = vmul.f32 %v931_v52, %v931_v52 }
 0x1aa   : > { %936 = vadd.xlane.f32.xlu1 %v933_v53 }
 0x1bb   : > { %962 = vperm.xlu1 %1247, %v944_v56  }
 0x1bf   : > { %1248 = vset.pattern.permute.xlu1 %v1328_v55 }
 0x22f   : > { %v935_v57 = vpop.xlane.xlu1 %934 }
 0x230   : > { %v938_v58 = vmul.f32 0.0078125, %v935_v57 }
 0x232   : > { %v940_v59 = vadd.f32 1e-05, %v938_v58 }
 0x233   : > { %v937_v60 = vpop.xlane.xlu1 %936 }
 0x234   : > { %1315 = vrsqrt.f32 %v940_v59  ;;  %v939_v61 = vmul.f32 0.0078125, %v937_v60 }
 0x236   : > { %v941_v62 = vadd.f32 1e-05, %v939_v61 }
 0x237   : > { %v963_v4 = vpop.permute.xlu1 %962 }
 0x238   : > { %1317 = vrsqrt.f32 %v941_v62 }
 0x241   : > { %v1316_v63 = vpop.eup %1315 }
 0x242   : > { %v946_v0 = vmul.f32 %v1316_v63, %v944_v56 }
 0x244   : > { %950 = vperm.xlu0 %1246, %v946_v0  }
 0x245   : > { %v1318_v2 = vpop.eup %1317 }
 0x246   : > { %v947_v3 = vmul.f32 %v1318_v2, %v945_v1 }
 0x248   : > { %955 = vperm.xlu1 %1248, %v947_v3   ;;  %1250 = vset.pattern.permute.xlu0 %v1327_v54 }
 0x24c   : > { %1249 = vset.pattern.permute.xlu1 %v1327_v54 }
 0x24d   : > { %967 = vperm.xlu1 %1249, %v945_v1  }
 0x2bf   : > { %v951_v5 = vpop.permute.xlu0 %950 }
 0x2c0   : > { %v958_v6 = vmul.f32 %v951_v5, %v930_v48 }
 0x2c2   : > { %v970_v8 = vadd.f32 %v963_v4, %v958_v6 }
 0x2c3   : > { %v956_v7 = vpop.permute.xlu1 %955 }
 0x2c4   : > { %v959_v9 = vmul.f32 %v956_v7, %v931_v52  ;;  %v972_v12 = vmax.f32 %v970_v8, 0.0 }
 0x2c8   : > { %v968_v10 = vpop.permute.xlu1 %967 }
 0x2c9   : > { %v971_v11 = vadd.f32 %v968_v10, %v959_v9 }
 0x2cb   : > { %v973_v13 = vmax.f32 %v971_v11, 0.0 }
 0x2cd   : > { %v1146_v14 = vpack.c.bf16 %v973_v13, %v972_v12 }
 0x2cf   : > { %1147 = vst [vmem:[%s197_s30] sm:$0xff] %v1146_v14  }
 0x2d0 PF: > { %s13_s12 = sadd.s32 1, %s1325_s12  }
 0x2d1   : > { %p10_p4 = scmp.ge.s32.totalorder %s13_s12, 4  }
 0x2d3   :  { %12 = sbr.rel (!%p10_p4) target bundleno = 1 (0x1), region = 65 }

// kernel: generator_forward.7
= control target key start
LH: loop header
LB: loop body
LE: loop exit
PB: predicated region body
PF: predicated region fallthrough
CT: control target
= control target key end

     0   :  { %s1895_s1 = inlined_call_operand.vmem [shape: bf16[512,512], index: 1, kind: input, shape index: {}]   ;;  %s1896_s0 = inlined_call_operand.vmem [shape: bf16[16,512], index: 0, kind: input, shape index: {}]   ;;  %s1897_s2 = inlined_call_operand.vmem [shape: f32[16,2], index: 2, kind: input, shape index: {}]   ;;  %s1898_s3 = inlined_call_operand.vmem [shape: bf16[16,512], index: 3, kind: output, shape index: {}]  }
   0x1   :  { %v1249_v0 = vld [vmem:[%s1895_s1 + $0xe4] ss:$16 sps:$4 sm:$0xff]   ;;  %v1253_v2 = vld [vmem:[%s1895_s1 + $0xe0] ss:$16 sps:$4 sm:$0xff]   ;;  %v1350_v51 = vld [vmem:[%s1896_s0 + $0xc] ss:$16 sps:$4 sm:$0xff]  }
   0x2   :  { %v1251_v1 = vld [vmem:[%s1895_s1 + $0x2e4] ss:$16 sps:$4 sm:$0xff]   ;;  %806 = vmatprep.subr.bf16.mxu0 %v1249_v0  ;;  %v1254_v3 = vld [vmem:[%s1895_s1 + $0x2e0] ss:$16 sps:$4 sm:$0xff]   ;;  %881 = vmatprep.mubr.bf16.mxu1 %v1350_v51 }
   0x3   :  { %849 = vmatprep.subr.bf16.mxu1 %v1251_v1  ;;  %v1255_v4 = vld [vmem:[%s1895_s1 + $0xc4] ss:$16 sps:$4 sm:$0xff]   ;;  %807 = vmatpush1.bf16.msra.mxu0 %v1253_v2  ;;  %v1259_v6 = vld [vmem:[%s1895_s1 + $0xc0] ss:$16 sps:$4 sm:$0xff]   ;;  %v1353_v2 = vld [vmem:[%s1895_s1 + $0xec] ss:$16 sps:$4 sm:$0xff]  }
   0x4   :  { %850 = vmatpush1.bf16.msra.mxu1 %v1254_v3  ;;  %v1257_v5 = vld [vmem:[%s1895_s1 + $0x2c4] ss:$16 sps:$4 sm:$0xff]   ;;  %808 = vmatprep.subr.bf16.mxu0 %v1255_v4  ;;  %v1260_v7 = vld [vmem:[%s1895_s1 + $0x2c0] ss:$16 sps:$4 sm:$0xff]   ;;  %v1356_v3 = vld [vmem:[%s1895_s1 + $0x2ec] ss:$16 sps:$4 sm:$0xff]  }
   0x5   :  { %851 = vmatprep.subr.bf16.mxu1 %v1257_v5  ;;  %v1261_v8 = vld [vmem:[%s1895_s1 + $0xa4] ss:$16 sps:$4 sm:$0xff]   ;;  %v1265_v10 = vld [vmem:[%s1895_s1 + $0xa0] ss:$16 sps:$4 sm:$0xff]   ;;  %v1685_v5 = vld [vmem:[%s1896_s0 + $0x8] ss:$16 sps:$4 sm:$0xff]  }
   0x6   :  { %v1263_v9 = vld [vmem:[%s1895_s1 + $0x2a4] ss:$16 sps:$4 sm:$0xff]   ;;  %v1266_v11 = vld [vmem:[%s1895_s1 + $0x2a0] ss:$16 sps:$4 sm:$0xff]  }
   0x7   :  { %809 = vmatpush1.bf16.msra.mxu0 %v1259_v6  ;;  %v1267_v12 = vld [vmem:[%s1895_s1 + $0x84] ss:$16 sps:$4 sm:$0xff]   ;;  %v1271_v14 = vld [vmem:[%s1895_s1 + $0x80] ss:$16 sps:$4 sm:$0xff]   ;;  %v1351_v6 = vld [vmem:[%s1895_s1 + $0xe8] ss:$16 sps:$4 sm:$0xff]  }
   0x8   :  { %852 = vmatpush1.bf16.msra.mxu1 %v1260_v7  ;;  %810 = vmatprep.subr.bf16.mxu0 %v1261_v8  ;;  %v1269_v13 = vld [vmem:[%s1895_s1 + $0x284] ss:$16 sps:$4 sm:$0xff]   ;;  %v1272_v15 = vld [vmem:[%s1895_s1 + $0x280] ss:$16 sps:$4 sm:$0xff]   ;;  %v1354_v7 = vld [vmem:[%s1895_s1 + $0x2e8] ss:$16 sps:$4 sm:$0xff]  }
   0x9   :  { %853 = vmatprep.subr.bf16.mxu1 %v1263_v9  ;;  %v1273_v16 = vld [vmem:[%s1895_s1 + $0x64] ss:$16 sps:$4 sm:$0xff]   ;;  %v1277_v18 = vld [vmem:[%s1895_s1 + $0x60] ss:$16 sps:$4 sm:$0xff]   ;;  %v1359_v8 = vld [vmem:[%s1895_s1 + $0xcc] ss:$16 sps:$4 sm:$0xff]  }
   0xa   :  { %v1275_v17 = vld [vmem:[%s1895_s1 + $0x264] ss:$16 sps:$4 sm:$0xff]   ;;  %v1278_v19 = vld [vmem:[%s1895_s1 + $0x260] ss:$16 sps:$4 sm:$0xff]   ;;  %v1362_v9 = vld [vmem:[%s1895_s1 + $0x2cc] ss:$16 sps:$4 sm:$0xff]  }
   0xb   :  { %811 = vmatpush1.bf16.msra.mxu0 %v1265_v10  ;;  %v1279_v20 = vld [vmem:[%s1895_s1 + $0x44] ss:$16 sps:$4 sm:$0xff]   ;;  %v1283_v22 = vld [vmem:[%s1895_s1 + $0x40] ss:$16 sps:$4 sm:$0xff]   ;;  %v1357_v10 = vld [vmem:[%s1895_s1 + $0xc8] ss:$16 sps:$4 sm:$0xff]  }
   0xc   :  { %854 = vmatpush1.bf16.msra.mxu1 %v1266_v11  ;;  %812 = vmatprep.subr.bf16.mxu0 %v1267_v12  ;;  %v1281_v21 = vld [vmem:[%s1895_s1 + $0x244] ss:$16 sps:$4 sm:$0xff]   ;;  %v1284_v23 = vld [vmem:[%s1895_s1 + $0x240] ss:$16 sps:$4 sm:$0xff]   ;;  %v1360_v11 = vld [vmem:[%s1895_s1 + $0x2c8] ss:$16 sps:$4 sm:$0xff]  }
   0xd   :  { %855 = vmatprep.subr.bf16.mxu1 %v1269_v13  ;;  %v1285_v24 = vld [vmem:[%s1895_s1 + $0x24] ss:$16 sps:$4 sm:$0xff]   ;;  %v1289_v26 = vld [vmem:[%s1895_s1 + $0x20] ss:$16 sps:$4 sm:$0xff]   ;;  %v1365_v12 = vld [vmem:[%s1895_s1 + $0xac] ss:$16 sps:$4 sm:$0xff]  }
   0xe   :  { %v1287_v25 = vld [vmem:[%s1895_s1 + $0x224] ss:$16 sps:$4 sm:$0xff]   ;;  %v1290_v27 = vld [vmem:[%s1895_s1 + $0x220] ss:$16 sps:$4 sm:$0xff]   ;;  %v1368_v13 = vld [vmem:[%s1895_s1 + $0x2ac] ss:$16 sps:$4 sm:$0xff]  }
   0xf   :  { %813 = vmatpush1.bf16.msra.mxu0 %v1271_v14  ;;  %v1291_v28 = vld [vmem:[%s1895_s1 + $0x4] ss:$16 sps:$4 sm:$0xff]   ;;  %v1295_v30 = vld [vmem:[%s1895_s1] ss:$16 sps:$4 sm:$0xff]   ;;  %v1363_v14 = vld [vmem:[%s1895_s1 + $0xa8] ss:$16 sps:$4 sm:$0xff]  }
  0x10   :  { %856 = vmatpush1.bf16.msra.mxu1 %v1272_v15  ;;  %814 = vmatprep.subr.bf16.mxu0 %v1273_v16  ;;  %v1293_v29 = vld [vmem:[%s1895_s1 + $0x204] ss:$16 sps:$4 sm:$0xff]   ;;  %v1296_v31 = vld [vmem:[%s1895_s1 + $0x200] ss:$16 sps:$4 sm:$0xff]   ;;  %v1366_v15 = vld [vmem:[%s1895_s1 + $0x2a8] ss:$16 sps:$4 sm:$0xff]  }
  0x11   :  { %857 = vmatprep.subr.bf16.mxu1 %v1275_v17  ;;  %v1297_v32 = vld [vmem:[%s1895_s1 + $0x1e4] ss:$16 sps:$4 sm:$0xff]   ;;  %v1301_v34 = vld [vmem:[%s1895_s1 + $0x1e0] ss:$16 sps:$4 sm:$0xff]   ;;  %v1371_v16 = vld [vmem:[%s1895_s1 + $0x8c] ss:$16 sps:$4 sm:$0xff]  }
  0x12   :  { %v1299_v33 = vld [vmem:[%s1895_s1 + $0x3e4] ss:$16 sps:$4 sm:$0xff]   ;;  %v1302_v35 = vld [vmem:[%s1895_s1 + $0x3e0] ss:$16 sps:$4 sm:$0xff]   ;;  %v1374_v17 = vld [vmem:[%s1895_s1 + $0x28c] ss:$16 sps:$4 sm:$0xff]  }
  0x13   :  { %815 = vmatpush1.bf16.msra.mxu0 %v1277_v18  ;;  %v1303_v36 = vld [vmem:[%s1895_s1 + $0x1c4] ss:$16 sps:$4 sm:$0xff]   ;;  %v1307_v38 = vld [vmem:[%s1895_s1 + $0x1c0] ss:$16 sps:$4 sm:$0xff]   ;;  %v1369_v18 = vld [vmem:[%s1895_s1 + $0x88] ss:$16 sps:$4 sm:$0xff]  }
  0x14   :  { %858 = vmatpush1.bf16.msra.mxu1 %v1278_v19  ;;  %816 = vmatprep.subr.bf16.mxu0 %v1279_v20  ;;  %v1305_v37 = vld [vmem:[%s1895_s1 + $0x3c4] ss:$16 sps:$4 sm:$0xff]   ;;  %v1308_v39 = vld [vmem:[%s1895_s1 + $0x3c0] ss:$16 sps:$4 sm:$0xff]   ;;  %v1372_v19 = vld [vmem:[%s1895_s1 + $0x288] ss:$16 sps:$4 sm:$0xff]  }
  0x15   :  { %859 = vmatprep.subr.bf16.mxu1 %v1281_v21  ;;  %v1309_v40 = vld [vmem:[%s1895_s1 + $0x1a4] ss:$16 sps:$4 sm:$0xff]   ;;  %v1313_v42 = vld [vmem:[%s1895_s1 + $0x1a0] ss:$16 sps:$4 sm:$0xff]   ;;  %v1377_v20 = vld [vmem:[%s1895_s1 + $0x6c] ss:$16 sps:$4 sm:$0xff]  }
  0x16   :  { %v1311_v41 = vld [vmem:[%s1895_s1 + $0x3a4] ss:$16 sps:$4 sm:$0xff]   ;;  %v1314_v43 = vld [vmem:[%s1895_s1 + $0x3a0] ss:$16 sps:$4 sm:$0xff]   ;;  %v1380_v21 = vld [vmem:[%s1895_s1 + $0x26c] ss:$16 sps:$4 sm:$0xff]  }
  0x17   :  { %817 = vmatpush1.bf16.msra.mxu0 %v1283_v22  ;;  %v1315_v44 = vld [vmem:[%s1895_s1 + $0x184] ss:$16 sps:$4 sm:$0xff]   ;;  %v1319_v46 = vld [vmem:[%s1895_s1 + $0x180] ss:$16 sps:$4 sm:$0xff]   ;;  %v1375_v22 = vld [vmem:[%s1895_s1 + $0x68] ss:$16 sps:$4 sm:$0xff]  }
  0x18   :  { %860 = vmatpush1.bf16.msra.mxu1 %v1284_v23  ;;  %818 = vmatprep.subr.bf16.mxu0 %v1285_v24  ;;  %v1317_v45 = vld [vmem:[%s1895_s1 + $0x384] ss:$16 sps:$4 sm:$0xff]   ;;  %v1320_v47 = vld [vmem:[%s1895_s1 + $0x380] ss:$16 sps:$4 sm:$0xff]   ;;  %v1378_v23 = vld [vmem:[%s1895_s1 + $0x268] ss:$16 sps:$4 sm:$0xff]  }
  0x19   :  { %861 = vmatprep.subr.bf16.mxu1 %v1287_v25  ;;  %v1321_v48 = vld [vmem:[%s1895_s1 + $0x164] ss:$16 sps:$4 sm:$0xff]   ;;  %v1325_v52 = vld [vmem:[%s1895_s1 + $0x160] ss:$16 sps:$4 sm:$0xff]   ;;  %v1383_v24 = vld [vmem:[%s1895_s1 + $0x4c] ss:$16 sps:$4 sm:$0xff]  }
  0x1a   :  { %v1347_v49 = vld [vmem:[%s1896_s0 + $0x4] ss:$16 sps:$4 sm:$0xff]   ;;  %v1326_v53 = vld [vmem:[%s1895_s1 + $0x360] ss:$16 sps:$4 sm:$0xff]   ;;  %v1386_v25 = vld [vmem:[%s1895_s1 + $0x24c] ss:$16 sps:$4 sm:$0xff]  }
  0x1b   :  { %819 = vmatpush1.bf16.msra.mxu0 %v1289_v26  ;;  %v1323_v50 = vld [vmem:[%s1895_s1 + $0x364] ss:$16 sps:$4 sm:$0xff]   ;;  %838 = vmatprep.mubr.bf16.mxu0 %v1347_v49  ;;  %v1331_v56 = vld [vmem:[%s1895_s1 + $0x140] ss:$16 sps:$4 sm:$0xff]   ;;  %v1381_v26 = vld [vmem:[%s1895_s1 + $0x48] ss:$16 sps:$4 sm:$0xff]  }
  0x1c   :  { %862 = vmatpush1.bf16.msra.mxu1 %v1290_v27  ;;  %820 = vmatprep.subr.bf16.mxu0 %v1291_v28  ;;  %v1327_v54 = vld [vmem:[%s1895_s1 + $0x144] ss:$16 sps:$4 sm:$0xff]   ;;  %v1332_v57 = vld [vmem:[%s1895_s1 + $0x340] ss:$16 sps:$4 sm:$0xff]   ;;  %v1384_v27 = vld [vmem:[%s1895_s1 + $0x248] ss:$16 sps:$4 sm:$0xff]  }
  0x1d   :  { %863 = vmatprep.subr.bf16.mxu1 %v1293_v29  ;;  %v1329_v55 = vld [vmem:[%s1895_s1 + $0x344] ss:$16 sps:$4 sm:$0xff]   ;;  %v1337_v60 = vld [vmem:[%s1895_s1 + $0x120] ss:$16 sps:$4 sm:$0xff]   ;;  %v1389_v28 = vld [vmem:[%s1895_s1 + $0x2c] ss:$16 sps:$4 sm:$0xff]  }
  0x1e   :  { %v1333_v58 = vld [vmem:[%s1895_s1 + $0x124] ss:$16 sps:$4 sm:$0xff]   ;;  %v1338_v61 = vld [vmem:[%s1895_s1 + $0x320] ss:$16 sps:$4 sm:$0xff]   ;;  %v1392_v29 = vld [vmem:[%s1895_s1 + $0x22c] ss:$16 sps:$4 sm:$0xff]  }
  0x1f   :  { %821 = vmatpush1.bf16.msra.mxu0 %v1295_v30  ;;  %v1335_v59 = vld [vmem:[%s1895_s1 + $0x324] ss:$16 sps:$4 sm:$0xff]   ;;  %v1343_v0 = vld [vmem:[%s1895_s1 + $0x100] ss:$16 sps:$4 sm:$0xff]   ;;  %v1387_v30 = vld [vmem:[%s1895_s1 + $0x28] ss:$16 sps:$4 sm:$0xff]  }
  0x20   :  { %864 = vmatpush1.bf16.msra.mxu1 %v1296_v31  ;;  %822 = vmatprep.subr.bf16.mxu0 %v1297_v32  ;;  %v1339_v62 = vld [vmem:[%s1895_s1 + $0x104] ss:$16 sps:$4 sm:$0xff]   ;;  %v1344_v1 = vld [vmem:[%s1895_s1 + $0x300] ss:$16 sps:$4 sm:$0xff]   ;;  %v1390_v31 = vld [vmem:[%s1895_s1 + $0x228] ss:$16 sps:$4 sm:$0xff]  }
  0x21   :  { %865 = vmatprep.subr.bf16.mxu1 %v1299_v33  ;;  %v1341_v63 = vld [vmem:[%s1895_s1 + $0x304] ss:$16 sps:$4 sm:$0xff]   ;;  %v1680_v4 = vld [vmem:[%s1896_s0] ss:$16 sps:$4 sm:$0xff]   ;;  %v1395_v32 = vld [vmem:[%s1895_s1 + $0xc] ss:$16 sps:$4 sm:$0xff]  }
  0x22   :  { %v1398_v33 = vld [vmem:[%s1895_s1 + $0x20c] ss:$16 sps:$4 sm:$0xff]  }
  0x23   :  { %823 = vmatpush2.bf16.msra.mxu0 %v1301_v34  ;;  %v1393_v34 = vld [vmem:[%s1895_s1 + $0x8] ss:$16 sps:$4 sm:$0xff]  }
  0x24   :  { %866 = vmatpush2.bf16.msra.mxu1 %v1302_v35  ;;  %824 = vmatprep.subr.bf16.mxu0 %v1303_v36  ;;  %v1396_v35 = vld [vmem:[%s1895_s1 + $0x208] ss:$16 sps:$4 sm:$0xff]   ;;  %v1401_v36 = vld [vmem:[%s1895_s1 + $0x1ec] ss:$16 sps:$4 sm:$0xff]  }
  0x25   :  { %867 = vmatprep.subr.bf16.mxu1 %v1305_v37  ;;  %v1404_v37 = vld [vmem:[%s1895_s1 + $0x3ec] ss:$16 sps:$4 sm:$0xff]  }
  0x27   :  { %825 = vmatpush2.bf16.msra.mxu0 %v1307_v38  ;;  %v1399_v38 = vld [vmem:[%s1895_s1 + $0x1e8] ss:$16 sps:$4 sm:$0xff]  }
  0x28   :  { %868 = vmatpush2.bf16.msra.mxu1 %v1308_v39  ;;  %826 = vmatprep.subr.bf16.mxu0 %v1309_v40  ;;  %v1402_v39 = vld [vmem:[%s1895_s1 + $0x3e8] ss:$16 sps:$4 sm:$0xff]   ;;  %v1407_v40 = vld [vmem:[%s1895_s1 + $0x1cc] ss:$16 sps:$4 sm:$0xff]  }
  0x29   :  { %869 = vmatprep.subr.bf16.mxu1 %v1311_v41  ;;  %v1410_v41 = vld [vmem:[%s1895_s1 + $0x3cc] ss:$16 sps:$4 sm:$0xff]  }
  0x2b   :  { %827 = vmatpush2.bf16.msra.mxu0 %v1313_v42  ;;  %v1405_v42 = vld [vmem:[%s1895_s1 + $0x1c8] ss:$16 sps:$4 sm:$0xff]  }
  0x2c   :  { %870 = vmatpush2.bf16.msra.mxu1 %v1314_v43  ;;  %828 = vmatprep.subr.bf16.mxu0 %v1315_v44  ;;  %v1408_v43 = vld [vmem:[%s1895_s1 + $0x3c8] ss:$16 sps:$4 sm:$0xff]   ;;  %v1413_v44 = vld [vmem:[%s1895_s1 + $0x1ac] ss:$16 sps:$4 sm:$0xff]  }
  0x2d   :  { %871 = vmatprep.subr.bf16.mxu1 %v1317_v45  ;;  %v1416_v45 = vld [vmem:[%s1895_s1 + $0x3ac] ss:$16 sps:$4 sm:$0xff]  }
  0x2f   :  { %829 = vmatpush2.bf16.msra.mxu0 %v1319_v46  ;;  %v1411_v46 = vld [vmem:[%s1895_s1 + $0x1a8] ss:$16 sps:$4 sm:$0xff]  }
  0x30   :  { %872 = vmatpush2.bf16.msra.mxu1 %v1320_v47  ;;  %830 = vmatprep.subr.bf16.mxu0 %v1321_v48  ;;  %v1414_v47 = vld [vmem:[%s1895_s1 + $0x3a8] ss:$16 sps:$4 sm:$0xff]   ;;  %v1419_v48 = vld [vmem:[%s1895_s1 + $0x18c] ss:$16 sps:$4 sm:$0xff]  }
  0x31   :  { %873 = vmatprep.subr.bf16.mxu1 %v1323_v50  ;;  %v1417_v50 = vld [vmem:[%s1895_s1 + $0x188] ss:$16 sps:$4 sm:$0xff]  }
  0x33   :  { %831 = vmatpush2.bf16.msra.mxu0 %v1325_v52  ;;  %v1425_v52 = vld [vmem:[%s1895_s1 + $0x16c] ss:$16 sps:$4 sm:$0xff]  }
  0x34   :  { %874 = vmatpush2.bf16.msra.mxu1 %v1326_v53  ;;  %832 = vmatprep.subr.bf16.mxu0 %v1327_v54  ;;  %v1428_v53 = vld [vmem:[%s1895_s1 + $0x36c] ss:$16 sps:$4 sm:$0xff]   ;;  %v1423_v54 = vld [vmem:[%s1895_s1 + $0x168] ss:$16 sps:$4 sm:$0xff]  }
  0x35   :  { %875 = vmatprep.subr.bf16.mxu1 %v1329_v55  ;;  %v1426_v55 = vld [vmem:[%s1895_s1 + $0x368] ss:$16 sps:$4 sm:$0xff]  }
  0x37   :  { %833 = vmatpush2.bf16.msra.mxu0 %v1331_v56  ;;  %v1431_v56 = vld [vmem:[%s1895_s1 + $0x14c] ss:$16 sps:$4 sm:$0xff]  }
  0x38   :  { %876 = vmatpush2.bf16.msra.mxu1 %v1332_v57  ;;  %834 = vmatprep.subr.bf16.mxu0 %v1333_v58  ;;  %v1434_v57 = vld [vmem:[%s1895_s1 + $0x34c] ss:$16 sps:$4 sm:$0xff]   ;;  %v1429_v58 = vld [vmem:[%s1895_s1 + $0x148] ss:$16 sps:$4 sm:$0xff]  }
  0x39   :  { %877 = vmatprep.subr.bf16.mxu1 %v1335_v59  ;;  %v1432_v59 = vld [vmem:[%s1895_s1 + $0x348] ss:$16 sps:$4 sm:$0xff]  }
  0x3b   :  { %835 = vmatpush2.bf16.msra.mxu0 %v1337_v60  ;;  %v1437_v60 = vld [vmem:[%s1895_s1 + $0x12c] ss:$16 sps:$4 sm:$0xff]  }
  0x3c   :  { %878 = vmatpush2.bf16.msra.mxu1 %v1338_v61  ;;  %836 = vmatprep.subr.bf16.mxu0 %v1339_v62  ;;  %v1440_v61 = vld [vmem:[%s1895_s1 + $0x32c] ss:$16 sps:$4 sm:$0xff]   ;;  %v1435_v62 = vld [vmem:[%s1895_s1 + $0x128] ss:$16 sps:$4 sm:$0xff]  }
  0x3d   :  { %879 = vmatprep.subr.bf16.mxu1 %v1341_v63  ;;  %v1438_v63 = vld [vmem:[%s1895_s1 + $0x328] ss:$16 sps:$4 sm:$0xff]  }
  0x3f   :  { %837 = vmatpush2.bf16.msra.mxu0 %v1343_v0  ;;  %v1443_v0 = vld [vmem:[%s1895_s1 + $0x10c] ss:$16 sps:$4 sm:$0xff]  }
  0x40   :  { %880 = vmatpush2.bf16.msra.mxu1 %v1344_v1  ;;  %892 = vmatprep.subr.bf16.mxu0 %v1353_v2  ;;  %v1446_v1 = vld [vmem:[%s1895_s1 + $0x30c] ss:$16 sps:$4 sm:$0xff]   ;;  %v1441_v2 = vld [vmem:[%s1895_s1 + $0x108] ss:$16 sps:$4 sm:$0xff]  }
  0x41   :  { %935 = vmatprep.subr.bf16.mxu1 %v1356_v3  ;;  %v1444_v3 = vld [vmem:[%s1895_s1 + $0x308] ss:$16 sps:$4 sm:$0xff]  }
  0x42   :  { %839 = vmatmul.mubr.bf16.vlgmr.msra.gmra.mxu0 %v1680_v4 }
  0x43   :  { %882 = vmatmul.mubr.bf16.vlgmr.msra.gmra.mxu1 %v1685_v5  ;;  %893 = vmatpush1.bf16.msra.mxu0 %v1351_v6 }
  0x44   :  { %936 = vmatpush1.bf16.msra.mxu1 %v1354_v7  ;;  %894 = vmatprep.subr.bf16.mxu0 %v1359_v8 }
  0x45   :  { %937 = vmatprep.subr.bf16.mxu1 %v1362_v9  ;;  %924 = vmatprep.mubr.bf16.mxu0 %v1347_v49  ;;  %v1422_v49 = vld [vmem:[%s1895_s1 + $0x38c] ss:$16 sps:$4 sm:$0xff]  }
  0x46   :  { %967 = vmatprep.mubr.bf16.mxu1 %v1350_v51  ;;  %v1420_v51 = vld [vmem:[%s1895_s1 + $0x388] ss:$16 sps:$4 sm:$0xff]  }
  0x47   :  { %895 = vmatpush1.bf16.msra.mxu0 %v1357_v10 }
  0x48   :  { %938 = vmatpush1.bf16.msra.mxu1 %v1360_v11  ;;  %896 = vmatprep.subr.bf16.mxu0 %v1365_v12 }
  0x49   :  { %939 = vmatprep.subr.bf16.mxu1 %v1368_v13 }
  0x4b   :  { %897 = vmatpush1.bf16.msra.mxu0 %v1363_v14 }
  0x4c   :  { %940 = vmatpush1.bf16.msra.mxu1 %v1366_v15  ;;  %898 = vmatprep.subr.bf16.mxu0 %v1371_v16 }
  0x4d   :  { %941 = vmatprep.subr.bf16.mxu1 %v1374_v17 }
  0x4f   :  { %899 = vmatpush1.bf16.msra.mxu0 %v1369_v18 }
  0x50   :  { %942 = vmatpush1.bf16.msra.mxu1 %v1372_v19  ;;  %900 = vmatprep.subr.bf16.mxu0 %v1377_v20 }
  0x51   :  { %943 = vmatprep.subr.bf16.mxu1 %v1380_v21 }
  0x53   :  { %901 = vmatpush1.bf16.msra.mxu0 %v1375_v22 }
  0x54   :  { %944 = vmatpush1.bf16.msra.mxu1 %v1378_v23  ;;  %902 = vmatprep.subr.bf16.mxu0 %v1383_v24 }
  0x55   :  { %945 = vmatprep.subr.bf16.mxu1 %v1386_v25 }
  0x57   :  { %903 = vmatpush1.bf16.msra.mxu0 %v1381_v26 }
  0x58   :  { %946 = vmatpush1.bf16.msra.mxu1 %v1384_v27  ;;  %904 = vmatprep.subr.bf16.mxu0 %v1389_v28 }
  0x59   :  { %947 = vmatprep.subr.bf16.mxu1 %v1392_v29 }
  0x5b   :  { %905 = vmatpush1.bf16.msra.mxu0 %v1387_v30 }
  0x5c   :  { %948 = vmatpush1.bf16.msra.mxu1 %v1390_v31  ;;  %906 = vmatprep.subr.bf16.mxu0 %v1395_v32 }
  0x5d   :  { %949 = vmatprep.subr.bf16.mxu1 %v1398_v33 }
  0x5f   :  { %907 = vmatpush1.bf16.msra.mxu0 %v1393_v34 }
  0x60   :  { %950 = vmatpush1.bf16.msra.mxu1 %v1396_v35  ;;  %908 = vmatprep.subr.bf16.mxu0 %v1401_v36 }
  0x61   :  { %951 = vmatprep.subr.bf16.mxu1 %v1404_v37 }
  0x63   :  { %909 = vmatpush2.bf16.msra.mxu0 %v1399_v38 }
  0x64   :  { %952 = vmatpush2.bf16.msra.mxu1 %v1402_v39  ;;  %910 = vmatprep.subr.bf16.mxu0 %v1407_v40 }
  0x65   :  { %953 = vmatprep.subr.bf16.mxu1 %v1410_v41 }
  0x67   :  { %911 = vmatpush2.bf16.msra.mxu0 %v1405_v42 }
  0x68   :  { %954 = vmatpush2.bf16.msra.mxu1 %v1408_v43  ;;  %912 = vmatprep.subr.bf16.mxu0 %v1413_v44 }
  0x69   :  { %955 = vmatprep.subr.bf16.mxu1 %v1416_v45 }
  0x6b   :  { %913 = vmatpush2.bf16.msra.mxu0 %v1411_v46 }
  0x6c   :  { %956 = vmatpush2.bf16.msra.mxu1 %v1414_v47  ;;  %914 = vmatprep.subr.bf16.mxu0 %v1419_v48 }
  0x6d   :  { %957 = vmatprep.subr.bf16.mxu1 %v1422_v49 }
  0x6f   :  { %915 = vmatpush2.bf16.msra.mxu0 %v1417_v50 }
  0x70   :  { %958 = vmatpush2.bf16.msra.mxu1 %v1420_v51  ;;  %916 = vmatprep.subr.bf16.mxu0 %v1425_v52 }
  0x71   :  { %959 = vmatprep.subr.bf16.mxu1 %v1428_v53 }
  0x73   :  { %917 = vmatpush2.bf16.msra.mxu0 %v1423_v54 }
  0x74   :  { %960 = vmatpush2.bf16.msra.mxu1 %v1426_v55  ;;  %918 = vmatprep.subr.bf16.mxu0 %v1431_v56 }
  0x75   :  { %961 = vmatprep.subr.bf16.mxu1 %v1434_v57 }
  0x77   :  { %919 = vmatpush2.bf16.msra.mxu0 %v1429_v58 }
  0x78   :  { %962 = vmatpush2.bf16.msra.mxu1 %v1432_v59  ;;  %920 = vmatprep.subr.bf16.mxu0 %v1437_v60  ;;  %v1451_v60 = vmov 1  }
  0x79   :  { %963 = vmatprep.subr.bf16.mxu1 %v1440_v61  ;;  %1245 = vset.pattern.permute.xlu1 %v1451_v60  ;;  %v1452_v61 = vmov 0  }
  0x7a   :  { %1244 = vset.pattern.permute.xlu0 %v1452_v61 }
  0x7b   :  { %921 = vmatpush2.bf16.msra.mxu0 %v1435_v62  ;;  %v1022_v62 = vld [vmem:[%s1897_s2] sm:$0xff] }
  0x7c   :  { %964 = vmatpush2.bf16.msra.mxu1 %v1438_v63  ;;  %922 = vmatprep.subr.bf16.mxu0 %v1443_v0 }
  0x7d   :  { %965 = vmatprep.subr.bf16.mxu1 %v1446_v1 }
  0x7f   :  { %923 = vmatpush2.bf16.msra.mxu0 %v1441_v2 }
  0x80   :  { %966 = vmatpush2.bf16.msra.mxu1 %v1444_v3 }
  0x82   :  { %925 = vmatmul.mubr.bf16.vlgmr.msra.gmra.mxu0 %v1680_v4 }
  0x83   :  { %968 = vmatmul.mubr.bf16.vlgmr.msra.gmra.mxu1 %v1685_v5 }
 0x102   :  { %v840_v6 = vpop.f32.mrf.mxu0 }
 0x103   :  { %v883_v7 = vpop.f32.mrf.mxu1 }
 0x104   :  { %v842_v8 = vpop.f32.mrf.mxu0  ;;  %v884_v12 = vadd.f32 %v883_v7, %v840_v6 }
 0x105   :  { %v885_v9 = vpop.f32.mrf.mxu1 }
 0x106   :  { %v844_v10 = vpop.f32.mrf.mxu0  ;;  %v886_v13 = vadd.f32 %v885_v9, %v842_v8  ;;  %v1023_v9 = vld [vmem:[%s1897_s2 + $0x8] sm:$0xff] }
 0x107   :  { %v887_v11 = vpop.f32.mrf.mxu1 }
 0x108   :  { %v846_v14 = vpop.f32.mrf.mxu0  ;;  %v978_v18 = vadd.f32 %v886_v13, %v884_v12  ;;  %v888_v4 = vadd.f32 %v887_v11, %v844_v10 }
 0x109   :  { %v889_v15 = vpop.f32.mrf.mxu1 }
 0x10a   :  { %v890_v19 = vadd.f32 %v889_v15, %v846_v14 }
 0x10c   :  { %v983_v26 = vadd.f32 %v890_v19, %v888_v4 }
 0x142   :  { %v926_v16 = vpop.f32.mrf.mxu0 }
 0x143   :  { %v969_v17 = vpop.f32.mrf.mxu1 }
 0x144   :  { %v970_v20 = vadd.f32 %v969_v17, %v926_v16  ;;  %v928_v21 = vpop.f32.mrf.mxu0 }
 0x145   :  { %v971_v22 = vpop.f32.mrf.mxu1 }
 0x146   :  { %v972_v23 = vadd.f32 %v971_v22, %v928_v21  ;;  %v979_v5 = vadd.f32 %v978_v18, %v970_v20  ;;  %v930_v24 = vpop.f32.mrf.mxu0 }
 0x147   :  { %v973_v25 = vpop.f32.mrf.mxu1 }
 0x148   :  { %v974_v27 = vadd.f32 %v973_v25, %v930_v24  ;;  %v980_v28 = vadd.f32 %v979_v5, %v972_v23  ;;  %v932_v29 = vpop.f32.mrf.mxu0 }
 0x149   :  { %v975_v30 = vpop.f32.mrf.mxu1 }
 0x14a   :  { %v984_v31 = vadd.f32 %v983_v26, %v974_v27  ;;  %v976_v32 = vadd.f32 %v975_v30, %v932_v29  ;;  %981 = vadd.xlane.f32.xlu0 %v980_v28 }
 0x14c   :  { %v985_v33 = vadd.f32 %v984_v31, %v976_v32 }
 0x14e   :  { %986 = vadd.xlane.f32.xlu0 %v985_v33 }
 0x1d3   :  { %v982_v34 = vpop.xlane.xlu0 %981 }
 0x1d4   :  { %v988_v35 = vmul.f32 0.001953125, %v982_v34 }
 0x1d6   :  { %v990_v36 = vsub.f32 %v884_v12, %v988_v35  ;;  %v991_v37 = vsub.f32 %v886_v13, %v988_v35  ;;  %v992_v38 = vsub.f32 %v970_v20, %v988_v35  ;;  %v993_v40 = vsub.f32 %v972_v23, %v988_v35 }
 0x1d7   :  { %v987_v39 = vpop.xlane.xlu0 %986 }
 0x1d8   :  { %v989_v41 = vmul.f32 0.001953125, %v987_v39  ;;  %v998_v42 = vmul.f32 %v990_v36, %v990_v36  ;;  %v999_v43 = vmul.f32 %v991_v37, %v991_v37  ;;  %v1000_v44 = vmul.f32 %v992_v38, %v992_v38 }
 0x1d9   :  { %v1001_v49 = vmul.f32 %v993_v40, %v993_v40 }
 0x1da   :  { %v994_v45 = vsub.f32 %v888_v4, %v989_v41  ;;  %v995_v46 = vsub.f32 %v890_v19, %v989_v41  ;;  %v1006_v47 = vadd.f32 %v999_v43, %v998_v42  ;;  %v996_v48 = vsub.f32 %v974_v27, %v989_v41 }
 0x1db   :  { %v997_v51 = vsub.f32 %v976_v32, %v989_v41 }
 0x1dc   :  { %v1007_v50 = vadd.f32 %v1006_v47, %v1000_v44  ;;  %v1002_v52 = vmul.f32 %v994_v45, %v994_v45  ;;  %v1003_v53 = vmul.f32 %v995_v46, %v995_v46  ;;  %v1004_v55 = vmul.f32 %v996_v48, %v996_v48 }
 0x1dd   :  { %v1005_v57 = vmul.f32 %v997_v51, %v997_v51 }
 0x1de   :  { %v1008_v54 = vadd.f32 %v1007_v50, %v1001_v49  ;;  %v1011_v56 = vadd.f32 %v1003_v53, %v1002_v52 }
 0x1e0   :  { %1009 = vadd.xlane.f32.xlu1 %v1008_v54  ;;  %v1012_v58 = vadd.f32 %v1011_v56, %v1004_v55 }
 0x1e2   :  { %v1013_v59 = vadd.f32 %v1012_v58, %v1005_v57 }
 0x1e4   :  { %1014 = vadd.xlane.f32.xlu1 %v1013_v59 }
 0x1f5   :  { %1046 = vperm.xlu1 %1245, %v1022_v62  }
 0x1f9   :  { %1246 = vset.pattern.permute.xlu1 %v1452_v61 }
 0x269   :  { %v1010_v63 = vpop.xlane.xlu1 %1009 }
 0x26a   :  { %v1016_v0 = vmul.f32 0.001953125, %v1010_v63 }
 0x26c   :  { %v1018_v1 = vadd.f32 1e-05, %v1016_v0 }
 0x26d   :  { %v1015_v2 = vpop.xlane.xlu1 %1014 }
 0x26e   :  { %1447 = vrsqrt.f32 %v1018_v1  ;;  %v1017_v3 = vmul.f32 0.001953125, %v1015_v2 }
 0x270   :  { %v1019_v6 = vadd.f32 1e-05, %v1017_v3 }
 0x271   :  { %v1047_v12 = vpop.permute.xlu1 %1046 }
 0x272   :  { %1449 = vrsqrt.f32 %v1019_v6 }
 0x27b   :  { %v1448_v7 = vpop.eup %1447 }
 0x27c   :  { %v1024_v8 = vmul.f32 %v1448_v7, %v1022_v62 }
 0x27e   :  { %1028 = vperm.xlu0 %1244, %v1024_v8  }
 0x27f   :  { %v1450_v10 = vpop.eup %1449 }
 0x280   :  { %v1025_v11 = vmul.f32 %v1450_v10, %v1023_v9 }
 0x282   :  { %1033 = vperm.xlu1 %1246, %v1025_v11   ;;  %1248 = vset.pattern.permute.xlu0 %v1451_v60 }
 0x286   :  { %1247 = vset.pattern.permute.xlu1 %v1451_v60 }
 0x287   :  { %1051 = vperm.xlu1 %1247, %v1023_v9  }
 0x2f9   :  { %v1029_v13 = vpop.permute.xlu0 %1028 }
 0x2fa   :  { %v1036_v14 = vmul.f32 %v1029_v13, %v990_v36  ;;  %v1037_v15 = vmul.f32 %v1029_v13, %v991_v37  ;;  %v1038_v16 = vmul.f32 %v1029_v13, %v992_v38  ;;  %v1039_v17 = vmul.f32 %v1029_v13, %v993_v40 }
 0x2fc   :  { %v1054_v18 = vadd.f32 %v1047_v12, %v1036_v14  ;;  %v1055_v19 = vadd.f32 %v1047_v12, %v1037_v15  ;;  %v1056_v20 = vadd.f32 %v1047_v12, %v1038_v16  ;;  %v1057_v21 = vadd.f32 %v1047_v12, %v1039_v17 }
 0x2fd   :  { %v1034_v22 = vpop.permute.xlu1 %1033 }
 0x2fe   :  { %v1062_v4 = vmax.f32 %v1054_v18, 0.0  ;;  %v1063_v23 = vmax.f32 %v1055_v19, 0.0  ;;  %v1064_v5 = vmax.f32 %v1056_v20, 0.0  ;;  %v1065_v24 = vmax.f32 %v1057_v21, 0.0 }
 0x2ff   :  { %v1040_v27 = vmul.f32 %v1034_v22, %v994_v45  ;;  %v1041_v28 = vmul.f32 %v1034_v22, %v995_v46  ;;  %v1042_v29 = vmul.f32 %v1034_v22, %v996_v48  ;;  %v1043_v30 = vmul.f32 %v1034_v22, %v997_v51 }
 0x300   :  { %v1238_v25 = vpack.c.bf16 %v1063_v23, %v1062_v4  ;;  %v1239_v26 = vpack.c.bf16 %v1065_v24, %v1064_v5 }
 0x302   :  { %1094 = vst [vmem:[%s1898_s3] sm:$0xff] %v1238_v25  ;;  %1095 = vst [vmem:[%s1898_s3 + $0x8] sm:$0xff] %v1239_v26  ;;  %v1052_v31 = vpop.permute.xlu1 %1051 }
 0x303   :  { %v1058_v32 = vadd.f32 %v1052_v31, %v1040_v27  ;;  %v1059_v33 = vadd.f32 %v1052_v31, %v1041_v28  ;;  %v1060_v34 = vadd.f32 %v1052_v31, %v1042_v29  ;;  %v1061_v35 = vadd.f32 %v1052_v31, %v1043_v30 }
 0x305   :  { %v1066_v36 = vmax.f32 %v1058_v32, 0.0  ;;  %v1067_v37 = vmax.f32 %v1059_v33, 0.0  ;;  %v1068_v38 = vmax.f32 %v1060_v34, 0.0  ;;  %v1069_v39 = vmax.f32 %v1061_v35, 0.0 }
 0x307   :  { %v1240_v40 = vpack.c.bf16 %v1067_v37, %v1066_v36  ;;  %v1241_v41 = vpack.c.bf16 %v1069_v39, %v1068_v38 }
 0x309   :  { %1096 = vst [vmem:[%s1898_s3 + $0x10] sm:$0xff] %v1240_v40  ;;  %1097 = vst [vmem:[%s1898_s3 + $0x18] sm:$0xff] %v1241_v41 }

// kernel: generator_forward.8
= control target key start
LH: loop header
LB: loop body
LE: loop exit
PB: predicated region body
PF: predicated region fallthrough
CT: control target
= control target key end

     0   :  { %s3236_s1 = inlined_call_operand.vmem [shape: bf16[256,2048], index: 1, kind: input, shape index: {}]   ;;  %s3237_s0 = inlined_call_operand.vmem [shape: bf16[8,256], index: 0, kind: input, shape index: {}]   ;;  %s3238_s2 = inlined_call_operand.vmem [shape: f32[8,2], index: 2, kind: input, shape index: {}]   ;;  %s3239_s3 = inlined_call_operand.vmem [shape: bf16[8,2048], index: 3, kind: output, shape index: {}]  }
   0x1   :  { %v127_v0 = vld [vmem:[%s3236_s1 + $0x380] sm:$0xff]  ;;  %v128_v2 = vld [vmem:[%s3236_s1 + $0x388] sm:$0xff] }
   0x2   :  { %v135_v1 = vld [vmem:[%s3236_s1 + $0x3c0] sm:$0xff]  ;;  %v136_v4 = vld [vmem:[%s3236_s1 + $0x3c8] sm:$0xff] }
   0x3   :  { %v2207_v3 = vcombine.high %v127_v0, %v135_v1  ;;  %v2206_v5 = vcombine.low %v127_v0, %v135_v1  ;;  %v111_v6 = vld [vmem:[%s3236_s1 + $0x300] sm:$0xff]  ;;  %v2209_v8 = vcombine.high %v128_v2, %v136_v4  ;;  %v2208_v9 = vcombine.low %v128_v2, %v136_v4  ;;  %v112_v11 = vld [vmem:[%s3236_s1 + $0x308] sm:$0xff] }
   0x4   :  { %v119_v7 = vld [vmem:[%s3236_s1 + $0x340] sm:$0xff]  ;;  %v120_v12 = vld [vmem:[%s3236_s1 + $0x348] sm:$0xff] }
   0x5   :  { %v2191_v10 = vcombine.high %v111_v6, %v119_v7  ;;  %v95_v13 = vld [vmem:[%s3236_s1 + $0x280] sm:$0xff]  ;;  %1558 = vmatprep.subr.bf16.mxu0 %v2207_v3  ;;  %v2193_v14 = vcombine.high %v112_v11, %v120_v12  ;;  %v96_v16 = vld [vmem:[%s3236_s1 + $0x288] sm:$0xff]  ;;  %1599 = vmatprep.subr.bf16.mxu1 %v2209_v8  ;;  %v2190_v18 = vcombine.low %v111_v6, %v119_v7 }
   0x6   :  { %v103_v15 = vld [vmem:[%s3236_s1 + $0x2c0] sm:$0xff]  ;;  %v104_v17 = vld [vmem:[%s3236_s1 + $0x2c8] sm:$0xff]  ;;  %1559 = vmatpush1.bf16.msra.mxu0 %v2206_v5  ;;  %1600 = vmatpush1.bf16.msra.mxu1 %v2208_v9  ;;  %v2192_v19 = vcombine.low %v112_v11, %v120_v12 }
   0x7   :  { %1560 = vmatprep.subr.bf16.mxu0 %v2191_v10  ;;  %v2175_v20 = vcombine.high %v95_v13, %v103_v15  ;;  %1601 = vmatprep.subr.bf16.mxu1 %v2193_v14  ;;  %v2177_v21 = vcombine.high %v96_v16, %v104_v17  ;;  %v79_v22 = vld [vmem:[%s3236_s1 + $0x200] sm:$0xff]  ;;  %v80_v24 = vld [vmem:[%s3236_s1 + $0x208] sm:$0xff]  ;;  %v2174_v26 = vcombine.low %v95_v13, %v103_v15 }
   0x8   :  { %v87_v23 = vld [vmem:[%s3236_s1 + $0x240] sm:$0xff]  ;;  %v88_v25 = vld [vmem:[%s3236_s1 + $0x248] sm:$0xff]  ;;  %v2176_v27 = vcombine.low %v96_v16, %v104_v17 }
   0x9   :  { %v2159_v28 = vcombine.high %v79_v22, %v87_v23  ;;  %v2161_v29 = vcombine.high %v80_v24, %v88_v25  ;;  %v63_v30 = vld [vmem:[%s3236_s1 + $0x180] sm:$0xff]  ;;  %v64_v32 = vld [vmem:[%s3236_s1 + $0x188] sm:$0xff]  ;;  %v2158_v34 = vcombine.low %v79_v22, %v87_v23  ;;  %v2160_v35 = vcombine.low %v80_v24, %v88_v25 }
   0xa   :  { %1561 = vmatpush1.bf16.msra.mxu0 %v2190_v18  ;;  %1602 = vmatpush1.bf16.msra.mxu1 %v2192_v19  ;;  %v71_v31 = vld [vmem:[%s3236_s1 + $0x1c0] sm:$0xff]  ;;  %v72_v33 = vld [vmem:[%s3236_s1 + $0x1c8] sm:$0xff] }
   0xb   :  { %1562 = vmatprep.subr.bf16.mxu0 %v2175_v20  ;;  %1603 = vmatprep.subr.bf16.mxu1 %v2177_v21  ;;  %v2143_v36 = vcombine.high %v63_v30, %v71_v31  ;;  %v2145_v37 = vcombine.high %v64_v32, %v72_v33  ;;  %v47_v38 = vld [vmem:[%s3236_s1 + $0x100] sm:$0xff]  ;;  %v48_v40 = vld [vmem:[%s3236_s1 + $0x108] sm:$0xff]  ;;  %v2142_v42 = vcombine.low %v63_v30, %v71_v31 }
   0xc   :  { %v55_v39 = vld [vmem:[%s3236_s1 + $0x140] sm:$0xff]  ;;  %v56_v41 = vld [vmem:[%s3236_s1 + $0x148] sm:$0xff]  ;;  %v2144_v43 = vcombine.low %v64_v32, %v72_v33 }
   0xd   :  { %v2127_v44 = vcombine.high %v47_v38, %v55_v39  ;;  %v2129_v45 = vcombine.high %v48_v40, %v56_v41  ;;  %v31_v46 = vld [vmem:[%s3236_s1 + $0x80] sm:$0xff]  ;;  %v32_v48 = vld [vmem:[%s3236_s1 + $0x88] sm:$0xff]  ;;  %v2126_v50 = vcombine.low %v47_v38, %v55_v39  ;;  %v2128_v51 = vcombine.low %v48_v40, %v56_v41 }
   0xe   :  { %1563 = vmatpush1.bf16.msra.mxu0 %v2174_v26  ;;  %1604 = vmatpush1.bf16.msra.mxu1 %v2176_v27  ;;  %v39_v47 = vld [vmem:[%s3236_s1 + $0xc0] sm:$0xff]  ;;  %v40_v49 = vld [vmem:[%s3236_s1 + $0xc8] sm:$0xff] }
   0xf   :  { %1564 = vmatprep.subr.bf16.mxu0 %v2159_v28  ;;  %1605 = vmatprep.subr.bf16.mxu1 %v2161_v29  ;;  %v2111_v52 = vcombine.high %v31_v46, %v39_v47  ;;  %v2484_v53 = vld [vmem:[%s3237_s0] sm:$0xff]  ;;  %v2113_v54 = vcombine.high %v32_v48, %v40_v49  ;;  %v16_v58 = vld [vmem:[%s3236_s1 + $0x8] sm:$0xff]  ;;  %v2110_v60 = vcombine.low %v31_v46, %v39_v47 }
  0x10   :  { %v15_v55 = vld [vmem:[%s3236_s1] sm:$0xff]  ;;  %v2494_v57 = vcombine.high %v2484_v53, %v2484_v53  ;;  %v24_v59 = vld [vmem:[%s3236_s1 + $0x48] sm:$0xff]  ;;  %v2112_v61 = vcombine.low %v32_v48, %v40_v49 }
  0x11   :  { %v23_v56 = vld [vmem:[%s3236_s1 + $0x40] sm:$0xff]  ;;  %v2097_v63 = vcombine.high %v16_v58, %v24_v59  ;;  %v256_v2 = vld [vmem:[%s3236_s1 + $0x788] sm:$0xff]  ;;  %v2096_v5 = vcombine.low %v16_v58, %v24_v59 }
  0x12   :  { %1565 = vmatpush1.bf16.msra.mxu0 %v2158_v34  ;;  %1606 = vmatpush1.bf16.msra.mxu1 %v2160_v35  ;;  %v2095_v62 = vcombine.high %v15_v55, %v23_v56  ;;  %v255_v0 = vld [vmem:[%s3236_s1 + $0x780] sm:$0xff]  ;;  %v264_v3 = vld [vmem:[%s3236_s1 + $0x7c8] sm:$0xff]  ;;  %v2094_v4 = vcombine.low %v15_v55, %v23_v56 }
  0x13   :  { %1566 = vmatprep.subr.bf16.mxu0 %v2143_v36  ;;  %1607 = vmatprep.subr.bf16.mxu1 %v2145_v37  ;;  %v263_v1 = vld [vmem:[%s3236_s1 + $0x7c0] sm:$0xff]  ;;  %v2337_v7 = vcombine.high %v256_v2, %v264_v3  ;;  %v240_v10 = vld [vmem:[%s3236_s1 + $0x708] sm:$0xff]  ;;  %v2336_v13 = vcombine.low %v256_v2, %v264_v3  ;;  %v129_v2 = vld [vmem:[%s3236_s1 + $0x390] sm:$0xff] }
  0x14   :  { %1590 = vmatprep.mubr.bf16.mxu0 %v2494_v57  ;;  %1631 = vmatprep.mubr.bf16.mxu1 %v2494_v57  ;;  %v2335_v6 = vcombine.high %v255_v0, %v263_v1  ;;  %v239_v8 = vld [vmem:[%s3236_s1 + $0x700] sm:$0xff]  ;;  %v248_v11 = vld [vmem:[%s3236_s1 + $0x748] sm:$0xff]  ;;  %v2334_v12 = vcombine.low %v255_v0, %v263_v1  ;;  %v137_v3 = vld [vmem:[%s3236_s1 + $0x3d0] sm:$0xff] }
  0x15   :  { %v247_v9 = vld [vmem:[%s3236_s1 + $0x740] sm:$0xff]  ;;  %v2321_v15 = vcombine.high %v240_v10, %v248_v11  ;;  %v224_v18 = vld [vmem:[%s3236_s1 + $0x688] sm:$0xff]  ;;  %v2320_v21 = vcombine.low %v240_v10, %v248_v11  ;;  %v113_v10 = vld [vmem:[%s3236_s1 + $0x310] sm:$0xff] }
  0x16   :  { %1567 = vmatpush1.bf16.msra.mxu0 %v2142_v42  ;;  %1608 = vmatpush1.bf16.msra.mxu1 %v2144_v43  ;;  %v2319_v14 = vcombine.high %v239_v8, %v247_v9  ;;  %v223_v16 = vld [vmem:[%s3236_s1 + $0x680] sm:$0xff]  ;;  %v232_v19 = vld [vmem:[%s3236_s1 + $0x6c8] sm:$0xff]  ;;  %v2318_v20 = vcombine.low %v239_v8, %v247_v9  ;;  %v2211_v8 = vcombine.high %v129_v2, %v137_v3  ;;  %v121_v11 = vld [vmem:[%s3236_s1 + $0x350] sm:$0xff] }
  0x17   :  { %1568 = vmatprep.subr.bf16.mxu0 %v2127_v44  ;;  %1609 = vmatprep.subr.bf16.mxu1 %v2129_v45  ;;  %v231_v17 = vld [vmem:[%s3236_s1 + $0x6c0] sm:$0xff]  ;;  %v2305_v23 = vcombine.high %v224_v18, %v232_v19  ;;  %v208_v26 = vld [vmem:[%s3236_s1 + $0x608] sm:$0xff]  ;;  %v2304_v29 = vcombine.low %v224_v18, %v232_v19  ;;  %v105_v19 = vld [vmem:[%s3236_s1 + $0x2d0] sm:$0xff] }
  0x18   :  { %v2303_v22 = vcombine.high %v223_v16, %v231_v17  ;;  %v207_v24 = vld [vmem:[%s3236_s1 + $0x600] sm:$0xff]  ;;  %v216_v27 = vld [vmem:[%s3236_s1 + $0x648] sm:$0xff]  ;;  %v2302_v28 = vcombine.low %v223_v16, %v231_v17  ;;  %v2195_v17 = vcombine.high %v113_v10, %v121_v11 }
  0x19   :  { %v215_v25 = vld [vmem:[%s3236_s1 + $0x640] sm:$0xff]  ;;  %v2289_v31 = vcombine.high %v208_v26, %v216_v27  ;;  %v192_v34 = vld [vmem:[%s3236_s1 + $0x588] sm:$0xff]  ;;  %v2288_v37 = vcombine.low %v208_v26, %v216_v27  ;;  %v81_v26 = vld [vmem:[%s3236_s1 + $0x210] sm:$0xff] }
  0x1a   :  { %1569 = vmatpush1.bf16.msra.mxu0 %v2126_v50  ;;  %1610 = vmatpush1.bf16.msra.mxu1 %v2128_v51  ;;  %v2287_v30 = vcombine.high %v207_v24, %v215_v25  ;;  %v191_v32 = vld [vmem:[%s3236_s1 + $0x580] sm:$0xff]  ;;  %v200_v35 = vld [vmem:[%s3236_s1 + $0x5c8] sm:$0xff]  ;;  %v2286_v36 = vcombine.low %v207_v24, %v215_v25  ;;  %v89_v27 = vld [vmem:[%s3236_s1 + $0x250] sm:$0xff] }
  0x1b   :  { %1570 = vmatprep.subr.bf16.mxu0 %v2111_v52  ;;  %1611 = vmatprep.subr.bf16.mxu1 %v2113_v54  ;;  %v199_v33 = vld [vmem:[%s3236_s1 + $0x5c0] sm:$0xff]  ;;  %v2273_v39 = vcombine.high %v192_v34, %v200_v35  ;;  %v176_v42 = vld [vmem:[%s3236_s1 + $0x508] sm:$0xff]  ;;  %v2272_v45 = vcombine.low %v192_v34, %v200_v35  ;;  %v65_v34 = vld [vmem:[%s3236_s1 + $0x190] sm:$0xff] }
  0x1c   :  { %v2271_v38 = vcombine.high %v191_v32, %v199_v33  ;;  %v175_v40 = vld [vmem:[%s3236_s1 + $0x500] sm:$0xff]  ;;  %v184_v43 = vld [vmem:[%s3236_s1 + $0x548] sm:$0xff]  ;;  %v2270_v44 = vcombine.low %v191_v32, %v199_v33  ;;  %v2163_v32 = vcombine.high %v81_v26, %v89_v27  ;;  %v73_v35 = vld [vmem:[%s3236_s1 + $0x1d0] sm:$0xff] }
  0x1d   :  { %v183_v41 = vld [vmem:[%s3236_s1 + $0x540] sm:$0xff]  ;;  %v2257_v47 = vcombine.high %v176_v42, %v184_v43  ;;  %v160_v50 = vld [vmem:[%s3236_s1 + $0x488] sm:$0xff]  ;;  %v2256_v54 = vcombine.low %v176_v42, %v184_v43  ;;  %v49_v42 = vld [vmem:[%s3236_s1 + $0x110] sm:$0xff] }
  0x1e   :  { %1571 = vmatpush1.bf16.msra.mxu0 %v2110_v60  ;;  %1612 = vmatpush1.bf16.msra.mxu1 %v2112_v61  ;;  %v2255_v46 = vcombine.high %v175_v40, %v183_v41  ;;  %v159_v48 = vld [vmem:[%s3236_s1 + $0x480] sm:$0xff]  ;;  %v168_v51 = vld [vmem:[%s3236_s1 + $0x4c8] sm:$0xff]  ;;  %v2254_v52 = vcombine.low %v175_v40, %v183_v41  ;;  %v2147_v40 = vcombine.high %v65_v34, %v73_v35  ;;  %v57_v43 = vld [vmem:[%s3236_s1 + $0x150] sm:$0xff] }
  0x1f   :  { %1572 = vmatprep.subr.bf16.mxu0 %v2095_v62  ;;  %1613 = vmatprep.subr.bf16.mxu1 %v2097_v63  ;;  %v167_v49 = vld [vmem:[%s3236_s1 + $0x4c0] sm:$0xff]  ;;  %v2241_v56 = vcombine.high %v160_v50, %v168_v51  ;;  %v144_v60 = vld [vmem:[%s3236_s1 + $0x408] sm:$0xff]  ;;  %v2240_v63 = vcombine.low %v160_v50, %v168_v51  ;;  %v33_v50 = vld [vmem:[%s3236_s1 + $0x90] sm:$0xff] }
  0x20   :  { %v2239_v55 = vcombine.high %v159_v48, %v167_v49  ;;  %v143_v58 = vld [vmem:[%s3236_s1 + $0x400] sm:$0xff]  ;;  %v152_v61 = vld [vmem:[%s3236_s1 + $0x448] sm:$0xff]  ;;  %v2238_v62 = vcombine.low %v159_v48, %v167_v49  ;;  %v2131_v48 = vcombine.high %v49_v42, %v57_v43  ;;  %v41_v51 = vld [vmem:[%s3236_s1 + $0xd0] sm:$0xff] }
  0x21   :  { %v151_v59 = vld [vmem:[%s3236_s1 + $0x440] sm:$0xff]  ;;  %v2225_v1 = vcombine.high %v144_v60, %v152_v61 }
  0x22   :  { %1573 = vmatpush1.bf16.msra.mxu0 %v2094_v4  ;;  %1614 = vmatpush1.bf16.msra.mxu1 %v2096_v5  ;;  %v2223_v0 = vcombine.high %v143_v58, %v151_v59  ;;  %v130_v4 = vld [vmem:[%s3236_s1 + $0x398] sm:$0xff] }
  0x23   :  { %1574 = vmatprep.subr.bf16.mxu0 %v2335_v6  ;;  %1615 = vmatprep.subr.bf16.mxu1 %v2337_v7  ;;  %v138_v5 = vld [vmem:[%s3236_s1 + $0x3d8] sm:$0xff]  ;;  %v2222_v6 = vcombine.low %v143_v58, %v151_v59  ;;  %v2224_v7 = vcombine.low %v144_v60, %v152_v61  ;;  %v2115_v58 = vcombine.high %v33_v50, %v41_v51  ;;  %v17_v60 = vld [vmem:[%s3236_s1 + $0x10] sm:$0xff] }
  0x24   :  { %v2213_v9 = vcombine.high %v130_v4, %v138_v5  ;;  %v2212_v16 = vcombine.low %v130_v4, %v138_v5  ;;  %v25_v61 = vld [vmem:[%s3236_s1 + $0x50] sm:$0xff] }
  0x25   :  { %v257_v4 = vld [vmem:[%s3236_s1 + $0x790] sm:$0xff] }
  0x26   :  { %1575 = vmatpush2.bf16.msra.mxu0 %v2334_v12  ;;  %1616 = vmatpush2.bf16.msra.mxu1 %v2336_v13  ;;  %v2620_v12 = vcombine.low %v2484_v53, %v2484_v53  ;;  %v114_v13 = vld [vmem:[%s3236_s1 + $0x318] sm:$0xff]  ;;  %v97_v53 = vld [vmem:[%s3236_s1 + $0x290] sm:$0xff] }
  0x27   :  { %1576 = vmatprep.subr.bf16.mxu0 %v2319_v14  ;;  %1617 = vmatprep.subr.bf16.mxu1 %v2321_v15  ;;  %v122_v14 = vld [vmem:[%s3236_s1 + $0x358] sm:$0xff]  ;;  %v2210_v15 = vcombine.low %v129_v2, %v137_v3  ;;  %v2179_v24 = vcombine.high %v97_v53, %v105_v19  ;;  %v2099_v2 = vcombine.high %v17_v60, %v25_v61  ;;  %v265_v5 = vld [vmem:[%s3236_s1 + $0x7d0] sm:$0xff] }
  0x28   :  { %v2197_v18 = vcombine.high %v114_v13, %v122_v14 }
  0x2a   :  { %1577 = vmatpush2.bf16.msra.mxu0 %v2318_v20  ;;  %1618 = vmatpush2.bf16.msra.mxu1 %v2320_v21  ;;  %v98_v20 = vld [vmem:[%s3236_s1 + $0x298] sm:$0xff] }
  0x2b   :  { %1578 = vmatprep.subr.bf16.mxu0 %v2303_v22  ;;  %1619 = vmatprep.subr.bf16.mxu1 %v2305_v23  ;;  %v106_v21 = vld [vmem:[%s3236_s1 + $0x2d8] sm:$0xff]  ;;  %v2194_v22 = vcombine.low %v113_v10, %v121_v11  ;;  %v2196_v23 = vcombine.low %v114_v13, %v122_v14  ;;  %v2339_v10 = vcombine.high %v257_v4, %v265_v5  ;;  %v241_v13 = vld [vmem:[%s3236_s1 + $0x710] sm:$0xff] }
  0x2c   :  { %v2181_v25 = vcombine.high %v98_v20, %v106_v21  ;;  %v249_v14 = vld [vmem:[%s3236_s1 + $0x750] sm:$0xff] }
  0x2e   :  { %1579 = vmatpush2.bf16.msra.mxu0 %v2302_v28  ;;  %1620 = vmatpush2.bf16.msra.mxu1 %v2304_v29  ;;  %v82_v28 = vld [vmem:[%s3236_s1 + $0x218] sm:$0xff] }
  0x2f   :  { %1580 = vmatprep.subr.bf16.mxu0 %v2287_v30  ;;  %1621 = vmatprep.subr.bf16.mxu1 %v2289_v31  ;;  %v90_v29 = vld [vmem:[%s3236_s1 + $0x258] sm:$0xff]  ;;  %v2178_v30 = vcombine.low %v97_v53, %v105_v19  ;;  %v2180_v31 = vcombine.low %v98_v20, %v106_v21  ;;  %v2323_v53 = vcombine.high %v241_v13, %v249_v14  ;;  %v225_v20 = vld [vmem:[%s3236_s1 + $0x690] sm:$0xff] }
  0x30   :  { %v2165_v33 = vcombine.high %v82_v28, %v90_v29  ;;  %v233_v21 = vld [vmem:[%s3236_s1 + $0x6d0] sm:$0xff] }
  0x32   :  { %1581 = vmatpush2.bf16.msra.mxu0 %v2286_v36  ;;  %1622 = vmatpush2.bf16.msra.mxu1 %v2288_v37  ;;  %v66_v36 = vld [vmem:[%s3236_s1 + $0x198] sm:$0xff] }
  0x33   :  { %1582 = vmatprep.subr.bf16.mxu0 %v2271_v38  ;;  %1623 = vmatprep.subr.bf16.mxu1 %v2273_v39  ;;  %v74_v37 = vld [vmem:[%s3236_s1 + $0x1d8] sm:$0xff]  ;;  %v2162_v38 = vcombine.low %v81_v26, %v89_v27  ;;  %v2164_v39 = vcombine.low %v82_v28, %v90_v29  ;;  %v2307_v26 = vcombine.high %v225_v20, %v233_v21  ;;  %v209_v28 = vld [vmem:[%s3236_s1 + $0x610] sm:$0xff] }
  0x34   :  { %v2149_v41 = vcombine.high %v66_v36, %v74_v37  ;;  %v217_v29 = vld [vmem:[%s3236_s1 + $0x650] sm:$0xff] }
  0x36   :  { %1583 = vmatpush2.bf16.msra.mxu0 %v2270_v44  ;;  %1624 = vmatpush2.bf16.msra.mxu1 %v2272_v45  ;;  %v50_v44 = vld [vmem:[%s3236_s1 + $0x118] sm:$0xff] }
  0x37   :  { %1584 = vmatprep.subr.bf16.mxu0 %v2255_v46  ;;  %1625 = vmatprep.subr.bf16.mxu1 %v2257_v47  ;;  %v58_v45 = vld [vmem:[%s3236_s1 + $0x158] sm:$0xff]  ;;  %v2146_v46 = vcombine.low %v65_v34, %v73_v35  ;;  %v2148_v47 = vcombine.low %v66_v36, %v74_v37  ;;  %v2291_v34 = vcombine.high %v209_v28, %v217_v29  ;;  %v193_v36 = vld [vmem:[%s3236_s1 + $0x590] sm:$0xff] }
  0x38   :  { %v2133_v49 = vcombine.high %v50_v44, %v58_v45  ;;  %v201_v37 = vld [vmem:[%s3236_s1 + $0x5d0] sm:$0xff] }
  0x3a   :  { %1585 = vmatpush2.bf16.msra.mxu0 %v2254_v52  ;;  %1626 = vmatpush2.bf16.msra.mxu1 %v2256_v54  ;;  %v34_v52 = vld [vmem:[%s3236_s1 + $0x98] sm:$0xff] }
  0x3b   :  { %1586 = vmatprep.subr.bf16.mxu0 %v2239_v55  ;;  %1627 = vmatprep.subr.bf16.mxu1 %v2241_v56  ;;  %v42_v54 = vld [vmem:[%s3236_s1 + $0xd8] sm:$0xff]  ;;  %v2130_v55 = vcombine.low %v49_v42, %v57_v43  ;;  %v2132_v56 = vcombine.low %v50_v44, %v58_v45  ;;  %v2275_v42 = vcombine.high %v193_v36, %v201_v37  ;;  %v177_v44 = vld [vmem:[%s3236_s1 + $0x510] sm:$0xff] }
  0x3c   :  { %v2117_v59 = vcombine.high %v34_v52, %v42_v54  ;;  %v185_v45 = vld [vmem:[%s3236_s1 + $0x550] sm:$0xff] }
  0x3e   :  { %1587 = vmatpush2.bf16.msra.mxu0 %v2238_v62  ;;  %1628 = vmatpush2.bf16.msra.mxu1 %v2240_v63  ;;  %v18_v62 = vld [vmem:[%s3236_s1 + $0x18] sm:$0xff] }
  0x3f   :  { %1588 = vmatprep.subr.bf16.mxu0 %v2223_v0  ;;  %1629 = vmatprep.subr.bf16.mxu1 %v2225_v1  ;;  %v26_v63 = vld [vmem:[%s3236_s1 + $0x58] sm:$0xff]  ;;  %v2114_v0 = vcombine.low %v33_v50, %v41_v51  ;;  %v2116_v1 = vcombine.low %v34_v52, %v42_v54  ;;  %v2259_v50 = vcombine.high %v177_v44, %v185_v45  ;;  %v161_v52 = vld [vmem:[%s3236_s1 + $0x490] sm:$0xff] }
  0x40   :  { %v2101_v3 = vcombine.high %v18_v62, %v26_v63  ;;  %v169_v54 = vld [vmem:[%s3236_s1 + $0x4d0] sm:$0xff] }
  0x42   :  { %1589 = vmatpush2.bf16.msra.mxu0 %v2222_v6  ;;  %1630 = vmatpush2.bf16.msra.mxu1 %v2224_v7  ;;  %v258_v6 = vld [vmem:[%s3236_s1 + $0x798] sm:$0xff] }
  0x43   :  { %1640 = vmatprep.subr.bf16.mxu0 %v2211_v8  ;;  %1681 = vmatprep.subr.bf16.mxu1 %v2213_v9  ;;  %v266_v7 = vld [vmem:[%s3236_s1 + $0x7d8] sm:$0xff]  ;;  %v2098_v8 = vcombine.low %v17_v60, %v25_v61  ;;  %v2100_v9 = vcombine.low %v18_v62, %v26_v63  ;;  %v2243_v60 = vcombine.high %v161_v52, %v169_v54  ;;  %v145_v62 = vld [vmem:[%s3236_s1 + $0x410] sm:$0xff] }
  0x44   :  { %v2341_v11 = vcombine.high %v258_v6, %v266_v7  ;;  %v153_v63 = vld [vmem:[%s3236_s1 + $0x450] sm:$0xff] }
  0x45   :  { %1591 = vmatmul.mubr.bf16.vlgmr.msra.gmra.mxu0 %v2620_v12  ;;  %1632 = vmatmul.mubr.bf16.vlgmr.msra.gmra.mxu1 %v2620_v12 }
  0x46   :  { %1641 = vmatpush1.bf16.msra.mxu0 %v2210_v15  ;;  %1682 = vmatpush1.bf16.msra.mxu1 %v2212_v16  ;;  %v242_v15 = vld [vmem:[%s3236_s1 + $0x718] sm:$0xff] }
  0x47   :  { %1642 = vmatprep.subr.bf16.mxu0 %v2195_v17  ;;  %1683 = vmatprep.subr.bf16.mxu1 %v2197_v18  ;;  %v250_v16 = vld [vmem:[%s3236_s1 + $0x758] sm:$0xff]  ;;  %v2338_v17 = vcombine.low %v257_v4, %v265_v5  ;;  %v2340_v18 = vcombine.low %v258_v6, %v266_v7  ;;  %v2227_v4 = vcombine.high %v145_v62, %v153_v63  ;;  %v131_v6 = vld [vmem:[%s3236_s1 + $0x3a0] sm:$0xff] }
  0x48   :  { %1672 = vmatprep.mubr.bf16.mxu0 %v2494_v57  ;;  %1713 = vmatprep.mubr.bf16.mxu1 %v2494_v57  ;;  %v2325_v19 = vcombine.high %v242_v15, %v250_v16  ;;  %v139_v7 = vld [vmem:[%s3236_s1 + $0x3e0] sm:$0xff] }
  0x4a   :  { %1643 = vmatpush1.bf16.msra.mxu0 %v2194_v22  ;;  %1684 = vmatpush1.bf16.msra.mxu1 %v2196_v23  ;;  %v226_v22 = vld [vmem:[%s3236_s1 + $0x698] sm:$0xff] }
  0x4b   :  { %1644 = vmatprep.subr.bf16.mxu0 %v2179_v24  ;;  %1685 = vmatprep.subr.bf16.mxu1 %v2181_v25  ;;  %v234_v23 = vld [vmem:[%s3236_s1 + $0x6d8] sm:$0xff]  ;;  %v2322_v24 = vcombine.low %v241_v13, %v249_v14  ;;  %v2324_v25 = vcombine.low %v242_v15, %v250_v16  ;;  %v2215_v13 = vcombine.high %v131_v6, %v139_v7  ;;  %v115_v15 = vld [vmem:[%s3236_s1 + $0x320] sm:$0xff] }
  0x4c   :  { %v2309_v27 = vcombine.high %v226_v22, %v234_v23  ;;  %v123_v16 = vld [vmem:[%s3236_s1 + $0x360] sm:$0xff] }
  0x4e   :  { %1645 = vmatpush1.bf16.msra.mxu0 %v2178_v30  ;;  %1686 = vmatpush1.bf16.msra.mxu1 %v2180_v31  ;;  %v210_v30 = vld [vmem:[%s3236_s1 + $0x618] sm:$0xff] }
  0x4f   :  { %1646 = vmatprep.subr.bf16.mxu0 %v2163_v32  ;;  %1687 = vmatprep.subr.bf16.mxu1 %v2165_v33  ;;  %v218_v31 = vld [vmem:[%s3236_s1 + $0x658] sm:$0xff]  ;;  %v2306_v32 = vcombine.low %v225_v20, %v233_v21  ;;  %v2308_v33 = vcombine.low %v226_v22, %v234_v23  ;;  %v2199_v20 = vcombine.high %v115_v15, %v123_v16  ;;  %v99_v22 = vld [vmem:[%s3236_s1 + $0x2a0] sm:$0xff] }
  0x50   :  { %v2293_v35 = vcombine.high %v210_v30, %v218_v31  ;;  %v107_v23 = vld [vmem:[%s3236_s1 + $0x2e0] sm:$0xff] }
  0x52   :  { %1647 = vmatpush1.bf16.msra.mxu0 %v2162_v38  ;;  %1688 = vmatpush1.bf16.msra.mxu1 %v2164_v39  ;;  %v194_v38 = vld [vmem:[%s3236_s1 + $0x598] sm:$0xff] }
  0x53   :  { %1648 = vmatprep.subr.bf16.mxu0 %v2147_v40  ;;  %1689 = vmatprep.subr.bf16.mxu1 %v2149_v41  ;;  %v202_v39 = vld [vmem:[%s3236_s1 + $0x5d8] sm:$0xff]  ;;  %v2290_v40 = vcombine.low %v209_v28, %v217_v29  ;;  %v2292_v41 = vcombine.low %v210_v30, %v218_v31  ;;  %v2183_v28 = vcombine.high %v99_v22, %v107_v23  ;;  %v83_v30 = vld [vmem:[%s3236_s1 + $0x220] sm:$0xff] }
  0x54   :  { %v2277_v43 = vcombine.high %v194_v38, %v202_v39  ;;  %v91_v31 = vld [vmem:[%s3236_s1 + $0x260] sm:$0xff] }
  0x56   :  { %1649 = vmatpush1.bf16.msra.mxu0 %v2146_v46  ;;  %1690 = vmatpush1.bf16.msra.mxu1 %v2148_v47  ;;  %v178_v46 = vld [vmem:[%s3236_s1 + $0x518] sm:$0xff] }
  0x57   :  { %1650 = vmatprep.subr.bf16.mxu0 %v2131_v48  ;;  %1691 = vmatprep.subr.bf16.mxu1 %v2133_v49  ;;  %v186_v47 = vld [vmem:[%s3236_s1 + $0x558] sm:$0xff]  ;;  %v2274_v48 = vcombine.low %v193_v36, %v201_v37  ;;  %v2276_v49 = vcombine.low %v194_v38, %v202_v39  ;;  %v2167_v36 = vcombine.high %v83_v30, %v91_v31  ;;  %v67_v38 = vld [vmem:[%s3236_s1 + $0x1a0] sm:$0xff] }
  0x58   :  { %v2261_v51 = vcombine.high %v178_v46, %v186_v47  ;;  %v75_v39 = vld [vmem:[%s3236_s1 + $0x1e0] sm:$0xff] }
  0x5a   :  { %1651 = vmatpush1.bf16.msra.mxu0 %v2130_v55  ;;  %1692 = vmatpush1.bf16.msra.mxu1 %v2132_v56  ;;  %v162_v55 = vld [vmem:[%s3236_s1 + $0x498] sm:$0xff] }
  0x5b   :  { %1652 = vmatprep.subr.bf16.mxu0 %v2115_v58  ;;  %1693 = vmatprep.subr.bf16.mxu1 %v2117_v59  ;;  %v170_v56 = vld [vmem:[%s3236_s1 + $0x4d8] sm:$0xff]  ;;  %v2258_v58 = vcombine.low %v177_v44, %v185_v45  ;;  %v2260_v59 = vcombine.low %v178_v46, %v186_v47  ;;  %v2151_v44 = vcombine.high %v67_v38, %v75_v39  ;;  %v51_v46 = vld [vmem:[%s3236_s1 + $0x120] sm:$0xff] }
  0x5c   :  { %v2245_v61 = vcombine.high %v162_v55, %v170_v56  ;;  %v59_v47 = vld [vmem:[%s3236_s1 + $0x160] sm:$0xff] }
  0x5e   :  { %1653 = vmatpush1.bf16.msra.mxu0 %v2114_v0  ;;  %1694 = vmatpush1.bf16.msra.mxu1 %v2116_v1  ;;  %v146_v0 = vld [vmem:[%s3236_s1 + $0x418] sm:$0xff] }
  0x5f   :  { %1654 = vmatprep.subr.bf16.mxu0 %v2099_v2  ;;  %1695 = vmatprep.subr.bf16.mxu1 %v2101_v3  ;;  %v154_v1 = vld [vmem:[%s3236_s1 + $0x458] sm:$0xff]  ;;  %v2242_v2 = vcombine.low %v161_v52, %v169_v54  ;;  %v2244_v3 = vcombine.low %v162_v55, %v170_v56  ;;  %v2135_v52 = vcombine.high %v51_v46, %v59_v47  ;;  %v35_v55 = vld [vmem:[%s3236_s1 + $0xa0] sm:$0xff] }
  0x60   :  { %v2229_v5 = vcombine.high %v146_v0, %v154_v1  ;;  %v43_v56 = vld [vmem:[%s3236_s1 + $0xe0] sm:$0xff] }
  0x62   :  { %1655 = vmatpush1.bf16.msra.mxu0 %v2098_v8  ;;  %1696 = vmatpush1.bf16.msra.mxu1 %v2100_v9  ;;  %v132_v8 = vld [vmem:[%s3236_s1 + $0x3a8] sm:$0xff] }
  0x63   :  { %1656 = vmatprep.subr.bf16.mxu0 %v2339_v10  ;;  %1697 = vmatprep.subr.bf16.mxu1 %v2341_v11  ;;  %v140_v9 = vld [vmem:[%s3236_s1 + $0x3e8] sm:$0xff]  ;;  %v2226_v10 = vcombine.low %v145_v62, %v153_v63  ;;  %v2228_v11 = vcombine.low %v146_v0, %v154_v1  ;;  %v2119_v62 = vcombine.high %v35_v55, %v43_v56  ;;  %v19_v0 = vld [vmem:[%s3236_s1 + $0x20] sm:$0xff] }
  0x64   :  { %v2217_v14 = vcombine.high %v132_v8, %v140_v9  ;;  %v27_v1 = vld [vmem:[%s3236_s1 + $0x60] sm:$0xff] }
  0x66   :  { %1657 = vmatpush2.bf16.msra.mxu0 %v2338_v17  ;;  %1698 = vmatpush2.bf16.msra.mxu1 %v2340_v18  ;;  %v116_v17 = vld [vmem:[%s3236_s1 + $0x328] sm:$0xff] }
  0x67   :  { %1658 = vmatprep.subr.bf16.mxu0 %v2323_v53  ;;  %1699 = vmatprep.subr.bf16.mxu1 %v2325_v19  ;;  %v124_v18 = vld [vmem:[%s3236_s1 + $0x368] sm:$0xff]  ;;  %v2214_v53 = vcombine.low %v131_v6, %v139_v7  ;;  %v2216_v19 = vcombine.low %v132_v8, %v140_v9  ;;  %v2103_v6 = vcombine.high %v19_v0, %v27_v1  ;;  %v259_v8 = vld [vmem:[%s3236_s1 + $0x7a0] sm:$0xff] }
  0x68   :  { %v2201_v21 = vcombine.high %v116_v17, %v124_v18  ;;  %v267_v9 = vld [vmem:[%s3236_s1 + $0x7e0] sm:$0xff] }
  0x6a   :  { %1659 = vmatpush2.bf16.msra.mxu0 %v2322_v24  ;;  %1700 = vmatpush2.bf16.msra.mxu1 %v2324_v25  ;;  %v100_v24 = vld [vmem:[%s3236_s1 + $0x2a8] sm:$0xff] }
  0x6b   :  { %1660 = vmatprep.subr.bf16.mxu0 %v2307_v26  ;;  %1701 = vmatprep.subr.bf16.mxu1 %v2309_v27  ;;  %v108_v25 = vld [vmem:[%s3236_s1 + $0x2e8] sm:$0xff]  ;;  %v2198_v26 = vcombine.low %v115_v15, %v123_v16  ;;  %v2200_v27 = vcombine.low %v116_v17, %v124_v18  ;;  %v2343_v15 = vcombine.high %v259_v8, %v267_v9  ;;  %v243_v17 = vld [vmem:[%s3236_s1 + $0x720] sm:$0xff] }
  0x6c   :  { %v2185_v29 = vcombine.high %v100_v24, %v108_v25  ;;  %v251_v18 = vld [vmem:[%s3236_s1 + $0x760] sm:$0xff] }
  0x6e   :  { %1661 = vmatpush2.bf16.msra.mxu0 %v2306_v32  ;;  %1702 = vmatpush2.bf16.msra.mxu1 %v2308_v33  ;;  %v84_v32 = vld [vmem:[%s3236_s1 + $0x228] sm:$0xff] }
  0x6f   :  { %1662 = vmatprep.subr.bf16.mxu0 %v2291_v34  ;;  %1703 = vmatprep.subr.bf16.mxu1 %v2293_v35  ;;  %v92_v33 = vld [vmem:[%s3236_s1 + $0x268] sm:$0xff]  ;;  %v2182_v34 = vcombine.low %v99_v22, %v107_v23  ;;  %v2184_v35 = vcombine.low %v100_v24, %v108_v25  ;;  %v2327_v22 = vcombine.high %v243_v17, %v251_v18  ;;  %v227_v24 = vld [vmem:[%s3236_s1 + $0x6a0] sm:$0xff] }
  0x70   :  { %v2169_v37 = vcombine.high %v84_v32, %v92_v33  ;;  %v235_v25 = vld [vmem:[%s3236_s1 + $0x6e0] sm:$0xff] }
  0x72   :  { %1663 = vmatpush2.bf16.msra.mxu0 %v2290_v40  ;;  %1704 = vmatpush2.bf16.msra.mxu1 %v2292_v41  ;;  %v68_v40 = vld [vmem:[%s3236_s1 + $0x1a8] sm:$0xff] }
  0x73   :  { %1664 = vmatprep.subr.bf16.mxu0 %v2275_v42  ;;  %1705 = vmatprep.subr.bf16.mxu1 %v2277_v43  ;;  %v76_v41 = vld [vmem:[%s3236_s1 + $0x1e8] sm:$0xff]  ;;  %v2166_v42 = vcombine.low %v83_v30, %v91_v31  ;;  %v2168_v43 = vcombine.low %v84_v32, %v92_v33  ;;  %v2311_v30 = vcombine.high %v227_v24, %v235_v25  ;;  %v211_v32 = vld [vmem:[%s3236_s1 + $0x620] sm:$0xff] }
  0x74   :  { %v2153_v45 = vcombine.high %v68_v40, %v76_v41  ;;  %v219_v33 = vld [vmem:[%s3236_s1 + $0x660] sm:$0xff] }
  0x76   :  { %1665 = vmatpush2.bf16.msra.mxu0 %v2274_v48  ;;  %1706 = vmatpush2.bf16.msra.mxu1 %v2276_v49  ;;  %v52_v48 = vld [vmem:[%s3236_s1 + $0x128] sm:$0xff] }
  0x77   :  { %1666 = vmatprep.subr.bf16.mxu0 %v2259_v50  ;;  %1707 = vmatprep.subr.bf16.mxu1 %v2261_v51  ;;  %v60_v49 = vld [vmem:[%s3236_s1 + $0x168] sm:$0xff]  ;;  %v2150_v50 = vcombine.low %v67_v38, %v75_v39  ;;  %v2152_v51 = vcombine.low %v68_v40, %v76_v41  ;;  %v2295_v38 = vcombine.high %v211_v32, %v219_v33  ;;  %v195_v40 = vld [vmem:[%s3236_s1 + $0x5a0] sm:$0xff] }
  0x78   :  { %v2137_v54 = vcombine.high %v52_v48, %v60_v49  ;;  %v203_v41 = vld [vmem:[%s3236_s1 + $0x5e0] sm:$0xff] }
  0x7a   :  { %1667 = vmatpush2.bf16.msra.mxu0 %v2258_v58  ;;  %1708 = vmatpush2.bf16.msra.mxu1 %v2260_v59  ;;  %v36_v58 = vld [vmem:[%s3236_s1 + $0xa8] sm:$0xff] }
  0x7b   :  { %1668 = vmatprep.subr.bf16.mxu0 %v2243_v60  ;;  %1709 = vmatprep.subr.bf16.mxu1 %v2245_v61  ;;  %v44_v59 = vld [vmem:[%s3236_s1 + $0xe8] sm:$0xff]  ;;  %v2134_v60 = vcombine.low %v51_v46, %v59_v47  ;;  %v2136_v61 = vcombine.low %v52_v48, %v60_v49  ;;  %v2279_v46 = vcombine.high %v195_v40, %v203_v41  ;;  %v179_v48 = vld [vmem:[%s3236_s1 + $0x520] sm:$0xff] }
  0x7c   :  { %v2121_v63 = vcombine.high %v36_v58, %v44_v59  ;;  %v187_v49 = vld [vmem:[%s3236_s1 + $0x560] sm:$0xff] }
  0x7e   :  { %1669 = vmatpush2.bf16.msra.mxu0 %v2242_v2  ;;  %1710 = vmatpush2.bf16.msra.mxu1 %v2244_v3  ;;  %v20_v2 = vld [vmem:[%s3236_s1 + $0x28] sm:$0xff] }
  0x7f   :  { %1670 = vmatprep.subr.bf16.mxu0 %v2227_v4  ;;  %1711 = vmatprep.subr.bf16.mxu1 %v2229_v5  ;;  %v28_v3 = vld [vmem:[%s3236_s1 + $0x68] sm:$0xff]  ;;  %v2118_v4 = vcombine.low %v35_v55, %v43_v56  ;;  %v2120_v5 = vcombine.low %v36_v58, %v44_v59  ;;  %v2263_v55 = vcombine.high %v179_v48, %v187_v49  ;;  %v163_v58 = vld [vmem:[%s3236_s1 + $0x4a0] sm:$0xff] }
  0x80   :  { %v2105_v7 = vcombine.high %v20_v2, %v28_v3  ;;  %v171_v59 = vld [vmem:[%s3236_s1 + $0x4e0] sm:$0xff] }
  0x82   :  { %1671 = vmatpush2.bf16.msra.mxu0 %v2226_v10  ;;  %1712 = vmatpush2.bf16.msra.mxu1 %v2228_v11  ;;  %v260_v10 = vld [vmem:[%s3236_s1 + $0x7a8] sm:$0xff] }
  0x83   :  { %1722 = vmatprep.subr.bf16.mxu0 %v2215_v13  ;;  %1763 = vmatprep.subr.bf16.mxu1 %v2217_v14  ;;  %v268_v11 = vld [vmem:[%s3236_s1 + $0x7e8] sm:$0xff]  ;;  %v2102_v13 = vcombine.low %v19_v0, %v27_v1  ;;  %v2104_v14 = vcombine.low %v20_v2, %v28_v3  ;;  %v2247_v0 = vcombine.high %v163_v58, %v171_v59  ;;  %v147_v2 = vld [vmem:[%s3236_s1 + $0x420] sm:$0xff] }
  0x84   :  { %v2345_v16 = vcombine.high %v260_v10, %v268_v11  ;;  %v155_v3 = vld [vmem:[%s3236_s1 + $0x460] sm:$0xff] }
  0x85   :  { %1673 = vmatmul.mubr.bf16.vlgmr.msra.gmra.mxu0 %v2620_v12  ;;  %1714 = vmatmul.mubr.bf16.vlgmr.msra.gmra.mxu1 %v2620_v12 }
  0x86   :  { %1723 = vmatpush1.bf16.msra.mxu0 %v2214_v53  ;;  %1764 = vmatpush1.bf16.msra.mxu1 %v2216_v19  ;;  %v244_v53 = vld [vmem:[%s3236_s1 + $0x728] sm:$0xff] }
  0x87   :  { %1724 = vmatprep.subr.bf16.mxu0 %v2199_v20  ;;  %1765 = vmatprep.subr.bf16.mxu1 %v2201_v21  ;;  %v252_v19 = vld [vmem:[%s3236_s1 + $0x768] sm:$0xff]  ;;  %v2342_v20 = vcombine.low %v259_v8, %v267_v9  ;;  %v2344_v21 = vcombine.low %v260_v10, %v268_v11  ;;  %v2231_v8 = vcombine.high %v147_v2, %v155_v3  ;;  %v133_v10 = vld [vmem:[%s3236_s1 + $0x3b0] sm:$0xff] }
  0x88   :  { %1754 = vmatprep.mubr.bf16.mxu0 %v2494_v57  ;;  %1795 = vmatprep.mubr.bf16.mxu1 %v2494_v57  ;;  %v2329_v23 = vcombine.high %v244_v53, %v252_v19  ;;  %v141_v11 = vld [vmem:[%s3236_s1 + $0x3f0] sm:$0xff] }
  0x8a   :  { %1725 = vmatpush1.bf16.msra.mxu0 %v2198_v26  ;;  %1766 = vmatpush1.bf16.msra.mxu1 %v2200_v27  ;;  %v228_v26 = vld [vmem:[%s3236_s1 + $0x6a8] sm:$0xff] }
  0x8b   :  { %1726 = vmatprep.subr.bf16.mxu0 %v2183_v28  ;;  %1767 = vmatprep.subr.bf16.mxu1 %v2185_v29  ;;  %v236_v27 = vld [vmem:[%s3236_s1 + $0x6e8] sm:$0xff]  ;;  %v2326_v28 = vcombine.low %v243_v17, %v251_v18  ;;  %v2328_v29 = vcombine.low %v244_v53, %v252_v19  ;;  %v2219_v17 = vcombine.high %v133_v10, %v141_v11  ;;  %v117_v53 = vld [vmem:[%s3236_s1 + $0x330] sm:$0xff] }
  0x8c   :  { %v2313_v31 = vcombine.high %v228_v26, %v236_v27  ;;  %v125_v19 = vld [vmem:[%s3236_s1 + $0x370] sm:$0xff] }
  0x8e   :  { %1727 = vmatpush1.bf16.msra.mxu0 %v2182_v34  ;;  %1768 = vmatpush1.bf16.msra.mxu1 %v2184_v35  ;;  %v212_v34 = vld [vmem:[%s3236_s1 + $0x628] sm:$0xff] }
  0x8f   :  { %1728 = vmatprep.subr.bf16.mxu0 %v2167_v36  ;;  %1769 = vmatprep.subr.bf16.mxu1 %v2169_v37  ;;  %v220_v35 = vld [vmem:[%s3236_s1 + $0x668] sm:$0xff]  ;;  %v2310_v36 = vcombine.low %v227_v24, %v235_v25  ;;  %v2312_v37 = vcombine.low %v228_v26, %v236_v27  ;;  %v2203_v24 = vcombine.high %v117_v53, %v125_v19  ;;  %v101_v26 = vld [vmem:[%s3236_s1 + $0x2b0] sm:$0xff] }
  0x90   :  { %v2297_v39 = vcombine.high %v212_v34, %v220_v35  ;;  %v109_v27 = vld [vmem:[%s3236_s1 + $0x2f0] sm:$0xff] }
  0x92   :  { %1729 = vmatpush1.bf16.msra.mxu0 %v2166_v42  ;;  %1770 = vmatpush1.bf16.msra.mxu1 %v2168_v43  ;;  %v196_v42 = vld [vmem:[%s3236_s1 + $0x5a8] sm:$0xff] }
  0x93   :  { %1730 = vmatprep.subr.bf16.mxu0 %v2151_v44  ;;  %1771 = vmatprep.subr.bf16.mxu1 %v2153_v45  ;;  %v204_v43 = vld [vmem:[%s3236_s1 + $0x5e8] sm:$0xff]  ;;  %v2294_v44 = vcombine.low %v211_v32, %v219_v33  ;;  %v2296_v45 = vcombine.low %v212_v34, %v220_v35  ;;  %v2187_v32 = vcombine.high %v101_v26, %v109_v27  ;;  %v85_v34 = vld [vmem:[%s3236_s1 + $0x230] sm:$0xff] }
  0x94   :  { %v2281_v47 = vcombine.high %v196_v42, %v204_v43  ;;  %v93_v35 = vld [vmem:[%s3236_s1 + $0x270] sm:$0xff] }
  0x96   :  { %1731 = vmatpush1.bf16.msra.mxu0 %v2150_v50  ;;  %1772 = vmatpush1.bf16.msra.mxu1 %v2152_v51  ;;  %v180_v50 = vld [vmem:[%s3236_s1 + $0x528] sm:$0xff] }
  0x97   :  { %1732 = vmatprep.subr.bf16.mxu0 %v2135_v52  ;;  %1773 = vmatprep.subr.bf16.mxu1 %v2137_v54  ;;  %v188_v51 = vld [vmem:[%s3236_s1 + $0x568] sm:$0xff]  ;;  %v2278_v52 = vcombine.low %v195_v40, %v203_v41  ;;  %v2280_v54 = vcombine.low %v196_v42, %v204_v43  ;;  %v2171_v40 = vcombine.high %v85_v34, %v93_v35  ;;  %v69_v42 = vld [vmem:[%s3236_s1 + $0x1b0] sm:$0xff] }
  0x98   :  { %v2265_v56 = vcombine.high %v180_v50, %v188_v51  ;;  %v77_v43 = vld [vmem:[%s3236_s1 + $0x1f0] sm:$0xff] }
  0x9a   :  { %1733 = vmatpush1.bf16.msra.mxu0 %v2134_v60  ;;  %1774 = vmatpush1.bf16.msra.mxu1 %v2136_v61  ;;  %v164_v60 = vld [vmem:[%s3236_s1 + $0x4a8] sm:$0xff] }
  0x9b   :  { %1734 = vmatprep.subr.bf16.mxu0 %v2119_v62  ;;  %1775 = vmatprep.subr.bf16.mxu1 %v2121_v63  ;;  %v172_v61 = vld [vmem:[%s3236_s1 + $0x4e8] sm:$0xff]  ;;  %v2262_v62 = vcombine.low %v179_v48, %v187_v49  ;;  %v2264_v63 = vcombine.low %v180_v50, %v188_v51  ;;  %v53_v49 = vld [vmem:[%s3236_s1 + $0x130] sm:$0xff]  ;;  %v54_v51 = vld [vmem:[%s3236_s1 + $0x138] sm:$0xff] }
  0x9c   :  { %v2249_v1 = vcombine.high %v164_v60, %v172_v61  ;;  %v61_v50 = vld [vmem:[%s3236_s1 + $0x170] sm:$0xff] }
  0x9e   :  { %1735 = vmatpush1.bf16.msra.mxu0 %v2118_v4  ;;  %1776 = vmatpush1.bf16.msra.mxu1 %v2120_v5  ;;  %v148_v4 = vld [vmem:[%s3236_s1 + $0x428] sm:$0xff] }
  0x9f   :  { %1736 = vmatprep.subr.bf16.mxu0 %v2103_v6  ;;  %1777 = vmatprep.subr.bf16.mxu1 %v2105_v7  ;;  %v156_v5 = vld [vmem:[%s3236_s1 + $0x468] sm:$0xff]  ;;  %v2246_v6 = vcombine.low %v163_v58, %v171_v59  ;;  %v2248_v7 = vcombine.low %v164_v60, %v172_v61  ;;  %v37_v59 = vld [vmem:[%s3236_s1 + $0xb0] sm:$0xff]  ;;  %v38_v61 = vld [vmem:[%s3236_s1 + $0xb8] sm:$0xff] }
  0xa0   :  { %v2233_v9 = vcombine.high %v148_v4, %v156_v5  ;;  %v45_v60 = vld [vmem:[%s3236_s1 + $0xf0] sm:$0xff] }
  0xa2   :  { %1737 = vmatpush1.bf16.msra.mxu0 %v2102_v13  ;;  %1778 = vmatpush1.bf16.msra.mxu1 %v2104_v14  ;;  %v134_v13 = vld [vmem:[%s3236_s1 + $0x3b8] sm:$0xff] }
  0xa3   :  { %1738 = vmatprep.subr.bf16.mxu0 %v2343_v15  ;;  %1779 = vmatprep.subr.bf16.mxu1 %v2345_v16  ;;  %v142_v14 = vld [vmem:[%s3236_s1 + $0x3f8] sm:$0xff]  ;;  %v2230_v15 = vcombine.low %v147_v2, %v155_v3  ;;  %v2232_v16 = vcombine.low %v148_v4, %v156_v5  ;;  %v21_v3 = vld [vmem:[%s3236_s1 + $0x30] sm:$0xff] }
  0xa4   :  { %v2221_v18 = vcombine.high %v134_v13, %v142_v14  ;;  %v29_v4 = vld [vmem:[%s3236_s1 + $0x70] sm:$0xff]  ;;  %v22_v5 = vld [vmem:[%s3236_s1 + $0x38] sm:$0xff] }
  0xa6   :  { %1739 = vmatpush2.bf16.msra.mxu0 %v2342_v20  ;;  %1780 = vmatpush2.bf16.msra.mxu1 %v2344_v21  ;;  %v118_v20 = vld [vmem:[%s3236_s1 + $0x338] sm:$0xff] }
  0xa7   :  { %1740 = vmatprep.subr.bf16.mxu0 %v2327_v22  ;;  %1781 = vmatprep.subr.bf16.mxu1 %v2329_v23  ;;  %v126_v21 = vld [vmem:[%s3236_s1 + $0x378] sm:$0xff]  ;;  %v2218_v22 = vcombine.low %v133_v10, %v141_v11  ;;  %v2220_v23 = vcombine.low %v134_v13, %v142_v14  ;;  %v261_v11 = vld [vmem:[%s3236_s1 + $0x7b0] sm:$0xff] }
  0xa8   :  { %v2205_v25 = vcombine.high %v118_v20, %v126_v21  ;;  %v269_v13 = vld [vmem:[%s3236_s1 + $0x7f0] sm:$0xff]  ;;  %v262_v14 = vld [vmem:[%s3236_s1 + $0x7b8] sm:$0xff] }
  0xaa   :  { %1741 = vmatpush2.bf16.msra.mxu0 %v2326_v28  ;;  %1782 = vmatpush2.bf16.msra.mxu1 %v2328_v29  ;;  %v102_v28 = vld [vmem:[%s3236_s1 + $0x2b8] sm:$0xff] }
  0xab   :  { %1742 = vmatprep.subr.bf16.mxu0 %v2311_v30  ;;  %1783 = vmatprep.subr.bf16.mxu1 %v2313_v31  ;;  %v110_v29 = vld [vmem:[%s3236_s1 + $0x2f8] sm:$0xff]  ;;  %v2202_v30 = vcombine.low %v117_v53, %v125_v19  ;;  %v2204_v31 = vcombine.low %v118_v20, %v126_v21  ;;  %v245_v19 = vld [vmem:[%s3236_s1 + $0x730] sm:$0xff] }
  0xac   :  { %v2189_v33 = vcombine.high %v102_v28, %v110_v29  ;;  %v253_v20 = vld [vmem:[%s3236_s1 + $0x770] sm:$0xff]  ;;  %v246_v21 = vld [vmem:[%s3236_s1 + $0x738] sm:$0xff] }
  0xae   :  { %1743 = vmatpush2.bf16.msra.mxu0 %v2310_v36  ;;  %1784 = vmatpush2.bf16.msra.mxu1 %v2312_v37  ;;  %v86_v36 = vld [vmem:[%s3236_s1 + $0x238] sm:$0xff] }
  0xaf   :  { %1744 = vmatprep.subr.bf16.mxu0 %v2295_v38  ;;  %1785 = vmatprep.subr.bf16.mxu1 %v2297_v39  ;;  %v94_v37 = vld [vmem:[%s3236_s1 + $0x278] sm:$0xff]  ;;  %v2186_v38 = vcombine.low %v101_v26, %v109_v27  ;;  %v2188_v39 = vcombine.low %v102_v28, %v110_v29  ;;  %v229_v27 = vld [vmem:[%s3236_s1 + $0x6b0] sm:$0xff] }
  0xb0   :  { %v2173_v41 = vcombine.high %v86_v36, %v94_v37  ;;  %v237_v28 = vld [vmem:[%s3236_s1 + $0x6f0] sm:$0xff]  ;;  %v230_v29 = vld [vmem:[%s3236_s1 + $0x6b8] sm:$0xff] }
  0xb2   :  { %1745 = vmatpush2.bf16.msra.mxu0 %v2294_v44  ;;  %1786 = vmatpush2.bf16.msra.mxu1 %v2296_v45  ;;  %v78_v44 = vld [vmem:[%s3236_s1 + $0x1f8] sm:$0xff]  ;;  %v2170_v45 = vcombine.low %v85_v34, %v93_v35  ;;  %v213_v35 = vld [vmem:[%s3236_s1 + $0x630] sm:$0xff] }
  0xb3   :  { %1746 = vmatprep.subr.bf16.mxu0 %v2279_v46  ;;  %1787 = vmatprep.subr.bf16.mxu1 %v2281_v47  ;;  %v2172_v46 = vcombine.low %v86_v36, %v94_v37  ;;  %v2155_v47 = vcombine.high %v69_v42, %v77_v43  ;;  %v221_v36 = vld [vmem:[%s3236_s1 + $0x670] sm:$0xff]  ;;  %v214_v37 = vld [vmem:[%s3236_s1 + $0x638] sm:$0xff] }
  0xb6   :  { %1747 = vmatpush2.bf16.msra.mxu0 %v2278_v52  ;;  %1788 = vmatpush2.bf16.msra.mxu1 %v2280_v54  ;;  %v62_v52 = vld [vmem:[%s3236_s1 + $0x178] sm:$0xff]  ;;  %v2154_v54 = vcombine.low %v69_v42, %v77_v43  ;;  %v197_v43 = vld [vmem:[%s3236_s1 + $0x5b0] sm:$0xff] }
  0xb7   :  { %1748 = vmatprep.subr.bf16.mxu0 %v2263_v55  ;;  %1789 = vmatprep.subr.bf16.mxu1 %v2265_v56  ;;  %v2139_v56 = vcombine.high %v53_v49, %v61_v50  ;;  %v2141_v58 = vcombine.high %v54_v51, %v62_v52 }
  0xba   :  { %1749 = vmatpush2.bf16.msra.mxu0 %v2262_v62  ;;  %1790 = vmatpush2.bf16.msra.mxu1 %v2264_v63  ;;  %v46_v62 = vld [vmem:[%s3236_s1 + $0xf8] sm:$0xff]  ;;  %v2138_v63 = vcombine.low %v53_v49, %v61_v50  ;;  %v181_v50 = vld [vmem:[%s3236_s1 + $0x530] sm:$0xff] }
  0xbb   :  { %1750 = vmatprep.subr.bf16.mxu0 %v2247_v0  ;;  %1791 = vmatprep.subr.bf16.mxu1 %v2249_v1  ;;  %v2140_v0 = vcombine.low %v54_v51, %v62_v52  ;;  %v2123_v1 = vcombine.high %v37_v59, %v45_v60  ;;  %v2125_v2 = vcombine.high %v38_v61, %v46_v62  ;;  %v189_v51 = vld [vmem:[%s3236_s1 + $0x570] sm:$0xff]  ;;  %v182_v52 = vld [vmem:[%s3236_s1 + $0x538] sm:$0xff] }
  0xbe   :  { %1751 = vmatpush2.bf16.msra.mxu0 %v2246_v6  ;;  %1792 = vmatpush2.bf16.msra.mxu1 %v2248_v7  ;;  %v30_v6 = vld [vmem:[%s3236_s1 + $0x78] sm:$0xff]  ;;  %v2122_v7 = vcombine.low %v37_v59, %v45_v60  ;;  %v165_v60 = vld [vmem:[%s3236_s1 + $0x4b0] sm:$0xff] }
  0xbf   :  { %1752 = vmatprep.subr.bf16.mxu0 %v2231_v8  ;;  %1793 = vmatprep.subr.bf16.mxu1 %v2233_v9  ;;  %v2124_v8 = vcombine.low %v38_v61, %v46_v62  ;;  %v2107_v9 = vcombine.high %v21_v3, %v29_v4  ;;  %v2109_v10 = vcombine.high %v22_v5, %v30_v6  ;;  %v173_v61 = vld [vmem:[%s3236_s1 + $0x4f0] sm:$0xff]  ;;  %v166_v62 = vld [vmem:[%s3236_s1 + $0x4b8] sm:$0xff] }
  0xc2   :  { %1753 = vmatpush2.bf16.msra.mxu0 %v2230_v15  ;;  %1794 = vmatpush2.bf16.msra.mxu1 %v2232_v16  ;;  %v270_v15 = vld [vmem:[%s3236_s1 + $0x7f8] sm:$0xff]  ;;  %v2106_v16 = vcombine.low %v21_v3, %v29_v4  ;;  %v149_v4 = vld [vmem:[%s3236_s1 + $0x430] sm:$0xff] }
  0xc3   :  { %1804 = vmatprep.subr.bf16.mxu0 %v2219_v17  ;;  %1845 = vmatprep.subr.bf16.mxu1 %v2221_v18  ;;  %v2108_v17 = vcombine.low %v22_v5, %v30_v6  ;;  %v2347_v18 = vcombine.high %v261_v11, %v269_v13  ;;  %v2349_v53 = vcombine.high %v262_v14, %v270_v15  ;;  %v157_v5 = vld [vmem:[%s3236_s1 + $0x470] sm:$0xff]  ;;  %v150_v6 = vld [vmem:[%s3236_s1 + $0x438] sm:$0xff] }
  0xc5   :  { %1755 = vmatmul.mubr.bf16.vlgmr.msra.gmra.mxu0 %v2620_v12  ;;  %1796 = vmatmul.mubr.bf16.vlgmr.msra.gmra.mxu1 %v2620_v12 }
  0xc6   :  { %1805 = vmatpush1.bf16.msra.mxu0 %v2218_v22  ;;  %1846 = vmatpush1.bf16.msra.mxu1 %v2220_v23  ;;  %v254_v22 = vld [vmem:[%s3236_s1 + $0x778] sm:$0xff]  ;;  %v2346_v23 = vcombine.low %v261_v11, %v269_v13  ;;  %v2234_v13 = vcombine.low %v149_v4, %v157_v5 }
  0xc7   :  { %1806 = vmatprep.subr.bf16.mxu0 %v2203_v24  ;;  %1847 = vmatprep.subr.bf16.mxu1 %v2205_v25  ;;  %v2348_v24 = vcombine.low %v262_v14, %v270_v15  ;;  %v2331_v25 = vcombine.high %v245_v19, %v253_v20  ;;  %v2333_v26 = vcombine.high %v246_v21, %v254_v22 }
  0xc8   :  { %1836 = vmatprep.mubr.bf16.mxu0 %v2494_v57  ;;  %1877 = vmatprep.mubr.bf16.mxu1 %v2494_v57  ;;  %v70_v57 = vld [vmem:[%s3236_s1 + $0x1b8] sm:$0xff] }
  0xc9   :  { %v2157_v48 = vcombine.high %v70_v57, %v78_v44  ;;  %v2156_v55 = vcombine.low %v70_v57, %v78_v44  ;;  %v205_v57 = vld [vmem:[%s3236_s1 + $0x5f0] sm:$0xff]  ;;  %v198_v44 = vld [vmem:[%s3236_s1 + $0x5b8] sm:$0xff] }
  0xca   :  { %1807 = vmatpush1.bf16.msra.mxu0 %v2202_v30  ;;  %1848 = vmatpush1.bf16.msra.mxu1 %v2204_v31  ;;  %v238_v30 = vld [vmem:[%s3236_s1 + $0x6f8] sm:$0xff]  ;;  %v2330_v31 = vcombine.low %v245_v19, %v253_v20 }
  0xcb   :  { %1808 = vmatprep.subr.bf16.mxu0 %v2187_v32  ;;  %1849 = vmatprep.subr.bf16.mxu1 %v2189_v33  ;;  %v2332_v32 = vcombine.low %v246_v21, %v254_v22  ;;  %v2315_v33 = vcombine.high %v229_v27, %v237_v28  ;;  %v2317_v34 = vcombine.high %v230_v29, %v238_v30 }
  0xce   :  { %1809 = vmatpush1.bf16.msra.mxu0 %v2186_v38  ;;  %1850 = vmatpush1.bf16.msra.mxu1 %v2188_v39  ;;  %v222_v38 = vld [vmem:[%s3236_s1 + $0x678] sm:$0xff]  ;;  %v2314_v39 = vcombine.low %v229_v27, %v237_v28 }
  0xcf   :  { %1810 = vmatprep.subr.bf16.mxu0 %v2171_v40  ;;  %1851 = vmatprep.subr.bf16.mxu1 %v2173_v41  ;;  %v2316_v40 = vcombine.low %v230_v29, %v238_v30  ;;  %v2299_v41 = vcombine.high %v213_v35, %v221_v36  ;;  %v2301_v42 = vcombine.high %v214_v37, %v222_v38 }
  0xd2   :  { %1811 = vmatpush1.bf16.msra.mxu0 %v2170_v45  ;;  %1852 = vmatpush1.bf16.msra.mxu1 %v2172_v46  ;;  %v206_v45 = vld [vmem:[%s3236_s1 + $0x5f8] sm:$0xff]  ;;  %v2298_v46 = vcombine.low %v213_v35, %v221_v36 }
  0xd3   :  { %1812 = vmatprep.subr.bf16.mxu0 %v2155_v47  ;;  %1853 = vmatprep.subr.bf16.mxu1 %v2157_v48  ;;  %v2300_v47 = vcombine.low %v214_v37, %v222_v38  ;;  %v2283_v48 = vcombine.high %v197_v43, %v205_v57  ;;  %v2285_v49 = vcombine.high %v198_v44, %v206_v45 }
  0xd6   :  { %1813 = vmatpush1.bf16.msra.mxu0 %v2154_v54  ;;  %1854 = vmatpush1.bf16.msra.mxu1 %v2156_v55  ;;  %v190_v54 = vld [vmem:[%s3236_s1 + $0x578] sm:$0xff]  ;;  %v2282_v55 = vcombine.low %v197_v43, %v205_v57 }
  0xd7   :  { %1814 = vmatprep.subr.bf16.mxu0 %v2139_v56  ;;  %1855 = vmatprep.subr.bf16.mxu1 %v2141_v58  ;;  %v2284_v56 = vcombine.low %v198_v44, %v206_v45  ;;  %v2267_v58 = vcombine.high %v181_v50, %v189_v51  ;;  %v2269_v59 = vcombine.high %v182_v52, %v190_v54 }
  0xda   :  { %1815 = vmatpush1.bf16.msra.mxu0 %v2138_v63  ;;  %1856 = vmatpush1.bf16.msra.mxu1 %v2140_v0  ;;  %v174_v63 = vld [vmem:[%s3236_s1 + $0x4f8] sm:$0xff]  ;;  %v2266_v0 = vcombine.low %v181_v50, %v189_v51 }
  0xdb   :  { %1816 = vmatprep.subr.bf16.mxu0 %v2123_v1  ;;  %1857 = vmatprep.subr.bf16.mxu1 %v2125_v2  ;;  %v2268_v1 = vcombine.low %v182_v52, %v190_v54  ;;  %v2251_v2 = vcombine.high %v165_v60, %v173_v61  ;;  %v2253_v3 = vcombine.high %v166_v62, %v174_v63 }
  0xde   :  { %1817 = vmatpush1.bf16.msra.mxu0 %v2122_v7  ;;  %1858 = vmatpush1.bf16.msra.mxu1 %v2124_v8  ;;  %v158_v7 = vld [vmem:[%s3236_s1 + $0x478] sm:$0xff]  ;;  %v2250_v8 = vcombine.low %v165_v60, %v173_v61 }
  0xdf   :  { %1818 = vmatprep.subr.bf16.mxu0 %v2107_v9  ;;  %1859 = vmatprep.subr.bf16.mxu1 %v2109_v10  ;;  %v2252_v9 = vcombine.low %v166_v62, %v174_v63  ;;  %v2235_v10 = vcombine.high %v149_v4, %v157_v5  ;;  %v2237_v11 = vcombine.high %v150_v6, %v158_v7 }
  0xe0   :  { %v2236_v14 = vcombine.low %v150_v6, %v158_v7 }
  0xe2   :  { %1819 = vmatpush1.bf16.msra.mxu0 %v2106_v16  ;;  %1860 = vmatpush1.bf16.msra.mxu1 %v2108_v17 }
  0xe3   :  { %1820 = vmatprep.subr.bf16.mxu0 %v2347_v18  ;;  %1861 = vmatprep.subr.bf16.mxu1 %v2349_v53 }
  0xe6   :  { %1821 = vmatpush2.bf16.msra.mxu0 %v2346_v23  ;;  %1862 = vmatpush2.bf16.msra.mxu1 %v2348_v24 }
  0xe7   :  { %1822 = vmatprep.subr.bf16.mxu0 %v2331_v25  ;;  %1863 = vmatprep.subr.bf16.mxu1 %v2333_v26 }
  0xea   :  { %1823 = vmatpush2.bf16.msra.mxu0 %v2330_v31  ;;  %1864 = vmatpush2.bf16.msra.mxu1 %v2332_v32 }
  0xeb   :  { %1824 = vmatprep.subr.bf16.mxu0 %v2315_v33  ;;  %1865 = vmatprep.subr.bf16.mxu1 %v2317_v34 }
  0xee   :  { %1825 = vmatpush2.bf16.msra.mxu0 %v2314_v39  ;;  %1866 = vmatpush2.bf16.msra.mxu1 %v2316_v40 }
  0xef   :  { %1826 = vmatprep.subr.bf16.mxu0 %v2299_v41  ;;  %1867 = vmatprep.subr.bf16.mxu1 %v2301_v42 }
  0xf2   :  { %1827 = vmatpush2.bf16.msra.mxu0 %v2298_v46  ;;  %1868 = vmatpush2.bf16.msra.mxu1 %v2300_v47 }
  0xf3   :  { %1828 = vmatprep.subr.bf16.mxu0 %v2283_v48  ;;  %1869 = vmatprep.subr.bf16.mxu1 %v2285_v49 }
  0xf6   :  { %1829 = vmatpush2.bf16.msra.mxu0 %v2282_v55  ;;  %1870 = vmatpush2.bf16.msra.mxu1 %v2284_v56 }
  0xf7   :  { %1830 = vmatprep.subr.bf16.mxu0 %v2267_v58  ;;  %1871 = vmatprep.subr.bf16.mxu1 %v2269_v59 }
  0xfa   :  { %1831 = vmatpush2.bf16.msra.mxu0 %v2266_v0  ;;  %1872 = vmatpush2.bf16.msra.mxu1 %v2268_v1 }
  0xfb   :  { %1832 = vmatprep.subr.bf16.mxu0 %v2251_v2  ;;  %1873 = vmatprep.subr.bf16.mxu1 %v2253_v3 }
  0xfe   :  { %1833 = vmatpush2.bf16.msra.mxu0 %v2250_v8  ;;  %1874 = vmatpush2.bf16.msra.mxu1 %v2252_v9 }
  0xff   :  { %1834 = vmatprep.subr.bf16.mxu0 %v2235_v10  ;;  %1875 = vmatprep.subr.bf16.mxu1 %v2237_v11 }
 0x102   :  { %1835 = vmatpush2.bf16.msra.mxu0 %v2234_v13  ;;  %1876 = vmatpush2.bf16.msra.mxu1 %v2236_v14 }
 0x105   :  { %v1592_v15 = vpop.f32.mrf.mxu0  ;;  %1837 = vmatmul.mubr.bf16.vlgmr.msra.gmra.mxu0 %v2620_v12  ;;  %v1633_v16 = vpop.f32.mrf.mxu1  ;;  %1878 = vmatmul.mubr.bf16.vlgmr.msra.gmra.mxu1 %v2620_v12 }
 0x107   :  { %v1594_v17 = vpop.f32.mrf.mxu0  ;;  %v1635_v18 = vpop.f32.mrf.mxu1 }
 0x108   :  { %v1886_v37 = vadd.f32 %v1594_v17, %v1592_v15 }
 0x109   :  { %v1596_v53 = vpop.f32.mrf.mxu0  ;;  %v1637_v19 = vpop.f32.mrf.mxu1 }
 0x10a   :  { %v1887_v38 = vadd.f32 %v1886_v37, %v1633_v16 }
 0x10b   :  { %v1597_v20 = vpop.f32.mrf.mxu0  ;;  %v1638_v21 = vpop.f32.mrf.mxu1 }
 0x10c   :  { %v1888_v39 = vadd.f32 %v1887_v38, %v1635_v18 }
 0x145   :  { %v1674_v22 = vpop.f32.mrf.mxu0  ;;  %v1715_v23 = vpop.f32.mrf.mxu1 }
 0x146   :  { %v1889_v40 = vadd.f32 %v1888_v39, %v1674_v22 }
 0x147   :  { %v1676_v24 = vpop.f32.mrf.mxu0  ;;  %v1717_v25 = vpop.f32.mrf.mxu1 }
 0x148   :  { %v1890_v41 = vadd.f32 %v1889_v40, %v1676_v24 }
 0x149   :  { %v1678_v26 = vpop.f32.mrf.mxu0  ;;  %v1719_v27 = vpop.f32.mrf.mxu1 }
 0x14a   :  { %v1891_v42 = vadd.f32 %v1890_v41, %v1715_v23 }
 0x14b   :  { %v1679_v28 = vpop.f32.mrf.mxu0  ;;  %v1720_v29 = vpop.f32.mrf.mxu1 }
 0x14c   :  { %v1892_v43 = vadd.f32 %v1891_v42, %v1717_v25 }
 0x185   :  { %v1756_v30 = vpop.f32.mrf.mxu0  ;;  %v1797_v31 = vpop.f32.mrf.mxu1 }
 0x186   :  { %v1893_v57 = vadd.f32 %v1892_v43, %v1756_v30 }
 0x187   :  { %v1758_v32 = vpop.f32.mrf.mxu0  ;;  %v1799_v33 = vpop.f32.mrf.mxu1 }
 0x188   :  { %v1894_v44 = vadd.f32 %v1893_v57, %v1758_v32 }
 0x189   :  { %v1760_v34 = vpop.f32.mrf.mxu0  ;;  %v1801_v12 = vpop.f32.mrf.mxu1 }
 0x18a   :  { %v1895_v45 = vadd.f32 %v1894_v44, %v1797_v31 }
 0x18b   :  { %v1761_v35 = vpop.f32.mrf.mxu0  ;;  %v1802_v36 = vpop.f32.mrf.mxu1 }
 0x18c   :  { %v1896_v46 = vadd.f32 %v1895_v45, %v1799_v33  ;;  %v2376_v45 = vmov 1  }
 0x18d   :  { %2370 = vset.pattern.permute.xlu0 %v2376_v45 }
 0x1c5   :  { %v1838_v47 = vpop.f32.mrf.mxu0  ;;  %v1879_v49 = vpop.f32.mrf.mxu1 }
 0x1c6   :  { %v1897_v48 = vadd.f32 %v1896_v46, %v1838_v47 }
 0x1c7   :  { %v1840_v50 = vpop.f32.mrf.mxu0  ;;  %v1881_v52 = vpop.f32.mrf.mxu1 }
 0x1c8   :  { %v1898_v51 = vadd.f32 %v1897_v48, %v1840_v50 }
 0x1c9   :  { %v1842_v54 = vpop.f32.mrf.mxu0  ;;  %v1883_v55 = vpop.f32.mrf.mxu1 }
 0x1ca   :  { %v1899_v56 = vadd.f32 %v1898_v51, %v1879_v49 }
 0x1cb   :  { %v1843_v58 = vpop.f32.mrf.mxu0  ;;  %v1884_v59 = vpop.f32.mrf.mxu1 }
 0x1cc   :  { %v1900_v60 = vadd.f32 %v1899_v56, %v1881_v52 }
 0x1ce   :  { %1901 = vadd.xlane.f32.xlu0 %v1900_v60 }
 0x257   :  { %v1902_v61 = vpop.xlane.xlu0 %1901 }
 0x258   :  { %v1903_v62 = vmul.f32 0.00048828125, %v1902_v61 }
 0x25a   :  { %v3194_v63 = vsub.f32 %v1592_v15, %v1903_v62  ;;  %v3196_v0 = vsub.f32 %v1594_v17, %v1903_v62  ;;  %v3198_v1 = vsub.f32 %v1633_v16, %v1903_v62  ;;  %v1907_v4 = vsub.f32 %v1635_v18, %v1903_v62 }
 0x25b   :  { %v1908_v5 = vsub.f32 %v1674_v22, %v1903_v62  ;;  %v1909_v8 = vsub.f32 %v1676_v24, %v1903_v62  ;;  %v1910_v11 = vsub.f32 %v1715_v23, %v1903_v62  ;;  %v1911_v15 = vsub.f32 %v1717_v25, %v1903_v62 }
 0x25c   :  { %v1920_v2 = vmul.f32 %v3194_v63, %v3194_v63  ;;  %v1921_v3 = vmul.f32 %v3196_v0, %v3196_v0  ;;  %v1922_v6 = vmul.f32 %v3198_v1, %v3198_v1  ;;  %v1923_v9 = vmul.f32 %v1907_v4, %v1907_v4 }
 0x25d   :  { %v1924_v13 = vmul.f32 %v1908_v5, %v1908_v5  ;;  %v1925_v16 = vmul.f32 %v1909_v8, %v1909_v8  ;;  %v1912_v53 = vsub.f32 %v1756_v30, %v1903_v62  ;;  %v1926_v19 = vmul.f32 %v1910_v11, %v1910_v11 }
 0x25e   :  { %v1936_v7 = vadd.f32 %v1921_v3, %v1920_v2  ;;  %v1913_v21 = vsub.f32 %v1758_v32, %v1903_v62  ;;  %v1927_v26 = vmul.f32 %v1911_v15, %v1911_v15  ;;  %v1914_v22 = vsub.f32 %v1797_v31, %v1903_v62 }
 0x25f   :  { %v1928_v27 = vmul.f32 %v1912_v53, %v1912_v53  ;;  %v1915_v29 = vsub.f32 %v1799_v33, %v1903_v62  ;;  %v1916_v12 = vsub.f32 %v1838_v47, %v1903_v62  ;;  %v1917_v36 = vsub.f32 %v1840_v50, %v1903_v62 }
 0x260   :  { %v1937_v10 = vadd.f32 %v1936_v7, %v1922_v6  ;;  %v1929_v34 = vmul.f32 %v1913_v21, %v1913_v21  ;;  %v1930_v35 = vmul.f32 %v1914_v22, %v1914_v22  ;;  %v1918_v38 = vsub.f32 %v1879_v49, %v1903_v62  ;;  %v1956_v49 = vld [vmem:[%s3238_s2] sm:$0xff] }
 0x261   :  { %v1931_v37 = vmul.f32 %v1915_v29, %v1915_v29  ;;  %v1932_v39 = vmul.f32 %v1916_v12, %v1916_v12  ;;  %v1919_v40 = vsub.f32 %v1881_v52, %v1903_v62  ;;  %v1933_v41 = vmul.f32 %v1917_v36, %v1917_v36 }
 0x262   :  { %v1938_v14 = vadd.f32 %v1937_v10, %v1923_v9  ;;  %v1934_v42 = vmul.f32 %v1918_v38, %v1918_v38  ;;  %v2375_v33 = vmov 0  }
 0x263   :  { %v1935_v31 = vmul.f32 %v1919_v40, %v1919_v40  ;;  %2368 = vset.pattern.permute.xlu1 %v2375_v33 }
 0x264   :  { %v1939_v17 = vadd.f32 %v1938_v14, %v1924_v13 }
 0x266   :  { %v1940_v20 = vadd.f32 %v1939_v17, %v1925_v16 }
 0x268   :  { %v1941_v18 = vadd.f32 %v1940_v20, %v1926_v19 }
 0x26a   :  { %v1942_v28 = vadd.f32 %v1941_v18, %v1927_v26 }
 0x26c   :  { %v1943_v24 = vadd.f32 %v1942_v28, %v1928_v27 }
 0x26e   :  { %v1944_v23 = vadd.f32 %v1943_v24, %v1929_v34 }
 0x270   :  { %v1945_v25 = vadd.f32 %v1944_v23, %v1930_v35 }
 0x272   :  { %v1946_v30 = vadd.f32 %v1945_v25, %v1931_v37 }
 0x274   :  { %v1947_v32 = vadd.f32 %v1946_v30, %v1932_v39 }
 0x276   :  { %v1948_v43 = vadd.f32 %v1947_v32, %v1933_v41 }
 0x278   :  { %v1949_v57 = vadd.f32 %v1948_v43, %v1934_v42 }
 0x27a   :  { %v1950_v44 = vadd.f32 %v1949_v57, %v1935_v31 }
 0x27c   :  { %1951 = vadd.xlane.f32.xlu0 %v1950_v44 }
 0x305   :  { %v1952_v46 = vpop.xlane.xlu0 %1951 }
 0x306   :  { %v1953_v47 = vmul.f32 0.00048828125, %v1952_v46 }
 0x308   :  { %v1954_v48 = vadd.f32 1e-05, %v1953_v47 }
 0x30a   :  { %2373 = vrsqrt.f32 %v1954_v48 }
 0x317   :  { %v2374_v50 = vpop.eup %2373 }
 0x318   :  { %v1957_v51 = vmul.f32 %v2374_v50, %v1956_v49 }
 0x31a   :  { %1960 = vperm.xlu1 %2368, %v1957_v51  }
 0x31e   :  { %2369 = vset.pattern.permute.xlu1 %v2376_v45 }
 0x31f   :  { %1981 = vperm.xlu1 %2369, %v1956_v49  }
 0x395   :  { %v1961_v52 = vpop.permute.xlu1 %1960 }
 0x396   :  { %v1963_v54 = vmul.f32 %v1961_v52, %v3194_v63  ;;  %v1964_v55 = vmul.f32 %v1961_v52, %v3196_v0  ;;  %v1965_v56 = vmul.f32 %v1961_v52, %v3198_v1  ;;  %v1966_v58 = vmul.f32 %v1961_v52, %v1907_v4 }
 0x397   :  { %v1967_v59 = vmul.f32 %v1961_v52, %v1908_v5  ;;  %v1968_v60 = vmul.f32 %v1961_v52, %v1909_v8  ;;  %v1969_v61 = vmul.f32 %v1961_v52, %v1910_v11  ;;  %v1970_v62 = vmul.f32 %v1961_v52, %v1911_v15 }
 0x398   :  { %v1971_v2 = vmul.f32 %v1961_v52, %v1912_v53  ;;  %v1972_v3 = vmul.f32 %v1961_v52, %v1913_v21  ;;  %v1973_v6 = vmul.f32 %v1961_v52, %v1914_v22  ;;  %v1974_v7 = vmul.f32 %v1961_v52, %v1915_v29 }
 0x399   :  { %v1975_v9 = vmul.f32 %v1961_v52, %v1916_v12  ;;  %v1976_v10 = vmul.f32 %v1961_v52, %v1917_v36  ;;  %v1977_v13 = vmul.f32 %v1961_v52, %v1918_v38  ;;  %v1978_v14 = vmul.f32 %v1961_v52, %v1919_v40 }
 0x39a   :  { %v1982_v16 = vpop.permute.xlu1 %1981 }
 0x39b   :  { %v1984_v17 = vadd.f32 %v1982_v16, %v1963_v54  ;;  %v1985_v63 = vadd.f32 %v1982_v16, %v1964_v55  ;;  %v1986_v19 = vadd.f32 %v1982_v16, %v1965_v56  ;;  %v1987_v0 = vadd.f32 %v1982_v16, %v1966_v58 }
 0x39c   :  { %v1988_v20 = vadd.f32 %v1982_v16, %v1967_v59  ;;  %v1989_v1 = vadd.f32 %v1982_v16, %v1968_v60  ;;  %v1990_v4 = vadd.f32 %v1982_v16, %v1969_v61  ;;  %v1991_v5 = vadd.f32 %v1982_v16, %v1970_v62 }
 0x39d   :  { %v1992_v8 = vadd.f32 %v1982_v16, %v1971_v2  ;;  %v1993_v11 = vadd.f32 %v1982_v16, %v1972_v3  ;;  %v1994_v15 = vadd.f32 %v1982_v16, %v1973_v6  ;;  %v1995_v53 = vadd.f32 %v1982_v16, %v1974_v7 }
 0x39e   :  { %v1996_v21 = vadd.f32 %v1982_v16, %v1975_v9  ;;  %v1997_v26 = vadd.f32 %v1982_v16, %v1976_v10  ;;  %v1998_v18 = vadd.f32 %v1982_v16, %v1977_v13  ;;  %v1999_v22 = vadd.f32 %v1982_v16, %v1978_v14 }
 0x39f   :  { %v2000_v27 = vmax.f32 %v1984_v17, 0.0  ;;  %v2001_v28 = vmax.f32 %v1985_v63, 0.0  ;;  %v2002_v29 = vmax.f32 %v1986_v19, 0.0  ;;  %v2003_v34 = vmax.f32 %v1987_v0, 0.0 }
 0x3a0   :  { %v2004_v24 = vmax.f32 %v1988_v20, 0.0  ;;  %v2005_v12 = vmax.f32 %v1989_v1, 0.0  ;;  %v2006_v35 = vmax.f32 %v1990_v4, 0.0  ;;  %v2007_v23 = vmax.f32 %v1991_v5, 0.0 }
 0x3a1   :  { %v2008_v36 = vmax.f32 %v1992_v8, 0.0  ;;  %v2009_v37 = vmax.f32 %v1993_v11, 0.0  ;;  %v2010_v25 = vmax.f32 %v1994_v15, 0.0  ;;  %v2011_v38 = vmax.f32 %v1995_v53, 0.0 }
 0x3a2   :  { %v2012_v39 = vmax.f32 %v1996_v21, 0.0  ;;  %v2013_v30 = vmax.f32 %v1997_v26, 0.0  ;;  %v2014_v40 = vmax.f32 %v1998_v18, 0.0  ;;  %v2015_v41 = vmax.f32 %v1999_v22, 0.0 }
 0x3a3   :  { %v2358_v32 = vpack.c.bf16 %v2001_v28, %v2000_v27  ;;  %v2359_v42 = vpack.c.bf16 %v2003_v34, %v2002_v29  ;;  %v2360_v43 = vpack.c.bf16 %v2005_v12, %v2004_v24  ;;  %v2361_v31 = vpack.c.bf16 %v2007_v23, %v2006_v35 }
 0x3a4   :  { %v2362_v57 = vpack.c.bf16 %v2009_v37, %v2008_v36  ;;  %v2363_v44 = vpack.c.bf16 %v2011_v38, %v2010_v25  ;;  %v2364_v33 = vpack.c.bf16 %v2013_v30, %v2012_v39  ;;  %v2365_v45 = vpack.c.bf16 %v2015_v41, %v2014_v40 }
 0x3a5   :  { %2080 = vst [vmem:[%s3239_s3] sm:$0xff] %v2358_v32  ;;  %2081 = vst [vmem:[%s3239_s3 + $0x8] sm:$0xff] %v2359_v42 }
 0x3a6   :  { %2082 = vst [vmem:[%s3239_s3 + $0x10] sm:$0xff] %v2360_v43  ;;  %2083 = vst [vmem:[%s3239_s3 + $0x18] sm:$0xff] %v2361_v31 }
 0x3a7   :  { %2084 = vst [vmem:[%s3239_s3 + $0x20] sm:$0xff] %v2362_v57  ;;  %2085 = vst [vmem:[%s3239_s3 + $0x28] sm:$0xff] %v2363_v44 }
 0x3a8   :  { %2086 = vst [vmem:[%s3239_s3 + $0x30] sm:$0xff] %v2364_v33  ;;  %2087 = vst [vmem:[%s3239_s3 + $0x38] sm:$0xff] %v2365_v45 }

// kernel: generator_forward.9
= control target key start
LH: loop header
LB: loop body
LE: loop exit
PB: predicated region body
PF: predicated region fallthrough
CT: control target
= control target key end

     0   :  { %s3444_s9 = smov 0   ;;  %s3446_s10 = smov 0   ;;  %s4336_s0 = inlined_call_operand.vmem [shape: bf16[3,128], index: 0, kind: input, shape index: {}]   ;;  %s4337_s1 = inlined_call_operand.vmem [shape: bf16[128,8192], index: 1, kind: input, shape index: {}]   ;;  %s4338_s2 = inlined_call_operand.vmem [shape: f32[3,8192], index: 2, kind: output, shape index: {}]  }
   0x1   :  { %s3448_s11 = smov 0  }
   0x2 LB: > { %s3044_s12 = sadd.s32 4294967295, %s3426_s11   ;;  %s3461_s13 = sadd.s32 1, %s3426_s11   ;;  %s3426_s11 = sphi %s3448_s11, %s4341_s11   ;;  %s3422_s10 = sphi %s3446_s10, %s4340_s10   ;;  %s3418_s9 = sphi %s3444_s9, %s4339_s9  }
   0x3   : > { %s37_s14 = ssub.s32 %s3426_s11, %s3461_s13  ;;  %s40_s15 = sadd.s32 1, %s3422_s10 }
   0x4   : > { %p38_p0 = scmp.eq.s32.totalorder %s37_s14, 0  ;;  %p47_p1 = scmp.ne.s32.totalorder %s3422_s10, %s3418_s9 }
   0x5   : > { %p48_p2 = scmp.eq.s32.totalorder %s3426_s11, 0  ;;  %p3047_p4 = scmp.ge.s32.totalorder %s3426_s11, 2 }
   0x6   : > { %s3470_s16 = scalar_select %p38_p0, %s3422_s10, %s40_s15  }
   0x7   : > { %p49_p3 = por %p48_p2, %p47_p1  ;;  %102 = sbr.rel (%p3047_p4) target bundleno = 144 (0x90), region = 20 }
   0xc   : > { %105 = sbr.rel (!%p49_p3) target bundleno = 144 (0x90), region = 24  ;;  %s107_s17 = sand.u32 (%p49_p3), 1, %s3422_s10  }
   0xd   : > { %s3313_s18 = sshll.u32 (%p49_p3), %s3426_s11, 7  ;;  %s3048_s19 = sshll.u32 (%p49_p3), %s107_s17, 11 }
   0xe   : > { %s3478_s22 = scalar_lea.vmem (%p49_p3), %s4337_s1, %s3313_s18  ;;  %s3483_s23 = scalar_lea.vmem (%p49_p3), [#allocation2], %s3048_s19 }
   0xf   : > { %v125_v0 = vld [vmem:[%s3478_s22] sm:$0xff] (%p49_p3)  ;;  %v127_v1 = vld [vmem:[%s3478_s22 + $0x8] sm:$0xff] (%p49_p3)  ;;  %v129_v2 = vld [vmem:[%s3478_s22 + $0x10] sm:$0xff] (%p49_p3) }
  0x10   : > { %126 = vst [vmem:[%s3483_s23] sm:$0xff] (%p49_p3), %v125_v0  ;;  %128 = vst [vmem:[%s3483_s23 + $0x8] sm:$0xff] (%p49_p3), %v127_v1  ;;  %v131_v3 = vld [vmem:[%s3478_s22 + $0x18] sm:$0xff] (%p49_p3)  ;;  %v133_v4 = vld [vmem:[%s3478_s22 + $0x20] sm:$0xff] (%p49_p3) }
  0x11   : > { %130 = vst [vmem:[%s3483_s23 + $0x10] sm:$0xff] %v129_v2  ;;  %v135_v5 = vld [vmem:[%s3478_s22 + $0x28] sm:$0xff]  ;;  %132 = vst [vmem:[%s3483_s23 + $0x18] sm:$0xff] %v131_v3  ;;  %v137_v6 = vld [vmem:[%s3478_s22 + $0x30] sm:$0xff] }
  0x12   : > { %134 = vst [vmem:[%s3483_s23 + $0x20] sm:$0xff] %v133_v4  ;;  %136 = vst [vmem:[%s3483_s23 + $0x28] sm:$0xff] %v135_v5  ;;  %v139_v7 = vld [vmem:[%s3478_s22 + $0x38] sm:$0xff]  ;;  %v141_v8 = vld [vmem:[%s3478_s22 + $0x40] sm:$0xff] }
  0x13   : > { %138 = vst [vmem:[%s3483_s23 + $0x30] sm:$0xff] %v137_v6  ;;  %140 = vst [vmem:[%s3483_s23 + $0x38] sm:$0xff] %v139_v7  ;;  %v143_v9 = vld [vmem:[%s3478_s22 + $0x48] sm:$0xff]  ;;  %v145_v10 = vld [vmem:[%s3478_s22 + $0x50] sm:$0xff] }
  0x14   : > { %142 = vst [vmem:[%s3483_s23 + $0x40] sm:$0xff] %v141_v8  ;;  %v147_v11 = vld [vmem:[%s3478_s22 + $0x58] sm:$0xff]  ;;  %144 = vst [vmem:[%s3483_s23 + $0x48] sm:$0xff] %v143_v9  ;;  %v149_v12 = vld [vmem:[%s3478_s22 + $0x60] sm:$0xff] }
  0x15   : > { %146 = vst [vmem:[%s3483_s23 + $0x50] sm:$0xff] %v145_v10  ;;  %148 = vst [vmem:[%s3483_s23 + $0x58] sm:$0xff] %v147_v11  ;;  %v151_v13 = vld [vmem:[%s3478_s22 + $0x68] sm:$0xff]  ;;  %v153_v14 = vld [vmem:[%s3478_s22 + $0x70] sm:$0xff] }
  0x16   : > { %150 = vst [vmem:[%s3483_s23 + $0x60] sm:$0xff] %v149_v12  ;;  %152 = vst [vmem:[%s3483_s23 + $0x68] sm:$0xff] %v151_v13  ;;  %v155_v15 = vld [vmem:[%s3478_s22 + $0x78] sm:$0xff]  ;;  %v157_v16 = vld [vmem:[%s3478_s22 + $0x100] sm:$0xff] }
  0x17   : > { %154 = vst [vmem:[%s3483_s23 + $0x70] sm:$0xff] %v153_v14  ;;  %v159_v17 = vld [vmem:[%s3478_s22 + $0x108] sm:$0xff]  ;;  %156 = vst [vmem:[%s3483_s23 + $0x78] sm:$0xff] %v155_v15  ;;  %v161_v18 = vld [vmem:[%s3478_s22 + $0x110] sm:$0xff] }
  0x18   : > { %158 = vst [vmem:[%s3483_s23 + $0x80] sm:$0xff] %v157_v16  ;;  %160 = vst [vmem:[%s3483_s23 + $0x88] sm:$0xff] %v159_v17  ;;  %v163_v19 = vld [vmem:[%s3478_s22 + $0x118] sm:$0xff]  ;;  %v165_v20 = vld [vmem:[%s3478_s22 + $0x120] sm:$0xff] }
  0x19   : > { %162 = vst [vmem:[%s3483_s23 + $0x90] sm:$0xff] %v161_v18  ;;  %164 = vst [vmem:[%s3483_s23 + $0x98] sm:$0xff] %v163_v19  ;;  %v167_v21 = vld [vmem:[%s3478_s22 + $0x128] sm:$0xff]  ;;  %v169_v22 = vld [vmem:[%s3478_s22 + $0x130] sm:$0xff] }
  0x1a   : > { %166 = vst [vmem:[%s3483_s23 + $0xa0] sm:$0xff] %v165_v20  ;;  %v171_v23 = vld [vmem:[%s3478_s22 + $0x138] sm:$0xff]  ;;  %168 = vst [vmem:[%s3483_s23 + $0xa8] sm:$0xff] %v167_v21  ;;  %v173_v24 = vld [vmem:[%s3478_s22 + $0x140] sm:$0xff] }
  0x1b   : > { %170 = vst [vmem:[%s3483_s23 + $0xb0] sm:$0xff] %v169_v22  ;;  %172 = vst [vmem:[%s3483_s23 + $0xb8] sm:$0xff] %v171_v23  ;;  %v175_v25 = vld [vmem:[%s3478_s22 + $0x148] sm:$0xff]  ;;  %v177_v26 = vld [vmem:[%s3478_s22 + $0x150] sm:$0xff] }
  0x1c   : > { %174 = vst [vmem:[%s3483_s23 + $0xc0] sm:$0xff] %v173_v24  ;;  %176 = vst [vmem:[%s3483_s23 + $0xc8] sm:$0xff] %v175_v25  ;;  %v179_v27 = vld [vmem:[%s3478_s22 + $0x158] sm:$0xff]  ;;  %v181_v28 = vld [vmem:[%s3478_s22 + $0x160] sm:$0xff] }
  0x1d   : > { %178 = vst [vmem:[%s3483_s23 + $0xd0] sm:$0xff] %v177_v26  ;;  %v183_v29 = vld [vmem:[%s3478_s22 + $0x168] sm:$0xff]  ;;  %180 = vst [vmem:[%s3483_s23 + $0xd8] sm:$0xff] %v179_v27  ;;  %v185_v30 = vld [vmem:[%s3478_s22 + $0x170] sm:$0xff] }
  0x1e   : > { %182 = vst [vmem:[%s3483_s23 + $0xe0] sm:$0xff] %v181_v28  ;;  %184 = vst [vmem:[%s3483_s23 + $0xe8] sm:$0xff] %v183_v29  ;;  %v187_v31 = vld [vmem:[%s3478_s22 + $0x178] sm:$0xff]  ;;  %v189_v32 = vld [vmem:[%s3478_s22 + $0x200] sm:$0xff] }
  0x1f   : > { %186 = vst [vmem:[%s3483_s23 + $0xf0] sm:$0xff] %v185_v30  ;;  %188 = vst [vmem:[%s3483_s23 + $0xf8] sm:$0xff] %v187_v31  ;;  %v191_v33 = vld [vmem:[%s3478_s22 + $0x208] sm:$0xff]  ;;  %v193_v34 = vld [vmem:[%s3478_s22 + $0x210] sm:$0xff] }
  0x20   : > { %190 = vst [vmem:[%s3483_s23 + $0x100] sm:$0xff] %v189_v32  ;;  %v195_v35 = vld [vmem:[%s3478_s22 + $0x218] sm:$0xff]  ;;  %192 = vst [vmem:[%s3483_s23 + $0x108] sm:$0xff] %v191_v33  ;;  %v197_v36 = vld [vmem:[%s3478_s22 + $0x220] sm:$0xff] }
  0x21   : > { %194 = vst [vmem:[%s3483_s23 + $0x110] sm:$0xff] %v193_v34  ;;  %196 = vst [vmem:[%s3483_s23 + $0x118] sm:$0xff] %v195_v35  ;;  %v199_v37 = vld [vmem:[%s3478_s22 + $0x228] sm:$0xff]  ;;  %v201_v38 = vld [vmem:[%s3478_s22 + $0x230] sm:$0xff] }
  0x22   : > { %198 = vst [vmem:[%s3483_s23 + $0x120] sm:$0xff] %v197_v36  ;;  %200 = vst [vmem:[%s3483_s23 + $0x128] sm:$0xff] %v199_v37  ;;  %v203_v39 = vld [vmem:[%s3478_s22 + $0x238] sm:$0xff]  ;;  %v205_v40 = vld [vmem:[%s3478_s22 + $0x240] sm:$0xff] }
  0x23   : > { %202 = vst [vmem:[%s3483_s23 + $0x130] sm:$0xff] %v201_v38  ;;  %v207_v41 = vld [vmem:[%s3478_s22 + $0x248] sm:$0xff]  ;;  %204 = vst [vmem:[%s3483_s23 + $0x138] sm:$0xff] %v203_v39  ;;  %v209_v42 = vld [vmem:[%s3478_s22 + $0x250] sm:$0xff] }
  0x24   : > { %206 = vst [vmem:[%s3483_s23 + $0x140] sm:$0xff] %v205_v40  ;;  %208 = vst [vmem:[%s3483_s23 + $0x148] sm:$0xff] %v207_v41  ;;  %v211_v43 = vld [vmem:[%s3478_s22 + $0x258] sm:$0xff]  ;;  %v213_v44 = vld [vmem:[%s3478_s22 + $0x260] sm:$0xff] }
  0x25   : > { %210 = vst [vmem:[%s3483_s23 + $0x150] sm:$0xff] %v209_v42  ;;  %212 = vst [vmem:[%s3483_s23 + $0x158] sm:$0xff] %v211_v43  ;;  %v215_v45 = vld [vmem:[%s3478_s22 + $0x268] sm:$0xff]  ;;  %v217_v46 = vld [vmem:[%s3478_s22 + $0x270] sm:$0xff] }
  0x26   : > { %214 = vst [vmem:[%s3483_s23 + $0x160] sm:$0xff] %v213_v44  ;;  %v219_v47 = vld [vmem:[%s3478_s22 + $0x278] sm:$0xff]  ;;  %216 = vst [vmem:[%s3483_s23 + $0x168] sm:$0xff] %v215_v45  ;;  %v221_v48 = vld [vmem:[%s3478_s22 + $0x300] sm:$0xff] }
  0x27   : > { %218 = vst [vmem:[%s3483_s23 + $0x170] sm:$0xff] %v217_v46  ;;  %220 = vst [vmem:[%s3483_s23 + $0x178] sm:$0xff] %v219_v47  ;;  %v223_v49 = vld [vmem:[%s3478_s22 + $0x308] sm:$0xff]  ;;  %v225_v50 = vld [vmem:[%s3478_s22 + $0x310] sm:$0xff] }
  0x28   : > { %222 = vst [vmem:[%s3483_s23 + $0x180] sm:$0xff] %v221_v48  ;;  %224 = vst [vmem:[%s3483_s23 + $0x188] sm:$0xff] %v223_v49  ;;  %v227_v51 = vld [vmem:[%s3478_s22 + $0x318] sm:$0xff]  ;;  %v229_v52 = vld [vmem:[%s3478_s22 + $0x320] sm:$0xff] }
  0x29   : > { %226 = vst [vmem:[%s3483_s23 + $0x190] sm:$0xff] %v225_v50  ;;  %v231_v53 = vld [vmem:[%s3478_s22 + $0x328] sm:$0xff]  ;;  %228 = vst [vmem:[%s3483_s23 + $0x198] sm:$0xff] %v227_v51  ;;  %v233_v54 = vld [vmem:[%s3478_s22 + $0x330] sm:$0xff] }
  0x2a   : > { %230 = vst [vmem:[%s3483_s23 + $0x1a0] sm:$0xff] %v229_v52  ;;  %232 = vst [vmem:[%s3483_s23 + $0x1a8] sm:$0xff] %v231_v53  ;;  %v235_v55 = vld [vmem:[%s3478_s22 + $0x338] sm:$0xff]  ;;  %v237_v56 = vld [vmem:[%s3478_s22 + $0x340] sm:$0xff] }
  0x2b   : > { %234 = vst [vmem:[%s3483_s23 + $0x1b0] sm:$0xff] %v233_v54  ;;  %236 = vst [vmem:[%s3483_s23 + $0x1b8] sm:$0xff] %v235_v55  ;;  %v239_v57 = vld [vmem:[%s3478_s22 + $0x348] sm:$0xff]  ;;  %v241_v58 = vld [vmem:[%s3478_s22 + $0x350] sm:$0xff] }
  0x2c   : > { %238 = vst [vmem:[%s3483_s23 + $0x1c0] sm:$0xff] %v237_v56  ;;  %v243_v59 = vld [vmem:[%s3478_s22 + $0x358] sm:$0xff]  ;;  %240 = vst [vmem:[%s3483_s23 + $0x1c8] sm:$0xff] %v239_v57  ;;  %v245_v60 = vld [vmem:[%s3478_s22 + $0x360] sm:$0xff] }
  0x2d   : > { %242 = vst [vmem:[%s3483_s23 + $0x1d0] sm:$0xff] %v241_v58  ;;  %244 = vst [vmem:[%s3483_s23 + $0x1d8] sm:$0xff] %v243_v59  ;;  %v247_v61 = vld [vmem:[%s3478_s22 + $0x368] sm:$0xff]  ;;  %v249_v62 = vld [vmem:[%s3478_s22 + $0x370] sm:$0xff] }
  0x2e   : > { %246 = vst [vmem:[%s3483_s23 + $0x1e0] sm:$0xff] %v245_v60  ;;  %248 = vst [vmem:[%s3483_s23 + $0x1e8] sm:$0xff] %v247_v61  ;;  %v251_v63 = vld [vmem:[%s3478_s22 + $0x378] sm:$0xff]  ;;  %v253_v0 = vld [vmem:[%s3478_s22 + $0x400] sm:$0xff] }
  0x2f   : > { %250 = vst [vmem:[%s3483_s23 + $0x1f0] sm:$0xff] %v249_v62  ;;  %v255_v1 = vld [vmem:[%s3478_s22 + $0x408] sm:$0xff]  ;;  %252 = vst [vmem:[%s3483_s23 + $0x1f8] sm:$0xff] %v251_v63  ;;  %v257_v2 = vld [vmem:[%s3478_s22 + $0x410] sm:$0xff] }
  0x30   : > { %254 = vst [vmem:[%s3483_s23 + $0x200] sm:$0xff] %v253_v0  ;;  %256 = vst [vmem:[%s3483_s23 + $0x208] sm:$0xff] %v255_v1  ;;  %v259_v3 = vld [vmem:[%s3478_s22 + $0x418] sm:$0xff]  ;;  %v261_v4 = vld [vmem:[%s3478_s22 + $0x420] sm:$0xff] }
  0x31   : > { %258 = vst [vmem:[%s3483_s23 + $0x210] sm:$0xff] %v257_v2  ;;  %260 = vst [vmem:[%s3483_s23 + $0x218] sm:$0xff] %v259_v3  ;;  %v263_v5 = vld [vmem:[%s3478_s22 + $0x428] sm:$0xff]  ;;  %v265_v6 = vld [vmem:[%s3478_s22 + $0x430] sm:$0xff] }
  0x32   : > { %262 = vst [vmem:[%s3483_s23 + $0x220] sm:$0xff] %v261_v4  ;;  %v267_v7 = vld [vmem:[%s3478_s22 + $0x438] sm:$0xff]  ;;  %264 = vst [vmem:[%s3483_s23 + $0x228] sm:$0xff] %v263_v5  ;;  %v269_v8 = vld [vmem:[%s3478_s22 + $0x440] sm:$0xff] }
  0x33   : > { %266 = vst [vmem:[%s3483_s23 + $0x230] sm:$0xff] %v265_v6  ;;  %268 = vst [vmem:[%s3483_s23 + $0x238] sm:$0xff] %v267_v7  ;;  %v271_v9 = vld [vmem:[%s3478_s22 + $0x448] sm:$0xff]  ;;  %v273_v10 = vld [vmem:[%s3478_s22 + $0x450] sm:$0xff] }
  0x34   : > { %270 = vst [vmem:[%s3483_s23 + $0x240] sm:$0xff] %v269_v8  ;;  %272 = vst [vmem:[%s3483_s23 + $0x248] sm:$0xff] %v271_v9  ;;  %v275_v11 = vld [vmem:[%s3478_s22 + $0x458] sm:$0xff]  ;;  %v277_v12 = vld [vmem:[%s3478_s22 + $0x460] sm:$0xff] }
  0x35   : > { %274 = vst [vmem:[%s3483_s23 + $0x250] sm:$0xff] %v273_v10  ;;  %v279_v13 = vld [vmem:[%s3478_s22 + $0x468] sm:$0xff]  ;;  %276 = vst [vmem:[%s3483_s23 + $0x258] sm:$0xff] %v275_v11  ;;  %v281_v14 = vld [vmem:[%s3478_s22 + $0x470] sm:$0xff] }
  0x36   : > { %278 = vst [vmem:[%s3483_s23 + $0x260] sm:$0xff] %v277_v12  ;;  %280 = vst [vmem:[%s3483_s23 + $0x268] sm:$0xff] %v279_v13  ;;  %v283_v15 = vld [vmem:[%s3478_s22 + $0x478] sm:$0xff]  ;;  %v285_v16 = vld [vmem:[%s3478_s22 + $0x500] sm:$0xff] }
  0x37   : > { %282 = vst [vmem:[%s3483_s23 + $0x270] sm:$0xff] %v281_v14  ;;  %284 = vst [vmem:[%s3483_s23 + $0x278] sm:$0xff] %v283_v15  ;;  %v287_v17 = vld [vmem:[%s3478_s22 + $0x508] sm:$0xff]  ;;  %v289_v18 = vld [vmem:[%s3478_s22 + $0x510] sm:$0xff] }
  0x38   : > { %286 = vst [vmem:[%s3483_s23 + $0x280] sm:$0xff] %v285_v16  ;;  %v291_v19 = vld [vmem:[%s3478_s22 + $0x518] sm:$0xff]  ;;  %288 = vst [vmem:[%s3483_s23 + $0x288] sm:$0xff] %v287_v17  ;;  %v293_v20 = vld [vmem:[%s3478_s22 + $0x520] sm:$0xff] }
  0x39   : > { %290 = vst [vmem:[%s3483_s23 + $0x290] sm:$0xff] %v289_v18  ;;  %292 = vst [vmem:[%s3483_s23 + $0x298] sm:$0xff] %v291_v19  ;;  %v295_v21 = vld [vmem:[%s3478_s22 + $0x528] sm:$0xff]  ;;  %v297_v22 = vld [vmem:[%s3478_s22 + $0x530] sm:$0xff] }
  0x3a   : > { %294 = vst [vmem:[%s3483_s23 + $0x2a0] sm:$0xff] %v293_v20  ;;  %296 = vst [vmem:[%s3483_s23 + $0x2a8] sm:$0xff] %v295_v21  ;;  %v299_v23 = vld [vmem:[%s3478_s22 + $0x538] sm:$0xff]  ;;  %v301_v24 = vld [vmem:[%s3478_s22 + $0x540] sm:$0xff] }
  0x3b   : > { %298 = vst [vmem:[%s3483_s23 + $0x2b0] sm:$0xff] %v297_v22  ;;  %v303_v25 = vld [vmem:[%s3478_s22 + $0x548] sm:$0xff]  ;;  %300 = vst [vmem:[%s3483_s23 + $0x2b8] sm:$0xff] %v299_v23  ;;  %v305_v26 = vld [vmem:[%s3478_s22 + $0x550] sm:$0xff] }
  0x3c   : > { %302 = vst [vmem:[%s3483_s23 + $0x2c0] sm:$0xff] %v301_v24  ;;  %304 = vst [vmem:[%s3483_s23 + $0x2c8] sm:$0xff] %v303_v25  ;;  %v307_v27 = vld [vmem:[%s3478_s22 + $0x558] sm:$0xff]  ;;  %v309_v28 = vld [vmem:[%s3478_s22 + $0x560] sm:$0xff] }
  0x3d   : > { %306 = vst [vmem:[%s3483_s23 + $0x2d0] sm:$0xff] %v305_v26  ;;  %308 = vst [vmem:[%s3483_s23 + $0x2d8] sm:$0xff] %v307_v27  ;;  %v311_v29 = vld [vmem:[%s3478_s22 + $0x568] sm:$0xff]  ;;  %v313_v30 = vld [vmem:[%s3478_s22 + $0x570] sm:$0xff] }
  0x3e   : > { %310 = vst [vmem:[%s3483_s23 + $0x2e0] sm:$0xff] %v309_v28  ;;  %v315_v31 = vld [vmem:[%s3478_s22 + $0x578] sm:$0xff]  ;;  %312 = vst [vmem:[%s3483_s23 + $0x2e8] sm:$0xff] %v311_v29  ;;  %v317_v32 = vld [vmem:[%s3478_s22 + $0x600] sm:$0xff] }
  0x3f   : > { %314 = vst [vmem:[%s3483_s23 + $0x2f0] sm:$0xff] %v313_v30  ;;  %316 = vst [vmem:[%s3483_s23 + $0x2f8] sm:$0xff] %v315_v31  ;;  %v319_v33 = vld [vmem:[%s3478_s22 + $0x608] sm:$0xff]  ;;  %v321_v34 = vld [vmem:[%s3478_s22 + $0x610] sm:$0xff] }
  0x40   : > { %318 = vst [vmem:[%s3483_s23 + $0x300] sm:$0xff] %v317_v32  ;;  %320 = vst [vmem:[%s3483_s23 + $0x308] sm:$0xff] %v319_v33  ;;  %v323_v35 = vld [vmem:[%s3478_s22 + $0x618] sm:$0xff]  ;;  %v325_v36 = vld [vmem:[%s3478_s22 + $0x620] sm:$0xff] }
  0x41   : > { %322 = vst [vmem:[%s3483_s23 + $0x310] sm:$0xff] %v321_v34  ;;  %v327_v37 = vld [vmem:[%s3478_s22 + $0x628] sm:$0xff]  ;;  %324 = vst [vmem:[%s3483_s23 + $0x318] sm:$0xff] %v323_v35  ;;  %v329_v38 = vld [vmem:[%s3478_s22 + $0x630] sm:$0xff] }
  0x42   : > { %326 = vst [vmem:[%s3483_s23 + $0x320] sm:$0xff] %v325_v36  ;;  %328 = vst [vmem:[%s3483_s23 + $0x328] sm:$0xff] %v327_v37  ;;  %v331_v39 = vld [vmem:[%s3478_s22 + $0x638] sm:$0xff]  ;;  %v333_v40 = vld [vmem:[%s3478_s22 + $0x640] sm:$0xff] }
  0x43   : > { %330 = vst [vmem:[%s3483_s23 + $0x330] sm:$0xff] %v329_v38  ;;  %332 = vst [vmem:[%s3483_s23 + $0x338] sm:$0xff] %v331_v39  ;;  %v335_v41 = vld [vmem:[%s3478_s22 + $0x648] sm:$0xff]  ;;  %v337_v42 = vld [vmem:[%s3478_s22 + $0x650] sm:$0xff] }
  0x44   : > { %334 = vst [vmem:[%s3483_s23 + $0x340] sm:$0xff] %v333_v40  ;;  %v339_v43 = vld [vmem:[%s3478_s22 + $0x658] sm:$0xff]  ;;  %336 = vst [vmem:[%s3483_s23 + $0x348] sm:$0xff] %v335_v41  ;;  %v341_v44 = vld [vmem:[%s3478_s22 + $0x660] sm:$0xff] }
  0x45   : > { %338 = vst [vmem:[%s3483_s23 + $0x350] sm:$0xff] %v337_v42  ;;  %340 = vst [vmem:[%s3483_s23 + $0x358] sm:$0xff] %v339_v43  ;;  %v343_v45 = vld [vmem:[%s3478_s22 + $0x668] sm:$0xff]  ;;  %v345_v46 = vld [vmem:[%s3478_s22 + $0x670] sm:$0xff] }
  0x46   : > { %342 = vst [vmem:[%s3483_s23 + $0x360] sm:$0xff] %v341_v44  ;;  %344 = vst [vmem:[%s3483_s23 + $0x368] sm:$0xff] %v343_v45  ;;  %v347_v47 = vld [vmem:[%s3478_s22 + $0x678] sm:$0xff]  ;;  %v349_v48 = vld [vmem:[%s3478_s22 + $0x700] sm:$0xff] }
  0x47   : > { %346 = vst [vmem:[%s3483_s23 + $0x370] sm:$0xff] %v345_v46  ;;  %v351_v49 = vld [vmem:[%s3478_s22 + $0x708] sm:$0xff]  ;;  %348 = vst [vmem:[%s3483_s23 + $0x378] sm:$0xff] %v347_v47  ;;  %v353_v50 = vld [vmem:[%s3478_s22 + $0x710] sm:$0xff] }
  0x48   : > { %350 = vst [vmem:[%s3483_s23 + $0x380] sm:$0xff] %v349_v48  ;;  %352 = vst [vmem:[%s3483_s23 + $0x388] sm:$0xff] %v351_v49  ;;  %v355_v51 = vld [vmem:[%s3478_s22 + $0x718] sm:$0xff]  ;;  %v357_v52 = vld [vmem:[%s3478_s22 + $0x720] sm:$0xff] }
  0x49   : > { %354 = vst [vmem:[%s3483_s23 + $0x390] sm:$0xff] %v353_v50  ;;  %356 = vst [vmem:[%s3483_s23 + $0x398] sm:$0xff] %v355_v51  ;;  %v359_v53 = vld [vmem:[%s3478_s22 + $0x728] sm:$0xff]  ;;  %v361_v54 = vld [vmem:[%s3478_s22 + $0x730] sm:$0xff] }
  0x4a   : > { %358 = vst [vmem:[%s3483_s23 + $0x3a0] sm:$0xff] %v357_v52  ;;  %v363_v55 = vld [vmem:[%s3478_s22 + $0x738] sm:$0xff]  ;;  %360 = vst [vmem:[%s3483_s23 + $0x3a8] sm:$0xff] %v359_v53  ;;  %v365_v56 = vld [vmem:[%s3478_s22 + $0x740] sm:$0xff] }
  0x4b   : > { %362 = vst [vmem:[%s3483_s23 + $0x3b0] sm:$0xff] %v361_v54  ;;  %364 = vst [vmem:[%s3483_s23 + $0x3b8] sm:$0xff] %v363_v55  ;;  %v367_v57 = vld [vmem:[%s3478_s22 + $0x748] sm:$0xff]  ;;  %v369_v58 = vld [vmem:[%s3478_s22 + $0x750] sm:$0xff] }
  0x4c   : > { %366 = vst [vmem:[%s3483_s23 + $0x3c0] sm:$0xff] %v365_v56  ;;  %368 = vst [vmem:[%s3483_s23 + $0x3c8] sm:$0xff] %v367_v57  ;;  %v371_v59 = vld [vmem:[%s3478_s22 + $0x758] sm:$0xff]  ;;  %v373_v60 = vld [vmem:[%s3478_s22 + $0x760] sm:$0xff] }
  0x4d   : > { %370 = vst [vmem:[%s3483_s23 + $0x3d0] sm:$0xff] %v369_v58  ;;  %v375_v61 = vld [vmem:[%s3478_s22 + $0x768] sm:$0xff]  ;;  %372 = vst [vmem:[%s3483_s23 + $0x3d8] sm:$0xff] %v371_v59  ;;  %v377_v62 = vld [vmem:[%s3478_s22 + $0x770] sm:$0xff] }
  0x4e   : > { %374 = vst [vmem:[%s3483_s23 + $0x3e0] sm:$0xff] %v373_v60  ;;  %376 = vst [vmem:[%s3483_s23 + $0x3e8] sm:$0xff] %v375_v61  ;;  %v379_v63 = vld [vmem:[%s3478_s22 + $0x778] sm:$0xff]  ;;  %v381_v0 = vld [vmem:[%s3478_s22 + $0x800] sm:$0xff] }
  0x4f   : > { %378 = vst [vmem:[%s3483_s23 + $0x3f0] sm:$0xff] %v377_v62  ;;  %380 = vst [vmem:[%s3483_s23 + $0x3f8] sm:$0xff] %v379_v63  ;;  %v383_v1 = vld [vmem:[%s3478_s22 + $0x808] sm:$0xff]  ;;  %v385_v2 = vld [vmem:[%s3478_s22 + $0x810] sm:$0xff] }
  0x50   : > { %382 = vst [vmem:[%s3483_s23 + $0x400] sm:$0xff] %v381_v0  ;;  %v387_v3 = vld [vmem:[%s3478_s22 + $0x818] sm:$0xff]  ;;  %384 = vst [vmem:[%s3483_s23 + $0x408] sm:$0xff] %v383_v1  ;;  %v389_v4 = vld [vmem:[%s3478_s22 + $0x820] sm:$0xff] }
  0x51   : > { %386 = vst [vmem:[%s3483_s23 + $0x410] sm:$0xff] %v385_v2  ;;  %388 = vst [vmem:[%s3483_s23 + $0x418] sm:$0xff] %v387_v3  ;;  %v391_v5 = vld [vmem:[%s3478_s22 + $0x828] sm:$0xff]  ;;  %v393_v6 = vld [vmem:[%s3478_s22 + $0x830] sm:$0xff] }
  0x52   : > { %390 = vst [vmem:[%s3483_s23 + $0x420] sm:$0xff] %v389_v4  ;;  %392 = vst [vmem:[%s3483_s23 + $0x428] sm:$0xff] %v391_v5  ;;  %v395_v7 = vld [vmem:[%s3478_s22 + $0x838] sm:$0xff]  ;;  %v397_v8 = vld [vmem:[%s3478_s22 + $0x840] sm:$0xff] }
  0x53   : > { %394 = vst [vmem:[%s3483_s23 + $0x430] sm:$0xff] %v393_v6  ;;  %v399_v9 = vld [vmem:[%s3478_s22 + $0x848] sm:$0xff]  ;;  %396 = vst [vmem:[%s3483_s23 + $0x438] sm:$0xff] %v395_v7  ;;  %v401_v10 = vld [vmem:[%s3478_s22 + $0x850] sm:$0xff] }
  0x54   : > { %398 = vst [vmem:[%s3483_s23 + $0x440] sm:$0xff] %v397_v8  ;;  %400 = vst [vmem:[%s3483_s23 + $0x448] sm:$0xff] %v399_v9  ;;  %v403_v11 = vld [vmem:[%s3478_s22 + $0x858] sm:$0xff]  ;;  %v405_v12 = vld [vmem:[%s3478_s22 + $0x860] sm:$0xff] }
  0x55   : > { %402 = vst [vmem:[%s3483_s23 + $0x450] sm:$0xff] %v401_v10  ;;  %404 = vst [vmem:[%s3483_s23 + $0x458] sm:$0xff] %v403_v11  ;;  %v407_v13 = vld [vmem:[%s3478_s22 + $0x868] sm:$0xff]  ;;  %v409_v14 = vld [vmem:[%s3478_s22 + $0x870] sm:$0xff] }
  0x56   : > { %406 = vst [vmem:[%s3483_s23 + $0x460] sm:$0xff] %v405_v12  ;;  %v411_v15 = vld [vmem:[%s3478_s22 + $0x878] sm:$0xff]  ;;  %408 = vst [vmem:[%s3483_s23 + $0x468] sm:$0xff] %v407_v13  ;;  %v413_v16 = vld [vmem:[%s3478_s22 + $0x900] sm:$0xff] }
  0x57   : > { %410 = vst [vmem:[%s3483_s23 + $0x470] sm:$0xff] %v409_v14  ;;  %412 = vst [vmem:[%s3483_s23 + $0x478] sm:$0xff] %v411_v15  ;;  %v415_v17 = vld [vmem:[%s3478_s22 + $0x908] sm:$0xff]  ;;  %v417_v18 = vld [vmem:[%s3478_s22 + $0x910] sm:$0xff] }
  0x58   : > { %414 = vst [vmem:[%s3483_s23 + $0x480] sm:$0xff] %v413_v16  ;;  %416 = vst [vmem:[%s3483_s23 + $0x488] sm:$0xff] %v415_v17  ;;  %v419_v19 = vld [vmem:[%s3478_s22 + $0x918] sm:$0xff]  ;;  %v421_v20 = vld [vmem:[%s3478_s22 + $0x920] sm:$0xff] }
  0x59   : > { %418 = vst [vmem:[%s3483_s23 + $0x490] sm:$0xff] %v417_v18  ;;  %v423_v21 = vld [vmem:[%s3478_s22 + $0x928] sm:$0xff]  ;;  %420 = vst [vmem:[%s3483_s23 + $0x498] sm:$0xff] %v419_v19  ;;  %v425_v22 = vld [vmem:[%s3478_s22 + $0x930] sm:$0xff] }
  0x5a   : > { %422 = vst [vmem:[%s3483_s23 + $0x4a0] sm:$0xff] %v421_v20  ;;  %424 = vst [vmem:[%s3483_s23 + $0x4a8] sm:$0xff] %v423_v21  ;;  %v427_v23 = vld [vmem:[%s3478_s22 + $0x938] sm:$0xff]  ;;  %v429_v24 = vld [vmem:[%s3478_s22 + $0x940] sm:$0xff] }
  0x5b   : > { %426 = vst [vmem:[%s3483_s23 + $0x4b0] sm:$0xff] %v425_v22  ;;  %428 = vst [vmem:[%s3483_s23 + $0x4b8] sm:$0xff] %v427_v23  ;;  %v431_v25 = vld [vmem:[%s3478_s22 + $0x948] sm:$0xff]  ;;  %v433_v26 = vld [vmem:[%s3478_s22 + $0x950] sm:$0xff] }
  0x5c   : > { %430 = vst [vmem:[%s3483_s23 + $0x4c0] sm:$0xff] %v429_v24  ;;  %v435_v27 = vld [vmem:[%s3478_s22 + $0x958] sm:$0xff]  ;;  %432 = vst [vmem:[%s3483_s23 + $0x4c8] sm:$0xff] %v431_v25  ;;  %v437_v28 = vld [vmem:[%s3478_s22 + $0x960] sm:$0xff] }
  0x5d   : > { %434 = vst [vmem:[%s3483_s23 + $0x4d0] sm:$0xff] %v433_v26  ;;  %436 = vst [vmem:[%s3483_s23 + $0x4d8] sm:$0xff] %v435_v27  ;;  %v439_v29 = vld [vmem:[%s3478_s22 + $0x968] sm:$0xff]  ;;  %v441_v30 = vld [vmem:[%s3478_s22 + $0x970] sm:$0xff] }
  0x5e   : > { %438 = vst [vmem:[%s3483_s23 + $0x4e0] sm:$0xff] %v437_v28  ;;  %440 = vst [vmem:[%s3483_s23 + $0x4e8] sm:$0xff] %v439_v29  ;;  %v443_v31 = vld [vmem:[%s3478_s22 + $0x978] sm:$0xff]  ;;  %v445_v32 = vld [vmem:[%s3478_s22 + $0xa00] sm:$0xff] }
  0x5f   : > { %442 = vst [vmem:[%s3483_s23 + $0x4f0] sm:$0xff] %v441_v30  ;;  %v447_v33 = vld [vmem:[%s3478_s22 + $0xa08] sm:$0xff]  ;;  %444 = vst [vmem:[%s3483_s23 + $0x4f8] sm:$0xff] %v443_v31  ;;  %v449_v34 = vld [vmem:[%s3478_s22 + $0xa10] sm:$0xff] }
  0x60   : > { %446 = vst [vmem:[%s3483_s23 + $0x500] sm:$0xff] %v445_v32  ;;  %448 = vst [vmem:[%s3483_s23 + $0x508] sm:$0xff] %v447_v33  ;;  %v451_v35 = vld [vmem:[%s3478_s22 + $0xa18] sm:$0xff]  ;;  %v453_v36 = vld [vmem:[%s3478_s22 + $0xa20] sm:$0xff] }
  0x61   : > { %450 = vst [vmem:[%s3483_s23 + $0x510] sm:$0xff] %v449_v34  ;;  %452 = vst [vmem:[%s3483_s23 + $0x518] sm:$0xff] %v451_v35  ;;  %v455_v37 = vld [vmem:[%s3478_s22 + $0xa28] sm:$0xff]  ;;  %v457_v38 = vld [vmem:[%s3478_s22 + $0xa30] sm:$0xff] }
  0x62   : > { %454 = vst [vmem:[%s3483_s23 + $0x520] sm:$0xff] %v453_v36  ;;  %v459_v39 = vld [vmem:[%s3478_s22 + $0xa38] sm:$0xff]  ;;  %456 = vst [vmem:[%s3483_s23 + $0x528] sm:$0xff] %v455_v37  ;;  %v461_v40 = vld [vmem:[%s3478_s22 + $0xa40] sm:$0xff] }
  0x63   : > { %458 = vst [vmem:[%s3483_s23 + $0x530] sm:$0xff] %v457_v38  ;;  %460 = vst [vmem:[%s3483_s23 + $0x538] sm:$0xff] %v459_v39  ;;  %v463_v41 = vld [vmem:[%s3478_s22 + $0xa48] sm:$0xff]  ;;  %v465_v42 = vld [vmem:[%s3478_s22 + $0xa50] sm:$0xff] }
  0x64   : > { %462 = vst [vmem:[%s3483_s23 + $0x540] sm:$0xff] %v461_v40  ;;  %464 = vst [vmem:[%s3483_s23 + $0x548] sm:$0xff] %v463_v41  ;;  %v467_v43 = vld [vmem:[%s3478_s22 + $0xa58] sm:$0xff]  ;;  %v469_v44 = vld [vmem:[%s3478_s22 + $0xa60] sm:$0xff] }
  0x65   : > { %466 = vst [vmem:[%s3483_s23 + $0x550] sm:$0xff] %v465_v42  ;;  %v471_v45 = vld [vmem:[%s3478_s22 + $0xa68] sm:$0xff]  ;;  %468 = vst [vmem:[%s3483_s23 + $0x558] sm:$0xff] %v467_v43  ;;  %v473_v46 = vld [vmem:[%s3478_s22 + $0xa70] sm:$0xff] }
  0x66   : > { %470 = vst [vmem:[%s3483_s23 + $0x560] sm:$0xff] %v469_v44  ;;  %472 = vst [vmem:[%s3483_s23 + $0x568] sm:$0xff] %v471_v45  ;;  %v475_v47 = vld [vmem:[%s3478_s22 + $0xa78] sm:$0xff]  ;;  %v477_v48 = vld [vmem:[%s3478_s22 + $0xb00] sm:$0xff] }
  0x67   : > { %474 = vst [vmem:[%s3483_s23 + $0x570] sm:$0xff] %v473_v46  ;;  %476 = vst [vmem:[%s3483_s23 + $0x578] sm:$0xff] %v475_v47  ;;  %v479_v49 = vld [vmem:[%s3478_s22 + $0xb08] sm:$0xff]  ;;  %v481_v50 = vld [vmem:[%s3478_s22 + $0xb10] sm:$0xff] }
  0x68   : > { %478 = vst [vmem:[%s3483_s23 + $0x580] sm:$0xff] %v477_v48  ;;  %v483_v51 = vld [vmem:[%s3478_s22 + $0xb18] sm:$0xff]  ;;  %480 = vst [vmem:[%s3483_s23 + $0x588] sm:$0xff] %v479_v49  ;;  %v485_v52 = vld [vmem:[%s3478_s22 + $0xb20] sm:$0xff] }
  0x69   : > { %482 = vst [vmem:[%s3483_s23 + $0x590] sm:$0xff] %v481_v50  ;;  %484 = vst [vmem:[%s3483_s23 + $0x598] sm:$0xff] %v483_v51  ;;  %v487_v53 = vld [vmem:[%s3478_s22 + $0xb28] sm:$0xff]  ;;  %v489_v54 = vld [vmem:[%s3478_s22 + $0xb30] sm:$0xff] }
  0x6a   : > { %486 = vst [vmem:[%s3483_s23 + $0x5a0] sm:$0xff] %v485_v52  ;;  %488 = vst [vmem:[%s3483_s23 + $0x5a8] sm:$0xff] %v487_v53  ;;  %v491_v55 = vld [vmem:[%s3478_s22 + $0xb38] sm:$0xff]  ;;  %v493_v56 = vld [vmem:[%s3478_s22 + $0xb40] sm:$0xff] }
  0x6b   : > { %490 = vst [vmem:[%s3483_s23 + $0x5b0] sm:$0xff] %v489_v54  ;;  %v495_v57 = vld [vmem:[%s3478_s22 + $0xb48] sm:$0xff]  ;;  %492 = vst [vmem:[%s3483_s23 + $0x5b8] sm:$0xff] %v491_v55  ;;  %v497_v58 = vld [vmem:[%s3478_s22 + $0xb50] sm:$0xff] }
  0x6c   : > { %494 = vst [vmem:[%s3483_s23 + $0x5c0] sm:$0xff] %v493_v56  ;;  %496 = vst [vmem:[%s3483_s23 + $0x5c8] sm:$0xff] %v495_v57  ;;  %v499_v59 = vld [vmem:[%s3478_s22 + $0xb58] sm:$0xff]  ;;  %v501_v60 = vld [vmem:[%s3478_s22 + $0xb60] sm:$0xff] }
  0x6d   : > { %498 = vst [vmem:[%s3483_s23 + $0x5d0] sm:$0xff] %v497_v58  ;;  %500 = vst [vmem:[%s3483_s23 + $0x5d8] sm:$0xff] %v499_v59  ;;  %v503_v61 = vld [vmem:[%s3478_s22 + $0xb68] sm:$0xff]  ;;  %v505_v62 = vld [vmem:[%s3478_s22 + $0xb70] sm:$0xff] }
  0x6e   : > { %502 = vst [vmem:[%s3483_s23 + $0x5e0] sm:$0xff] %v501_v60  ;;  %v507_v63 = vld [vmem:[%s3478_s22 + $0xb78] sm:$0xff]  ;;  %504 = vst [vmem:[%s3483_s23 + $0x5e8] sm:$0xff] %v503_v61  ;;  %v509_v0 = vld [vmem:[%s3478_s22 + $0xc00] sm:$0xff] }
  0x6f   : > { %506 = vst [vmem:[%s3483_s23 + $0x5f0] sm:$0xff] %v505_v62  ;;  %508 = vst [vmem:[%s3483_s23 + $0x5f8] sm:$0xff] %v507_v63  ;;  %v511_v1 = vld [vmem:[%s3478_s22 + $0xc08] sm:$0xff]  ;;  %v513_v2 = vld [vmem:[%s3478_s22 + $0xc10] sm:$0xff] }
  0x70   : > { %510 = vst [vmem:[%s3483_s23 + $0x600] sm:$0xff] %v509_v0  ;;  %512 = vst [vmem:[%s3483_s23 + $0x608] sm:$0xff] %v511_v1  ;;  %v515_v3 = vld [vmem:[%s3478_s22 + $0xc18] sm:$0xff]  ;;  %v517_v4 = vld [vmem:[%s3478_s22 + $0xc20] sm:$0xff] }
  0x71   : > { %514 = vst [vmem:[%s3483_s23 + $0x610] sm:$0xff] %v513_v2  ;;  %v519_v5 = vld [vmem:[%s3478_s22 + $0xc28] sm:$0xff]  ;;  %516 = vst [vmem:[%s3483_s23 + $0x618] sm:$0xff] %v515_v3  ;;  %v521_v6 = vld [vmem:[%s3478_s22 + $0xc30] sm:$0xff] }
  0x72   : > { %518 = vst [vmem:[%s3483_s23 + $0x620] sm:$0xff] %v517_v4  ;;  %520 = vst [vmem:[%s3483_s23 + $0x628] sm:$0xff] %v519_v5  ;;  %v523_v7 = vld [vmem:[%s3478_s22 + $0xc38] sm:$0xff]  ;;  %v525_v8 = vld [vmem:[%s3478_s22 + $0xc40] sm:$0xff] }
  0x73   : > { %522 = vst [vmem:[%s3483_s23 + $0x630] sm:$0xff] %v521_v6  ;;  %524 = vst [vmem:[%s3483_s23 + $0x638] sm:$0xff] %v523_v7  ;;  %v527_v9 = vld [vmem:[%s3478_s22 + $0xc48] sm:$0xff]  ;;  %v529_v10 = vld [vmem:[%s3478_s22 + $0xc50] sm:$0xff] }
  0x74   : > { %526 = vst [vmem:[%s3483_s23 + $0x640] sm:$0xff] %v525_v8  ;;  %v531_v11 = vld [vmem:[%s3478_s22 + $0xc58] sm:$0xff]  ;;  %528 = vst [vmem:[%s3483_s23 + $0x648] sm:$0xff] %v527_v9  ;;  %v533_v12 = vld [vmem:[%s3478_s22 + $0xc60] sm:$0xff] }
  0x75   : > { %530 = vst [vmem:[%s3483_s23 + $0x650] sm:$0xff] %v529_v10  ;;  %532 = vst [vmem:[%s3483_s23 + $0x658] sm:$0xff] %v531_v11  ;;  %v535_v13 = vld [vmem:[%s3478_s22 + $0xc68] sm:$0xff]  ;;  %v537_v14 = vld [vmem:[%s3478_s22 + $0xc70] sm:$0xff] }
  0x76   : > { %534 = vst [vmem:[%s3483_s23 + $0x660] sm:$0xff] %v533_v12  ;;  %536 = vst [vmem:[%s3483_s23 + $0x668] sm:$0xff] %v535_v13  ;;  %v539_v15 = vld [vmem:[%s3478_s22 + $0xc78] sm:$0xff]  ;;  %v541_v16 = vld [vmem:[%s3478_s22 + $0xd00] sm:$0xff] }
  0x77   : > { %538 = vst [vmem:[%s3483_s23 + $0x670] sm:$0xff] %v537_v14  ;;  %v543_v17 = vld [vmem:[%s3478_s22 + $0xd08] sm:$0xff]  ;;  %540 = vst [vmem:[%s3483_s23 + $0x678] sm:$0xff] %v539_v15  ;;  %v545_v18 = vld [vmem:[%s3478_s22 + $0xd10] sm:$0xff] }
  0x78   : > { %542 = vst [vmem:[%s3483_s23 + $0x680] sm:$0xff] %v541_v16  ;;  %544 = vst [vmem:[%s3483_s23 + $0x688] sm:$0xff] %v543_v17  ;;  %v547_v19 = vld [vmem:[%s3478_s22 + $0xd18] sm:$0xff]  ;;  %v549_v20 = vld [vmem:[%s3478_s22 + $0xd20] sm:$0xff] }
  0x79   : > { %546 = vst [vmem:[%s3483_s23 + $0x690] sm:$0xff] %v545_v18  ;;  %548 = vst [vmem:[%s3483_s23 + $0x698] sm:$0xff] %v547_v19  ;;  %v551_v21 = vld [vmem:[%s3478_s22 + $0xd28] sm:$0xff]  ;;  %v553_v22 = vld [vmem:[%s3478_s22 + $0xd30] sm:$0xff] }
  0x7a   : > { %550 = vst [vmem:[%s3483_s23 + $0x6a0] sm:$0xff] %v549_v20  ;;  %v555_v23 = vld [vmem:[%s3478_s22 + $0xd38] sm:$0xff]  ;;  %552 = vst [vmem:[%s3483_s23 + $0x6a8] sm:$0xff] %v551_v21  ;;  %v557_v24 = vld [vmem:[%s3478_s22 + $0xd40] sm:$0xff] }
  0x7b   : > { %554 = vst [vmem:[%s3483_s23 + $0x6b0] sm:$0xff] %v553_v22  ;;  %556 = vst [vmem:[%s3483_s23 + $0x6b8] sm:$0xff] %v555_v23  ;;  %v559_v25 = vld [vmem:[%s3478_s22 + $0xd48] sm:$0xff]  ;;  %v561_v26 = vld [vmem:[%s3478_s22 + $0xd50] sm:$0xff] }
  0x7c   : > { %558 = vst [vmem:[%s3483_s23 + $0x6c0] sm:$0xff] %v557_v24  ;;  %560 = vst [vmem:[%s3483_s23 + $0x6c8] sm:$0xff] %v559_v25  ;;  %v563_v27 = vld [vmem:[%s3478_s22 + $0xd58] sm:$0xff]  ;;  %v565_v28 = vld [vmem:[%s3478_s22 + $0xd60] sm:$0xff] }
  0x7d   : > { %562 = vst [vmem:[%s3483_s23 + $0x6d0] sm:$0xff] %v561_v26  ;;  %v567_v29 = vld [vmem:[%s3478_s22 + $0xd68] sm:$0xff]  ;;  %564 = vst [vmem:[%s3483_s23 + $0x6d8] sm:$0xff] %v563_v27  ;;  %v569_v30 = vld [vmem:[%s3478_s22 + $0xd70] sm:$0xff] }
  0x7e   : > { %566 = vst [vmem:[%s3483_s23 + $0x6e0] sm:$0xff] %v565_v28  ;;  %568 = vst [vmem:[%s3483_s23 + $0x6e8] sm:$0xff] %v567_v29  ;;  %v571_v31 = vld [vmem:[%s3478_s22 + $0xd78] sm:$0xff]  ;;  %v573_v32 = vld [vmem:[%s3478_s22 + $0xe00] sm:$0xff] }
  0x7f   : > { %570 = vst [vmem:[%s3483_s23 + $0x6f0] sm:$0xff] %v569_v30  ;;  %572 = vst [vmem:[%s3483_s23 + $0x6f8] sm:$0xff] %v571_v31  ;;  %v575_v33 = vld [vmem:[%s3478_s22 + $0xe08] sm:$0xff]  ;;  %v577_v34 = vld [vmem:[%s3478_s22 + $0xe10] sm:$0xff] }
  0x80   : > { %574 = vst [vmem:[%s3483_s23 + $0x700] sm:$0xff] %v573_v32  ;;  %v579_v35 = vld [vmem:[%s3478_s22 + $0xe18] sm:$0xff]  ;;  %576 = vst [vmem:[%s3483_s23 + $0x708] sm:$0xff] %v575_v33  ;;  %v581_v36 = vld [vmem:[%s3478_s22 + $0xe20] sm:$0xff] }
  0x81   : > { %578 = vst [vmem:[%s3483_s23 + $0x710] sm:$0xff] %v577_v34  ;;  %580 = vst [vmem:[%s3483_s23 + $0x718] sm:$0xff] %v579_v35  ;;  %v583_v37 = vld [vmem:[%s3478_s22 + $0xe28] sm:$0xff]  ;;  %v585_v38 = vld [vmem:[%s3478_s22 + $0xe30] sm:$0xff] }
  0x82   : > { %582 = vst [vmem:[%s3483_s23 + $0x720] sm:$0xff] %v581_v36  ;;  %584 = vst [vmem:[%s3483_s23 + $0x728] sm:$0xff] %v583_v37  ;;  %v587_v39 = vld [vmem:[%s3478_s22 + $0xe38] sm:$0xff]  ;;  %v589_v40 = vld [vmem:[%s3478_s22 + $0xe40] sm:$0xff] }
  0x83   : > { %586 = vst [vmem:[%s3483_s23 + $0x730] sm:$0xff] %v585_v38  ;;  %v591_v41 = vld [vmem:[%s3478_s22 + $0xe48] sm:$0xff]  ;;  %588 = vst [vmem:[%s3483_s23 + $0x738] sm:$0xff] %v587_v39  ;;  %v593_v42 = vld [vmem:[%s3478_s22 + $0xe50] sm:$0xff] }
  0x84   : > { %590 = vst [vmem:[%s3483_s23 + $0x740] sm:$0xff] %v589_v40  ;;  %592 = vst [vmem:[%s3483_s23 + $0x748] sm:$0xff] %v591_v41  ;;  %v595_v43 = vld [vmem:[%s3478_s22 + $0xe58] sm:$0xff]  ;;  %v597_v44 = vld [vmem:[%s3478_s22 + $0xe60] sm:$0xff] }
  0x85   : > { %594 = vst [vmem:[%s3483_s23 + $0x750] sm:$0xff] %v593_v42  ;;  %596 = vst [vmem:[%s3483_s23 + $0x758] sm:$0xff] %v595_v43  ;;  %v599_v45 = vld [vmem:[%s3478_s22 + $0xe68] sm:$0xff]  ;;  %v601_v46 = vld [vmem:[%s3478_s22 + $0xe70] sm:$0xff] }
  0x86   : > { %598 = vst [vmem:[%s3483_s23 + $0x760] sm:$0xff] %v597_v44  ;;  %v603_v47 = vld [vmem:[%s3478_s22 + $0xe78] sm:$0xff]  ;;  %600 = vst [vmem:[%s3483_s23 + $0x768] sm:$0xff] %v599_v45  ;;  %v605_v48 = vld [vmem:[%s3478_s22 + $0xf00] sm:$0xff] }
  0x87   : > { %602 = vst [vmem:[%s3483_s23 + $0x770] sm:$0xff] %v601_v46  ;;  %604 = vst [vmem:[%s3483_s23 + $0x778] sm:$0xff] %v603_v47  ;;  %v607_v49 = vld [vmem:[%s3478_s22 + $0xf08] sm:$0xff]  ;;  %v609_v50 = vld [vmem:[%s3478_s22 + $0xf10] sm:$0xff] }
  0x88   : > { %606 = vst [vmem:[%s3483_s23 + $0x780] sm:$0xff] %v605_v48  ;;  %608 = vst [vmem:[%s3483_s23 + $0x788] sm:$0xff] %v607_v49  ;;  %v611_v51 = vld [vmem:[%s3478_s22 + $0xf18] sm:$0xff]  ;;  %v613_v52 = vld [vmem:[%s3478_s22 + $0xf20] sm:$0xff] }
  0x89   : > { %610 = vst [vmem:[%s3483_s23 + $0x790] sm:$0xff] %v609_v50  ;;  %v615_v53 = vld [vmem:[%s3478_s22 + $0xf28] sm:$0xff]  ;;  %612 = vst [vmem:[%s3483_s23 + $0x798] sm:$0xff] %v611_v51  ;;  %v617_v54 = vld [vmem:[%s3478_s22 + $0xf30] sm:$0xff] }
  0x8a   : > { %614 = vst [vmem:[%s3483_s23 + $0x7a0] sm:$0xff] %v613_v52  ;;  %616 = vst [vmem:[%s3483_s23 + $0x7a8] sm:$0xff] %v615_v53  ;;  %v619_v55 = vld [vmem:[%s3478_s22 + $0xf38] sm:$0xff]  ;;  %v621_v56 = vld [vmem:[%s3478_s22 + $0xf40] sm:$0xff] }
  0x8b   : > { %618 = vst [vmem:[%s3483_s23 + $0x7b0] sm:$0xff] %v617_v54  ;;  %620 = vst [vmem:[%s3483_s23 + $0x7b8] sm:$0xff] %v619_v55  ;;  %v623_v57 = vld [vmem:[%s3478_s22 + $0xf48] sm:$0xff]  ;;  %v625_v58 = vld [vmem:[%s3478_s22 + $0xf50] sm:$0xff] }
  0x8c   : > { %622 = vst [vmem:[%s3483_s23 + $0x7c0] sm:$0xff] %v621_v56  ;;  %v627_v59 = vld [vmem:[%s3478_s22 + $0xf58] sm:$0xff]  ;;  %624 = vst [vmem:[%s3483_s23 + $0x7c8] sm:$0xff] %v623_v57  ;;  %v629_v60 = vld [vmem:[%s3478_s22 + $0xf60] sm:$0xff] }
  0x8d   : > { %626 = vst [vmem:[%s3483_s23 + $0x7d0] sm:$0xff] %v625_v58  ;;  %628 = vst [vmem:[%s3483_s23 + $0x7d8] sm:$0xff] %v627_v59  ;;  %v631_v61 = vld [vmem:[%s3478_s22 + $0xf68] sm:$0xff]  ;;  %v633_v62 = vld [vmem:[%s3478_s22 + $0xf70] sm:$0xff] }
  0x8e   : > { %630 = vst [vmem:[%s3483_s23 + $0x7e0] sm:$0xff] %v629_v60  ;;  %632 = vst [vmem:[%s3483_s23 + $0x7e8] sm:$0xff] %v631_v61  ;;  %v635_v63 = vld [vmem:[%s3478_s22 + $0xf78] sm:$0xff] }
  0x8f   : > { %634 = vst [vmem:[%s3483_s23 + $0x7f0] sm:$0xff] %v633_v62  ;;  %636 = vst [vmem:[%s3483_s23 + $0x7f8] sm:$0xff] %v635_v63 }
  0x90 PF: > { %p3051_p5 = scmp.ge.s32.totalorder %s3426_s11, 1  ;;  %p641_p6 = scmp.lt.s32.totalorder %s3426_s11, 3 }
  0x92   : > { %p642_p7 = pnand %p3051_p5, %p641_p6 }
  0x93   : > { %s648_s24 = sand.u32 (!%p642_p7), 1, %s3418_s9   ;;  %s4275_s3 = sshll.u32 (!%p642_p7), %s3044_s12, 5 }
  0x94   : > { %645 = sbr.rel (%p642_p7) target bundleno = 626 (0x272), region = 47  ;;  %s3052_s25 = sshll.u32 (!%p642_p7), %s648_s24, 11 }
  0x95   : > { %s3999_s26 = scalar_lea.vmem (!%p642_p7), [#allocation2], %s3052_s25  ;;  %p671_p8 = scmp.lt.s32.totalorder (!%p642_p7), %s4275_s3, 63 }
  0x99   : > { %v3428_v0 = vmov 0   ;;  %v902_v1 = vld [vmem:[%s3999_s26 + $0x700] sm:$0xff]  ;;  %v903_v3 = vld [vmem:[%s3999_s26 + $0x708] sm:$0xff]  ;;  %v904_v63 = vld [vmem:[%s3999_s26 + $0x710] sm:$0xff]  ;;  %s4343_s3 = smov (!%p671_p8, %s4275_s3), 63 }
  0x9a   : > { %2246 = vmatprep.mubr.bf16.mxu0 %v3428_v0  ;;  %2287 = vmatprep.mubr.bf16.mxu1 %v3428_v0  ;;  %v918_v2 = vld [vmem:[%s3999_s26 + $0x780] sm:$0xff]  ;;  %v919_v5 = vld [vmem:[%s3999_s26 + $0x788] sm:$0xff]  ;;  %s3054_s4 = sshll.u32 %s4343_s3, 2 }
  0x9b   : > { %v3280_v4 = vcombine.high %v902_v1, %v918_v2  ;;  %v3279_v6 = vcombine.low %v902_v1, %v918_v2  ;;  %v870_v7 = vld [vmem:[%s3999_s26 + $0x600] sm:$0xff]  ;;  %v3282_v9 = vcombine.high %v903_v3, %v919_v5  ;;  %v3281_v10 = vcombine.low %v903_v3, %v919_v5  ;;  %v871_v12 = vld [vmem:[%s3999_s26 + $0x608] sm:$0xff]  ;;  %v920_v1 = vld [vmem:[%s3999_s26 + $0x790] sm:$0xff]  ;;  %s4300_s7 = scalar_lea.vmem %s4338_s2, %s3054_s4 }
  0x9c   : > { %v886_v8 = vld [vmem:[%s3999_s26 + $0x680] sm:$0xff]  ;;  %v887_v13 = vld [vmem:[%s3999_s26 + $0x688] sm:$0xff]  ;;  %v905_v2 = vld [vmem:[%s3999_s26 + $0x718] sm:$0xff] }
  0x9d   : > { %v3248_v11 = vcombine.high %v870_v7, %v886_v8  ;;  %v838_v14 = vld [vmem:[%s3999_s26 + $0x500] sm:$0xff]  ;;  %2214 = vmatprep.subr.bf16.mxu0 %v3280_v4  ;;  %v3250_v15 = vcombine.high %v871_v12, %v887_v13  ;;  %v839_v17 = vld [vmem:[%s3999_s26 + $0x508] sm:$0xff]  ;;  %2255 = vmatprep.subr.bf16.mxu1 %v3282_v9  ;;  %v3247_v19 = vcombine.low %v870_v7, %v886_v8  ;;  %v921_v3 = vld [vmem:[%s3999_s26 + $0x798] sm:$0xff] }
  0x9e   : > { %v854_v16 = vld [vmem:[%s3999_s26 + $0x580] sm:$0xff]  ;;  %v855_v18 = vld [vmem:[%s3999_s26 + $0x588] sm:$0xff]  ;;  %2215 = vmatpush1.bf16.msra.mxu0 %v3279_v6  ;;  %2256 = vmatpush1.bf16.msra.mxu1 %v3281_v10  ;;  %v3249_v20 = vcombine.low %v871_v12, %v887_v13  ;;  %v3284_v6 = vcombine.high %v904_v63, %v920_v1  ;;  %v3286_v7 = vcombine.high %v905_v2, %v921_v3  ;;  %v872_v8 = vld [vmem:[%s3999_s26 + $0x610] sm:$0xff] }
  0x9f   : > { %2216 = vmatprep.subr.bf16.mxu0 %v3248_v11  ;;  %v3216_v21 = vcombine.high %v838_v14, %v854_v16  ;;  %2257 = vmatprep.subr.bf16.mxu1 %v3250_v15  ;;  %v3218_v22 = vcombine.high %v839_v17, %v855_v18  ;;  %v806_v23 = vld [vmem:[%s3999_s26 + $0x400] sm:$0xff]  ;;  %v807_v25 = vld [vmem:[%s3999_s26 + $0x408] sm:$0xff]  ;;  %v3215_v27 = vcombine.low %v838_v14, %v854_v16  ;;  %v888_v9 = vld [vmem:[%s3999_s26 + $0x690] sm:$0xff] }
  0xa0   : > { %v822_v24 = vld [vmem:[%s3999_s26 + $0x480] sm:$0xff]  ;;  %v823_v26 = vld [vmem:[%s3999_s26 + $0x488] sm:$0xff]  ;;  %v3217_v28 = vcombine.low %v839_v17, %v855_v18  ;;  %v873_v10 = vld [vmem:[%s3999_s26 + $0x618] sm:$0xff]  ;;  %v3283_v13 = vcombine.low %v904_v63, %v920_v1  ;;  %v3285_v14 = vcombine.low %v905_v2, %v921_v3  ;;  %v3252_v15 = vcombine.high %v872_v8, %v888_v9 }
  0xa1   : > { %v3184_v29 = vcombine.high %v806_v23, %v822_v24  ;;  %v3186_v30 = vcombine.high %v807_v25, %v823_v26  ;;  %v774_v31 = vld [vmem:[%s3999_s26 + $0x300] sm:$0xff]  ;;  %v775_v33 = vld [vmem:[%s3999_s26 + $0x308] sm:$0xff]  ;;  %v3183_v35 = vcombine.low %v806_v23, %v822_v24  ;;  %v3185_v36 = vcombine.low %v807_v25, %v823_v26  ;;  %v889_v11 = vld [vmem:[%s3999_s26 + $0x698] sm:$0xff] }
  0xa2   : > { %2217 = vmatpush1.bf16.msra.mxu0 %v3247_v19  ;;  %2258 = vmatpush1.bf16.msra.mxu1 %v3249_v20  ;;  %v790_v32 = vld [vmem:[%s3999_s26 + $0x380] sm:$0xff]  ;;  %v791_v34 = vld [vmem:[%s3999_s26 + $0x388] sm:$0xff]  ;;  %v3254_v16 = vcombine.high %v873_v10, %v889_v11  ;;  %v840_v17 = vld [vmem:[%s3999_s26 + $0x510] sm:$0xff] }
  0xa3   : > { %2218 = vmatprep.subr.bf16.mxu0 %v3216_v21  ;;  %2259 = vmatprep.subr.bf16.mxu1 %v3218_v22  ;;  %v3152_v37 = vcombine.high %v774_v31, %v790_v32  ;;  %v3154_v38 = vcombine.high %v775_v33, %v791_v34  ;;  %v742_v39 = vld [vmem:[%s3999_s26 + $0x200] sm:$0xff]  ;;  %v743_v41 = vld [vmem:[%s3999_s26 + $0x208] sm:$0xff]  ;;  %v3151_v43 = vcombine.low %v774_v31, %v790_v32  ;;  %v856_v18 = vld [vmem:[%s3999_s26 + $0x590] sm:$0xff] }
  0xa4   : > { %v758_v40 = vld [vmem:[%s3999_s26 + $0x280] sm:$0xff]  ;;  %v759_v42 = vld [vmem:[%s3999_s26 + $0x288] sm:$0xff]  ;;  %v3153_v44 = vcombine.low %v775_v33, %v791_v34  ;;  %v841_v19 = vld [vmem:[%s3999_s26 + $0x518] sm:$0xff]  ;;  %v3251_v21 = vcombine.low %v872_v8, %v888_v9  ;;  %v3253_v22 = vcombine.low %v873_v10, %v889_v11  ;;  %v3220_v23 = vcombine.high %v840_v17, %v856_v18 }
  0xa5   : > { %v3120_v45 = vcombine.high %v742_v39, %v758_v40  ;;  %v3122_v46 = vcombine.high %v743_v41, %v759_v42  ;;  %v710_v47 = vld [vmem:[%s3999_s26 + $0x100] sm:$0xff]  ;;  %v711_v49 = vld [vmem:[%s3999_s26 + $0x108] sm:$0xff]  ;;  %v3119_v51 = vcombine.low %v742_v39, %v758_v40  ;;  %v3121_v52 = vcombine.low %v743_v41, %v759_v42  ;;  %v857_v20 = vld [vmem:[%s3999_s26 + $0x598] sm:$0xff] }
  0xa6   : > { %2219 = vmatpush1.bf16.msra.mxu0 %v3215_v27  ;;  %2260 = vmatpush1.bf16.msra.mxu1 %v3217_v28  ;;  %v726_v48 = vld [vmem:[%s3999_s26 + $0x180] sm:$0xff]  ;;  %v727_v50 = vld [vmem:[%s3999_s26 + $0x188] sm:$0xff]  ;;  %v3222_v24 = vcombine.high %v841_v19, %v857_v20  ;;  %v808_v25 = vld [vmem:[%s3999_s26 + $0x410] sm:$0xff] }
  0xa7   : > { %2220 = vmatprep.subr.bf16.mxu0 %v3184_v29  ;;  %2261 = vmatprep.subr.bf16.mxu1 %v3186_v30  ;;  %v3088_v53 = vcombine.high %v710_v47, %v726_v48  ;;  %v3090_v54 = vcombine.high %v711_v49, %v727_v50  ;;  %v678_v55 = vld [vmem:[%s3999_s26] sm:$0xff]  ;;  %v679_v57 = vld [vmem:[%s3999_s26 + $0x8] sm:$0xff]  ;;  %v3087_v59 = vcombine.low %v710_v47, %v726_v48  ;;  %v824_v26 = vld [vmem:[%s3999_s26 + $0x490] sm:$0xff] }
  0xa8   : > { %v694_v56 = vld [vmem:[%s3999_s26 + $0x80] sm:$0xff]  ;;  %v695_v58 = vld [vmem:[%s3999_s26 + $0x88] sm:$0xff]  ;;  %v3089_v60 = vcombine.low %v711_v49, %v727_v50  ;;  %v809_v27 = vld [vmem:[%s3999_s26 + $0x418] sm:$0xff]  ;;  %v3219_v29 = vcombine.low %v840_v17, %v856_v18  ;;  %v3221_v30 = vcombine.low %v841_v19, %v857_v20  ;;  %v3188_v31 = vcombine.high %v808_v25, %v824_v26 }
  0xa9   : > { %v3056_v61 = vcombine.high %v678_v55, %v694_v56  ;;  %v3058_v62 = vcombine.high %v679_v57, %v695_v58  ;;  %v3055_v4 = vcombine.low %v678_v55, %v694_v56  ;;  %v3057_v5 = vcombine.low %v679_v57, %v695_v58  ;;  %v4044_v12 = vld [vmem:[%s4336_s0] sm:$0x3]  ;;  %v825_v28 = vld [vmem:[%s3999_s26 + $0x498] sm:$0xff]  ;;  %v776_v33 = vld [vmem:[%s3999_s26 + $0x310] sm:$0xff] }
  0xaa   : > { %2221 = vmatpush1.bf16.msra.mxu0 %v3183_v35  ;;  %2262 = vmatpush1.bf16.msra.mxu1 %v3185_v36  ;;  %v3190_v32 = vcombine.high %v809_v27, %v825_v28  ;;  %v792_v34 = vld [vmem:[%s3999_s26 + $0x390] sm:$0xff]  ;;  %v777_v35 = vld [vmem:[%s3999_s26 + $0x318] sm:$0xff]  ;;  %v906_v2 = vld [vmem:[%s3999_s26 + $0x720] sm:$0xff] }
  0xab   : > { %2222 = vmatprep.subr.bf16.mxu0 %v3152_v37  ;;  %2263 = vmatprep.subr.bf16.mxu1 %v3154_v38  ;;  %v793_v36 = vld [vmem:[%s3999_s26 + $0x398] sm:$0xff]  ;;  %v3187_v37 = vcombine.low %v808_v25, %v824_v26  ;;  %v3189_v38 = vcombine.low %v809_v27, %v825_v28  ;;  %v3156_v39 = vcombine.high %v776_v33, %v792_v34  ;;  %v744_v41 = vld [vmem:[%s3999_s26 + $0x210] sm:$0xff]  ;;  %v922_v3 = vld [vmem:[%s3999_s26 + $0x7a0] sm:$0xff] }
  0xac   : > { %v3158_v40 = vcombine.high %v777_v35, %v793_v36  ;;  %v760_v42 = vld [vmem:[%s3999_s26 + $0x290] sm:$0xff]  ;;  %v3288_v8 = vcombine.high %v906_v2, %v922_v3  ;;  %v874_v10 = vld [vmem:[%s3999_s26 + $0x620] sm:$0xff] }
  0xad   : > { %v3124_v47 = vcombine.high %v744_v41, %v760_v42  ;;  %v712_v49 = vld [vmem:[%s3999_s26 + $0x110] sm:$0xff]  ;;  %v890_v11 = vld [vmem:[%s3999_s26 + $0x6a0] sm:$0xff] }
  0xae   : > { %2223 = vmatpush1.bf16.msra.mxu0 %v3151_v43  ;;  %2264 = vmatpush1.bf16.msra.mxu1 %v3153_v44  ;;  %v745_v43 = vld [vmem:[%s3999_s26 + $0x218] sm:$0xff]  ;;  %v728_v50 = vld [vmem:[%s3999_s26 + $0x190] sm:$0xff]  ;;  %v3256_v17 = vcombine.high %v874_v10, %v890_v11  ;;  %v842_v19 = vld [vmem:[%s3999_s26 + $0x520] sm:$0xff] }
  0xaf   : > { %2224 = vmatprep.subr.bf16.mxu0 %v3120_v45  ;;  %2265 = vmatprep.subr.bf16.mxu1 %v3122_v46  ;;  %v761_v44 = vld [vmem:[%s3999_s26 + $0x298] sm:$0xff]  ;;  %v3155_v45 = vcombine.low %v776_v33, %v792_v34  ;;  %v3157_v46 = vcombine.low %v777_v35, %v793_v36  ;;  %v3092_v55 = vcombine.high %v712_v49, %v728_v50  ;;  %v680_v57 = vld [vmem:[%s3999_s26 + $0x10] sm:$0xff]  ;;  %v858_v20 = vld [vmem:[%s3999_s26 + $0x5a0] sm:$0xff] }
  0xb0   : > { %v3126_v48 = vcombine.high %v745_v43, %v761_v44  ;;  %v696_v58 = vld [vmem:[%s3999_s26 + $0x90] sm:$0xff]  ;;  %v3224_v25 = vcombine.high %v842_v19, %v858_v20  ;;  %v810_v27 = vld [vmem:[%s3999_s26 + $0x420] sm:$0xff] }
  0xb1   : > { %v3060_v63 = vcombine.high %v680_v57, %v696_v58  ;;  %v826_v28 = vld [vmem:[%s3999_s26 + $0x4a0] sm:$0xff] }
  0xb2   : > { %2225 = vmatpush1.bf16.msra.mxu0 %v3119_v51  ;;  %2266 = vmatpush1.bf16.msra.mxu1 %v3121_v52  ;;  %v713_v51 = vld [vmem:[%s3999_s26 + $0x118] sm:$0xff]  ;;  %v3192_v33 = vcombine.high %v810_v27, %v826_v28  ;;  %v778_v35 = vld [vmem:[%s3999_s26 + $0x320] sm:$0xff] }
  0xb3   : > { %2226 = vmatprep.subr.bf16.mxu0 %v3088_v53  ;;  %2267 = vmatprep.subr.bf16.mxu1 %v3090_v54  ;;  %v729_v52 = vld [vmem:[%s3999_s26 + $0x198] sm:$0xff]  ;;  %v3123_v53 = vcombine.low %v744_v41, %v760_v42  ;;  %v3125_v54 = vcombine.low %v745_v43, %v761_v44  ;;  %v794_v36 = vld [vmem:[%s3999_s26 + $0x3a0] sm:$0xff] }
  0xb4   : > { %v3094_v56 = vcombine.high %v713_v51, %v729_v52  ;;  %v3160_v41 = vcombine.high %v778_v35, %v794_v36  ;;  %v746_v43 = vld [vmem:[%s3999_s26 + $0x220] sm:$0xff] }
  0xb5   : > { %v762_v44 = vld [vmem:[%s3999_s26 + $0x2a0] sm:$0xff] }
  0xb6   : > { %2227 = vmatpush1.bf16.msra.mxu0 %v3087_v59  ;;  %2268 = vmatpush1.bf16.msra.mxu1 %v3089_v60  ;;  %v681_v59 = vld [vmem:[%s3999_s26 + $0x18] sm:$0xff] }
  0xb7   : > { %2228 = vmatprep.subr.bf16.mxu0 %v3056_v61  ;;  %2269 = vmatprep.subr.bf16.mxu1 %v3058_v62  ;;  %v697_v60 = vld [vmem:[%s3999_s26 + $0x98] sm:$0xff]  ;;  %v3091_v61 = vcombine.low %v712_v49, %v728_v50  ;;  %v3093_v62 = vcombine.low %v713_v51, %v729_v52  ;;  %v3128_v49 = vcombine.high %v746_v43, %v762_v44  ;;  %v714_v51 = vld [vmem:[%s3999_s26 + $0x120] sm:$0xff] }
  0xb8   : > { %v3062_v1 = vcombine.high %v681_v59, %v697_v60  ;;  %v730_v52 = vld [vmem:[%s3999_s26 + $0x1a0] sm:$0xff] }
  0xba   : > { %2229 = vmatpush1.bf16.msra.mxu0 %v3055_v4  ;;  %2270 = vmatpush1.bf16.msra.mxu1 %v3057_v5  ;;  %v907_v4 = vld [vmem:[%s3999_s26 + $0x728] sm:$0xff] }
  0xbb   : > { %2296 = vmatprep.subr.bf16.mxu0 %v3284_v6  ;;  %2337 = vmatprep.subr.bf16.mxu1 %v3286_v7  ;;  %v923_v5 = vld [vmem:[%s3999_s26 + $0x7a8] sm:$0xff]  ;;  %v3059_v6 = vcombine.low %v680_v57, %v696_v58  ;;  %v3061_v7 = vcombine.low %v681_v59, %v697_v60  ;;  %v3096_v57 = vcombine.high %v714_v51, %v730_v52  ;;  %v682_v59 = vld [vmem:[%s3999_s26 + $0x20] sm:$0xff] }
  0xbc   : > { %v3290_v9 = vcombine.high %v907_v4, %v923_v5  ;;  %v698_v60 = vld [vmem:[%s3999_s26 + $0xa0] sm:$0xff] }
  0xbd   : > { %2247 = vmatmul.mubr.bf16.vlgmr.msra.gmra.mxu0 %v4044_v12  ;;  %2288 = vmatmul.mubr.bf16.vlgmr.msra.gmra.mxu1 %v4044_v12 }
  0xbe   : > { %2297 = vmatpush1.bf16.msra.mxu0 %v3283_v13  ;;  %2338 = vmatpush1.bf16.msra.mxu1 %v3285_v14  ;;  %v875_v13 = vld [vmem:[%s3999_s26 + $0x628] sm:$0xff] }
  0xbf   : > { %2298 = vmatprep.subr.bf16.mxu0 %v3252_v15  ;;  %2339 = vmatprep.subr.bf16.mxu1 %v3254_v16  ;;  %v891_v14 = vld [vmem:[%s3999_s26 + $0x6a8] sm:$0xff]  ;;  %v3287_v15 = vcombine.low %v906_v2, %v922_v3  ;;  %v3289_v16 = vcombine.low %v907_v4, %v923_v5  ;;  %v3064_v2 = vcombine.high %v682_v59, %v698_v60  ;;  %v908_v4 = vld [vmem:[%s3999_s26 + $0x730] sm:$0xff] }
  0xc0   : > { %2328 = vmatprep.mubr.bf16.mxu0 %v3428_v0  ;;  %2369 = vmatprep.mubr.bf16.mxu1 %v3428_v0  ;;  %v3258_v18 = vcombine.high %v875_v13, %v891_v14  ;;  %v924_v5 = vld [vmem:[%s3999_s26 + $0x7b0] sm:$0xff] }
  0xc2   : > { %2299 = vmatpush1.bf16.msra.mxu0 %v3251_v21  ;;  %2340 = vmatpush1.bf16.msra.mxu1 %v3253_v22  ;;  %v843_v21 = vld [vmem:[%s3999_s26 + $0x528] sm:$0xff] }
  0xc3   : > { %2300 = vmatprep.subr.bf16.mxu0 %v3220_v23  ;;  %2341 = vmatprep.subr.bf16.mxu1 %v3222_v24  ;;  %v859_v22 = vld [vmem:[%s3999_s26 + $0x5a8] sm:$0xff]  ;;  %v3255_v23 = vcombine.low %v874_v10, %v890_v11  ;;  %v3257_v24 = vcombine.low %v875_v13, %v891_v14  ;;  %v3292_v10 = vcombine.high %v908_v4, %v924_v5  ;;  %v876_v13 = vld [vmem:[%s3999_s26 + $0x630] sm:$0xff] }
  0xc4   : > { %v3226_v26 = vcombine.high %v843_v21, %v859_v22  ;;  %v892_v14 = vld [vmem:[%s3999_s26 + $0x6b0] sm:$0xff] }
  0xc6   : > { %2301 = vmatpush1.bf16.msra.mxu0 %v3219_v29  ;;  %2342 = vmatpush1.bf16.msra.mxu1 %v3221_v30  ;;  %v811_v29 = vld [vmem:[%s3999_s26 + $0x428] sm:$0xff] }
  0xc7   : > { %2302 = vmatprep.subr.bf16.mxu0 %v3188_v31  ;;  %2343 = vmatprep.subr.bf16.mxu1 %v3190_v32  ;;  %v827_v30 = vld [vmem:[%s3999_s26 + $0x4a8] sm:$0xff]  ;;  %v3223_v31 = vcombine.low %v842_v19, %v858_v20  ;;  %v3225_v32 = vcombine.low %v843_v21, %v859_v22  ;;  %v3260_v19 = vcombine.high %v876_v13, %v892_v14  ;;  %v844_v21 = vld [vmem:[%s3999_s26 + $0x530] sm:$0xff] }
  0xc8   : > { %v3194_v34 = vcombine.high %v811_v29, %v827_v30  ;;  %v860_v22 = vld [vmem:[%s3999_s26 + $0x5b0] sm:$0xff] }
  0xca   : > { %2303 = vmatpush1.bf16.msra.mxu0 %v3187_v37  ;;  %2344 = vmatpush1.bf16.msra.mxu1 %v3189_v38  ;;  %v779_v37 = vld [vmem:[%s3999_s26 + $0x328] sm:$0xff] }
  0xcb   : > { %2304 = vmatprep.subr.bf16.mxu0 %v3156_v39  ;;  %2345 = vmatprep.subr.bf16.mxu1 %v3158_v40  ;;  %v795_v38 = vld [vmem:[%s3999_s26 + $0x3a8] sm:$0xff]  ;;  %v3191_v39 = vcombine.low %v810_v27, %v826_v28  ;;  %v3193_v40 = vcombine.low %v811_v29, %v827_v30  ;;  %v3228_v27 = vcombine.high %v844_v21, %v860_v22  ;;  %v812_v29 = vld [vmem:[%s3999_s26 + $0x430] sm:$0xff] }
  0xcc   : > { %v3162_v42 = vcombine.high %v779_v37, %v795_v38  ;;  %v828_v30 = vld [vmem:[%s3999_s26 + $0x4b0] sm:$0xff] }
  0xce   : > { %2305 = vmatpush1.bf16.msra.mxu0 %v3155_v45  ;;  %2346 = vmatpush1.bf16.msra.mxu1 %v3157_v46  ;;  %v747_v45 = vld [vmem:[%s3999_s26 + $0x228] sm:$0xff] }
  0xcf   : > { %2306 = vmatprep.subr.bf16.mxu0 %v3124_v47  ;;  %2347 = vmatprep.subr.bf16.mxu1 %v3126_v48  ;;  %v763_v46 = vld [vmem:[%s3999_s26 + $0x2a8] sm:$0xff]  ;;  %v3159_v47 = vcombine.low %v778_v35, %v794_v36  ;;  %v3161_v48 = vcombine.low %v779_v37, %v795_v38  ;;  %v3196_v35 = vcombine.high %v812_v29, %v828_v30  ;;  %v780_v37 = vld [vmem:[%s3999_s26 + $0x330] sm:$0xff] }
  0xd0   : > { %v3130_v50 = vcombine.high %v747_v45, %v763_v46  ;;  %v796_v38 = vld [vmem:[%s3999_s26 + $0x3b0] sm:$0xff] }
  0xd2   : > { %2307 = vmatpush1.bf16.msra.mxu0 %v3123_v53  ;;  %2348 = vmatpush1.bf16.msra.mxu1 %v3125_v54  ;;  %v715_v53 = vld [vmem:[%s3999_s26 + $0x128] sm:$0xff] }
  0xd3   : > { %2308 = vmatprep.subr.bf16.mxu0 %v3092_v55  ;;  %2349 = vmatprep.subr.bf16.mxu1 %v3094_v56  ;;  %v731_v54 = vld [vmem:[%s3999_s26 + $0x1a8] sm:$0xff]  ;;  %v3127_v55 = vcombine.low %v746_v43, %v762_v44  ;;  %v3129_v56 = vcombine.low %v747_v45, %v763_v46  ;;  %v3164_v43 = vcombine.high %v780_v37, %v796_v38  ;;  %v748_v45 = vld [vmem:[%s3999_s26 + $0x230] sm:$0xff] }
  0xd4   : > { %v3098_v58 = vcombine.high %v715_v53, %v731_v54  ;;  %v764_v46 = vld [vmem:[%s3999_s26 + $0x2b0] sm:$0xff] }
  0xd6   : > { %2309 = vmatpush1.bf16.msra.mxu0 %v3091_v61  ;;  %2350 = vmatpush1.bf16.msra.mxu1 %v3093_v62  ;;  %v683_v61 = vld [vmem:[%s3999_s26 + $0x28] sm:$0xff] }
  0xd7   : > { %2310 = vmatprep.subr.bf16.mxu0 %v3060_v63  ;;  %2351 = vmatprep.subr.bf16.mxu1 %v3062_v1  ;;  %v699_v62 = vld [vmem:[%s3999_s26 + $0xa8] sm:$0xff]  ;;  %v3095_v63 = vcombine.low %v714_v51, %v730_v52  ;;  %v3097_v1 = vcombine.low %v715_v53, %v731_v54  ;;  %v3132_v51 = vcombine.high %v748_v45, %v764_v46  ;;  %v716_v53 = vld [vmem:[%s3999_s26 + $0x130] sm:$0xff] }
  0xd8   : > { %v3066_v3 = vcombine.high %v683_v61, %v699_v62  ;;  %v732_v54 = vld [vmem:[%s3999_s26 + $0x1b0] sm:$0xff] }
  0xda   : > { %2311 = vmatpush1.bf16.msra.mxu0 %v3059_v6  ;;  %2352 = vmatpush1.bf16.msra.mxu1 %v3061_v7  ;;  %v909_v6 = vld [vmem:[%s3999_s26 + $0x738] sm:$0xff] }
  0xdb   : > { %2378 = vmatprep.subr.bf16.mxu0 %v3288_v8  ;;  %2419 = vmatprep.subr.bf16.mxu1 %v3290_v9  ;;  %v925_v7 = vld [vmem:[%s3999_s26 + $0x7b8] sm:$0xff]  ;;  %v3063_v8 = vcombine.low %v682_v59, %v698_v60  ;;  %v3065_v9 = vcombine.low %v683_v61, %v699_v62  ;;  %v3100_v59 = vcombine.high %v716_v53, %v732_v54  ;;  %v684_v61 = vld [vmem:[%s3999_s26 + $0x30] sm:$0xff] }
  0xdc   : > { %v3294_v11 = vcombine.high %v909_v6, %v925_v7  ;;  %v700_v62 = vld [vmem:[%s3999_s26 + $0xb0] sm:$0xff] }
  0xdd   : > { %2329 = vmatmul.mubr.bf16.vlgmr.msra.gmra.mxu0 %v4044_v12  ;;  %2370 = vmatmul.mubr.bf16.vlgmr.msra.gmra.mxu1 %v4044_v12 }
  0xde   : > { %2379 = vmatpush1.bf16.msra.mxu0 %v3287_v15  ;;  %2420 = vmatpush1.bf16.msra.mxu1 %v3289_v16  ;;  %v877_v15 = vld [vmem:[%s3999_s26 + $0x638] sm:$0xff] }
  0xdf   : > { %2380 = vmatprep.subr.bf16.mxu0 %v3256_v17  ;;  %2421 = vmatprep.subr.bf16.mxu1 %v3258_v18  ;;  %v893_v16 = vld [vmem:[%s3999_s26 + $0x6b8] sm:$0xff]  ;;  %v3291_v17 = vcombine.low %v908_v4, %v924_v5  ;;  %v3293_v18 = vcombine.low %v909_v6, %v925_v7  ;;  %v3068_v4 = vcombine.high %v684_v61, %v700_v62  ;;  %v910_v6 = vld [vmem:[%s3999_s26 + $0x740] sm:$0xff] }
  0xe0   : > { %2410 = vmatprep.mubr.bf16.mxu0 %v3428_v0  ;;  %2451 = vmatprep.mubr.bf16.mxu1 %v3428_v0  ;;  %v3262_v20 = vcombine.high %v877_v15, %v893_v16  ;;  %v926_v7 = vld [vmem:[%s3999_s26 + $0x7c0] sm:$0xff] }
  0xe2   : > { %2381 = vmatpush1.bf16.msra.mxu0 %v3255_v23  ;;  %2422 = vmatpush1.bf16.msra.mxu1 %v3257_v24  ;;  %v845_v23 = vld [vmem:[%s3999_s26 + $0x538] sm:$0xff] }
  0xe3   : > { %2382 = vmatprep.subr.bf16.mxu0 %v3224_v25  ;;  %2423 = vmatprep.subr.bf16.mxu1 %v3226_v26  ;;  %v861_v24 = vld [vmem:[%s3999_s26 + $0x5b8] sm:$0xff]  ;;  %v3259_v25 = vcombine.low %v876_v13, %v892_v14  ;;  %v3261_v26 = vcombine.low %v877_v15, %v893_v16  ;;  %v3296_v13 = vcombine.high %v910_v6, %v926_v7  ;;  %v878_v15 = vld [vmem:[%s3999_s26 + $0x640] sm:$0xff] }
  0xe4   : > { %v3230_v28 = vcombine.high %v845_v23, %v861_v24  ;;  %v894_v16 = vld [vmem:[%s3999_s26 + $0x6c0] sm:$0xff] }
  0xe6   : > { %2383 = vmatpush1.bf16.msra.mxu0 %v3223_v31  ;;  %2424 = vmatpush1.bf16.msra.mxu1 %v3225_v32  ;;  %v813_v31 = vld [vmem:[%s3999_s26 + $0x438] sm:$0xff] }
  0xe7   : > { %2384 = vmatprep.subr.bf16.mxu0 %v3192_v33  ;;  %2425 = vmatprep.subr.bf16.mxu1 %v3194_v34  ;;  %v829_v32 = vld [vmem:[%s3999_s26 + $0x4b8] sm:$0xff]  ;;  %v3227_v33 = vcombine.low %v844_v21, %v860_v22  ;;  %v3229_v34 = vcombine.low %v845_v23, %v861_v24  ;;  %v3264_v21 = vcombine.high %v878_v15, %v894_v16  ;;  %v846_v23 = vld [vmem:[%s3999_s26 + $0x540] sm:$0xff] }
  0xe8   : > { %v3198_v36 = vcombine.high %v813_v31, %v829_v32  ;;  %v862_v24 = vld [vmem:[%s3999_s26 + $0x5c0] sm:$0xff] }
  0xea   : > { %2385 = vmatpush1.bf16.msra.mxu0 %v3191_v39  ;;  %2426 = vmatpush1.bf16.msra.mxu1 %v3193_v40  ;;  %v781_v39 = vld [vmem:[%s3999_s26 + $0x338] sm:$0xff] }
  0xeb   : > { %2386 = vmatprep.subr.bf16.mxu0 %v3160_v41  ;;  %2427 = vmatprep.subr.bf16.mxu1 %v3162_v42  ;;  %v797_v40 = vld [vmem:[%s3999_s26 + $0x3b8] sm:$0xff]  ;;  %v3195_v41 = vcombine.low %v812_v29, %v828_v30  ;;  %v3197_v42 = vcombine.low %v813_v31, %v829_v32  ;;  %v3232_v29 = vcombine.high %v846_v23, %v862_v24  ;;  %v814_v31 = vld [vmem:[%s3999_s26 + $0x440] sm:$0xff] }
  0xec   : > { %v3166_v44 = vcombine.high %v781_v39, %v797_v40  ;;  %v830_v32 = vld [vmem:[%s3999_s26 + $0x4c0] sm:$0xff] }
  0xee   : > { %2387 = vmatpush1.bf16.msra.mxu0 %v3159_v47  ;;  %2428 = vmatpush1.bf16.msra.mxu1 %v3161_v48  ;;  %v749_v47 = vld [vmem:[%s3999_s26 + $0x238] sm:$0xff] }
  0xef   : > { %2388 = vmatprep.subr.bf16.mxu0 %v3128_v49  ;;  %2429 = vmatprep.subr.bf16.mxu1 %v3130_v50  ;;  %v765_v48 = vld [vmem:[%s3999_s26 + $0x2b8] sm:$0xff]  ;;  %v3163_v49 = vcombine.low %v780_v37, %v796_v38  ;;  %v3165_v50 = vcombine.low %v781_v39, %v797_v40  ;;  %v3200_v37 = vcombine.high %v814_v31, %v830_v32  ;;  %v782_v39 = vld [vmem:[%s3999_s26 + $0x340] sm:$0xff] }
  0xf0   : > { %v3134_v52 = vcombine.high %v749_v47, %v765_v48  ;;  %v798_v40 = vld [vmem:[%s3999_s26 + $0x3c0] sm:$0xff] }
  0xf2   : > { %2389 = vmatpush1.bf16.msra.mxu0 %v3127_v55  ;;  %2430 = vmatpush1.bf16.msra.mxu1 %v3129_v56  ;;  %v717_v55 = vld [vmem:[%s3999_s26 + $0x138] sm:$0xff] }
  0xf3   : > { %2390 = vmatprep.subr.bf16.mxu0 %v3096_v57  ;;  %2431 = vmatprep.subr.bf16.mxu1 %v3098_v58  ;;  %v733_v56 = vld [vmem:[%s3999_s26 + $0x1b8] sm:$0xff]  ;;  %v3131_v57 = vcombine.low %v748_v45, %v764_v46  ;;  %v3133_v58 = vcombine.low %v749_v47, %v765_v48  ;;  %v3168_v45 = vcombine.high %v782_v39, %v798_v40  ;;  %v750_v47 = vld [vmem:[%s3999_s26 + $0x240] sm:$0xff] }
  0xf4   : > { %v3102_v60 = vcombine.high %v717_v55, %v733_v56  ;;  %v766_v48 = vld [vmem:[%s3999_s26 + $0x2c0] sm:$0xff] }
  0xf6   : > { %2391 = vmatpush1.bf16.msra.mxu0 %v3095_v63  ;;  %2432 = vmatpush1.bf16.msra.mxu1 %v3097_v1  ;;  %v685_v63 = vld [vmem:[%s3999_s26 + $0x38] sm:$0xff] }
  0xf7   : > { %2392 = vmatprep.subr.bf16.mxu0 %v3064_v2  ;;  %2433 = vmatprep.subr.bf16.mxu1 %v3066_v3  ;;  %v701_v1 = vld [vmem:[%s3999_s26 + $0xb8] sm:$0xff]  ;;  %v3099_v2 = vcombine.low %v716_v53, %v732_v54  ;;  %v3101_v3 = vcombine.low %v717_v55, %v733_v56  ;;  %v3136_v53 = vcombine.high %v750_v47, %v766_v48  ;;  %v718_v55 = vld [vmem:[%s3999_s26 + $0x140] sm:$0xff] }
  0xf8   : > { %v3070_v5 = vcombine.high %v685_v63, %v701_v1  ;;  %v734_v56 = vld [vmem:[%s3999_s26 + $0x1c0] sm:$0xff] }
  0xfa   : > { %2393 = vmatpush1.bf16.msra.mxu0 %v3063_v8  ;;  %2434 = vmatpush1.bf16.msra.mxu1 %v3065_v9  ;;  %v911_v8 = vld [vmem:[%s3999_s26 + $0x748] sm:$0xff] }
  0xfb   : > { %2460 = vmatprep.subr.bf16.mxu0 %v3292_v10  ;;  %2501 = vmatprep.subr.bf16.mxu1 %v3294_v11  ;;  %v927_v9 = vld [vmem:[%s3999_s26 + $0x7c8] sm:$0xff]  ;;  %v3067_v10 = vcombine.low %v684_v61, %v700_v62  ;;  %v3069_v11 = vcombine.low %v685_v63, %v701_v1  ;;  %v3104_v61 = vcombine.high %v718_v55, %v734_v56  ;;  %v686_v63 = vld [vmem:[%s3999_s26 + $0x40] sm:$0xff] }
  0xfc   : > { %v3298_v14 = vcombine.high %v911_v8, %v927_v9  ;;  %v702_v1 = vld [vmem:[%s3999_s26 + $0xc0] sm:$0xff] }
  0xfd   : > { %2411 = vmatmul.mubr.bf16.vlgmr.msra.gmra.mxu0 %v4044_v12  ;;  %2452 = vmatmul.mubr.bf16.vlgmr.msra.gmra.mxu1 %v4044_v12 }
  0xfe   : > { %2461 = vmatpush1.bf16.msra.mxu0 %v3291_v17  ;;  %2502 = vmatpush1.bf16.msra.mxu1 %v3293_v18  ;;  %v879_v17 = vld [vmem:[%s3999_s26 + $0x648] sm:$0xff] }
  0xff   : > { %2462 = vmatprep.subr.bf16.mxu0 %v3260_v19  ;;  %2503 = vmatprep.subr.bf16.mxu1 %v3262_v20  ;;  %v895_v18 = vld [vmem:[%s3999_s26 + $0x6c8] sm:$0xff]  ;;  %v3295_v19 = vcombine.low %v910_v6, %v926_v7  ;;  %v3297_v20 = vcombine.low %v911_v8, %v927_v9  ;;  %v3072_v6 = vcombine.high %v686_v63, %v702_v1  ;;  %v912_v8 = vld [vmem:[%s3999_s26 + $0x750] sm:$0xff] }
 0x100   : > { %2492 = vmatprep.mubr.bf16.mxu0 %v3428_v0  ;;  %2533 = vmatprep.mubr.bf16.mxu1 %v3428_v0  ;;  %v3266_v22 = vcombine.high %v879_v17, %v895_v18  ;;  %v928_v9 = vld [vmem:[%s3999_s26 + $0x7d0] sm:$0xff] }
 0x102   : > { %2463 = vmatpush1.bf16.msra.mxu0 %v3259_v25  ;;  %2504 = vmatpush1.bf16.msra.mxu1 %v3261_v26  ;;  %v847_v25 = vld [vmem:[%s3999_s26 + $0x548] sm:$0xff] }
 0x103   : > { %2464 = vmatprep.subr.bf16.mxu0 %v3228_v27  ;;  %2505 = vmatprep.subr.bf16.mxu1 %v3230_v28  ;;  %v863_v26 = vld [vmem:[%s3999_s26 + $0x5c8] sm:$0xff]  ;;  %v3263_v27 = vcombine.low %v878_v15, %v894_v16  ;;  %v3265_v28 = vcombine.low %v879_v17, %v895_v18  ;;  %v3300_v15 = vcombine.high %v912_v8, %v928_v9  ;;  %v880_v17 = vld [vmem:[%s3999_s26 + $0x650] sm:$0xff] }
 0x104   : > { %v3234_v30 = vcombine.high %v847_v25, %v863_v26  ;;  %v896_v18 = vld [vmem:[%s3999_s26 + $0x6d0] sm:$0xff] }
 0x106   : > { %2465 = vmatpush1.bf16.msra.mxu0 %v3227_v33  ;;  %2506 = vmatpush1.bf16.msra.mxu1 %v3229_v34  ;;  %v815_v33 = vld [vmem:[%s3999_s26 + $0x448] sm:$0xff] }
 0x107   : > { %2466 = vmatprep.subr.bf16.mxu0 %v3196_v35  ;;  %2507 = vmatprep.subr.bf16.mxu1 %v3198_v36  ;;  %v831_v34 = vld [vmem:[%s3999_s26 + $0x4c8] sm:$0xff]  ;;  %v3231_v35 = vcombine.low %v846_v23, %v862_v24  ;;  %v3233_v36 = vcombine.low %v847_v25, %v863_v26  ;;  %v3268_v23 = vcombine.high %v880_v17, %v896_v18  ;;  %v848_v25 = vld [vmem:[%s3999_s26 + $0x550] sm:$0xff] }
 0x108   : > { %v3202_v38 = vcombine.high %v815_v33, %v831_v34  ;;  %v864_v26 = vld [vmem:[%s3999_s26 + $0x5d0] sm:$0xff] }
 0x10a   : > { %2467 = vmatpush1.bf16.msra.mxu0 %v3195_v41  ;;  %2508 = vmatpush1.bf16.msra.mxu1 %v3197_v42  ;;  %v783_v41 = vld [vmem:[%s3999_s26 + $0x348] sm:$0xff] }
 0x10b   : > { %2468 = vmatprep.subr.bf16.mxu0 %v3164_v43  ;;  %2509 = vmatprep.subr.bf16.mxu1 %v3166_v44  ;;  %v799_v42 = vld [vmem:[%s3999_s26 + $0x3c8] sm:$0xff]  ;;  %v3199_v43 = vcombine.low %v814_v31, %v830_v32  ;;  %v3201_v44 = vcombine.low %v815_v33, %v831_v34  ;;  %v3236_v31 = vcombine.high %v848_v25, %v864_v26  ;;  %v816_v33 = vld [vmem:[%s3999_s26 + $0x450] sm:$0xff] }
 0x10c   : > { %v3170_v46 = vcombine.high %v783_v41, %v799_v42  ;;  %v832_v34 = vld [vmem:[%s3999_s26 + $0x4d0] sm:$0xff] }
 0x10e   : > { %2469 = vmatpush1.bf16.msra.mxu0 %v3163_v49  ;;  %2510 = vmatpush1.bf16.msra.mxu1 %v3165_v50  ;;  %v751_v49 = vld [vmem:[%s3999_s26 + $0x248] sm:$0xff] }
 0x10f   : > { %2470 = vmatprep.subr.bf16.mxu0 %v3132_v51  ;;  %2511 = vmatprep.subr.bf16.mxu1 %v3134_v52  ;;  %v767_v50 = vld [vmem:[%s3999_s26 + $0x2c8] sm:$0xff]  ;;  %v3167_v51 = vcombine.low %v782_v39, %v798_v40  ;;  %v3169_v52 = vcombine.low %v783_v41, %v799_v42  ;;  %v3204_v39 = vcombine.high %v816_v33, %v832_v34  ;;  %v784_v41 = vld [vmem:[%s3999_s26 + $0x350] sm:$0xff] }
 0x110   : > { %v3138_v54 = vcombine.high %v751_v49, %v767_v50  ;;  %v800_v42 = vld [vmem:[%s3999_s26 + $0x3d0] sm:$0xff] }
 0x112   : > { %2471 = vmatpush1.bf16.msra.mxu0 %v3131_v57  ;;  %2512 = vmatpush1.bf16.msra.mxu1 %v3133_v58  ;;  %v719_v57 = vld [vmem:[%s3999_s26 + $0x148] sm:$0xff] }
 0x113   : > { %2472 = vmatprep.subr.bf16.mxu0 %v3100_v59  ;;  %2513 = vmatprep.subr.bf16.mxu1 %v3102_v60  ;;  %v735_v58 = vld [vmem:[%s3999_s26 + $0x1c8] sm:$0xff]  ;;  %v3135_v59 = vcombine.low %v750_v47, %v766_v48  ;;  %v3137_v60 = vcombine.low %v751_v49, %v767_v50  ;;  %v3172_v47 = vcombine.high %v784_v41, %v800_v42  ;;  %v752_v49 = vld [vmem:[%s3999_s26 + $0x250] sm:$0xff] }
 0x114   : > { %v3106_v62 = vcombine.high %v719_v57, %v735_v58  ;;  %v768_v50 = vld [vmem:[%s3999_s26 + $0x2d0] sm:$0xff] }
 0x116   : > { %2473 = vmatpush1.bf16.msra.mxu0 %v3099_v2  ;;  %2514 = vmatpush1.bf16.msra.mxu1 %v3101_v3  ;;  %v687_v2 = vld [vmem:[%s3999_s26 + $0x48] sm:$0xff] }
 0x117   : > { %2474 = vmatprep.subr.bf16.mxu0 %v3068_v4  ;;  %2515 = vmatprep.subr.bf16.mxu1 %v3070_v5  ;;  %v703_v3 = vld [vmem:[%s3999_s26 + $0xc8] sm:$0xff]  ;;  %v3103_v4 = vcombine.low %v718_v55, %v734_v56  ;;  %v3105_v5 = vcombine.low %v719_v57, %v735_v58  ;;  %v3140_v55 = vcombine.high %v752_v49, %v768_v50  ;;  %v720_v57 = vld [vmem:[%s3999_s26 + $0x150] sm:$0xff] }
 0x118   : > { %v3074_v7 = vcombine.high %v687_v2, %v703_v3  ;;  %v736_v58 = vld [vmem:[%s3999_s26 + $0x1d0] sm:$0xff] }
 0x11a   : > { %2475 = vmatpush1.bf16.msra.mxu0 %v3067_v10  ;;  %2516 = vmatpush1.bf16.msra.mxu1 %v3069_v11  ;;  %v913_v10 = vld [vmem:[%s3999_s26 + $0x758] sm:$0xff] }
 0x11b   : > { %2542 = vmatprep.subr.bf16.mxu0 %v3296_v13  ;;  %2583 = vmatprep.subr.bf16.mxu1 %v3298_v14  ;;  %v929_v11 = vld [vmem:[%s3999_s26 + $0x7d8] sm:$0xff]  ;;  %v3071_v13 = vcombine.low %v686_v63, %v702_v1  ;;  %v3073_v14 = vcombine.low %v687_v2, %v703_v3  ;;  %v3108_v63 = vcombine.high %v720_v57, %v736_v58  ;;  %v688_v2 = vld [vmem:[%s3999_s26 + $0x50] sm:$0xff] }
 0x11c   : > { %v3302_v16 = vcombine.high %v913_v10, %v929_v11  ;;  %v704_v3 = vld [vmem:[%s3999_s26 + $0xd0] sm:$0xff] }
 0x11d   : > { %2493 = vmatmul.mubr.bf16.vlgmr.msra.gmra.mxu0 %v4044_v12  ;;  %2534 = vmatmul.mubr.bf16.vlgmr.msra.gmra.mxu1 %v4044_v12 }
 0x11e   : > { %2543 = vmatpush1.bf16.msra.mxu0 %v3295_v19  ;;  %2584 = vmatpush1.bf16.msra.mxu1 %v3297_v20  ;;  %v881_v19 = vld [vmem:[%s3999_s26 + $0x658] sm:$0xff] }
 0x11f   : > { %2544 = vmatprep.subr.bf16.mxu0 %v3264_v21  ;;  %2585 = vmatprep.subr.bf16.mxu1 %v3266_v22  ;;  %v897_v20 = vld [vmem:[%s3999_s26 + $0x6d8] sm:$0xff]  ;;  %v3299_v21 = vcombine.low %v912_v8, %v928_v9  ;;  %v3301_v22 = vcombine.low %v913_v10, %v929_v11  ;;  %v3076_v8 = vcombine.high %v688_v2, %v704_v3  ;;  %v914_v10 = vld [vmem:[%s3999_s26 + $0x760] sm:$0xff] }
 0x120   : > { %2574 = vmatprep.mubr.bf16.mxu0 %v3428_v0  ;;  %2615 = vmatprep.mubr.bf16.mxu1 %v3428_v0  ;;  %v3270_v24 = vcombine.high %v881_v19, %v897_v20  ;;  %v930_v11 = vld [vmem:[%s3999_s26 + $0x7e0] sm:$0xff] }
 0x122   : > { %2545 = vmatpush1.bf16.msra.mxu0 %v3263_v27  ;;  %2586 = vmatpush1.bf16.msra.mxu1 %v3265_v28  ;;  %v849_v27 = vld [vmem:[%s3999_s26 + $0x558] sm:$0xff] }
 0x123   : > { %2546 = vmatprep.subr.bf16.mxu0 %v3232_v29  ;;  %2587 = vmatprep.subr.bf16.mxu1 %v3234_v30  ;;  %v865_v28 = vld [vmem:[%s3999_s26 + $0x5d8] sm:$0xff]  ;;  %v3267_v29 = vcombine.low %v880_v17, %v896_v18  ;;  %v3269_v30 = vcombine.low %v881_v19, %v897_v20  ;;  %v3304_v17 = vcombine.high %v914_v10, %v930_v11  ;;  %v882_v19 = vld [vmem:[%s3999_s26 + $0x660] sm:$0xff] }
 0x124   : > { %v3238_v32 = vcombine.high %v849_v27, %v865_v28  ;;  %v898_v20 = vld [vmem:[%s3999_s26 + $0x6e0] sm:$0xff] }
 0x126   : > { %2547 = vmatpush1.bf16.msra.mxu0 %v3231_v35  ;;  %2588 = vmatpush1.bf16.msra.mxu1 %v3233_v36  ;;  %v817_v35 = vld [vmem:[%s3999_s26 + $0x458] sm:$0xff] }
 0x127   : > { %2548 = vmatprep.subr.bf16.mxu0 %v3200_v37  ;;  %2589 = vmatprep.subr.bf16.mxu1 %v3202_v38  ;;  %v833_v36 = vld [vmem:[%s3999_s26 + $0x4d8] sm:$0xff]  ;;  %v3235_v37 = vcombine.low %v848_v25, %v864_v26  ;;  %v3237_v38 = vcombine.low %v849_v27, %v865_v28  ;;  %v3272_v25 = vcombine.high %v882_v19, %v898_v20  ;;  %v850_v27 = vld [vmem:[%s3999_s26 + $0x560] sm:$0xff] }
 0x128   : > { %v3206_v40 = vcombine.high %v817_v35, %v833_v36  ;;  %v866_v28 = vld [vmem:[%s3999_s26 + $0x5e0] sm:$0xff] }
 0x12a   : > { %2549 = vmatpush1.bf16.msra.mxu0 %v3199_v43  ;;  %2590 = vmatpush1.bf16.msra.mxu1 %v3201_v44  ;;  %v785_v43 = vld [vmem:[%s3999_s26 + $0x358] sm:$0xff] }
 0x12b   : > { %2550 = vmatprep.subr.bf16.mxu0 %v3168_v45  ;;  %2591 = vmatprep.subr.bf16.mxu1 %v3170_v46  ;;  %v801_v44 = vld [vmem:[%s3999_s26 + $0x3d8] sm:$0xff]  ;;  %v3203_v45 = vcombine.low %v816_v33, %v832_v34  ;;  %v3205_v46 = vcombine.low %v817_v35, %v833_v36  ;;  %v3240_v34 = vcombine.high %v850_v27, %v866_v28  ;;  %v818_v35 = vld [vmem:[%s3999_s26 + $0x460] sm:$0xff] }
 0x12c   : > { %v3174_v48 = vcombine.high %v785_v43, %v801_v44  ;;  %v834_v36 = vld [vmem:[%s3999_s26 + $0x4e0] sm:$0xff] }
 0x12e   : > { %2551 = vmatpush1.bf16.msra.mxu0 %v3167_v51  ;;  %2592 = vmatpush1.bf16.msra.mxu1 %v3169_v52  ;;  %v753_v51 = vld [vmem:[%s3999_s26 + $0x258] sm:$0xff] }
 0x12f   : > { %2552 = vmatprep.subr.bf16.mxu0 %v3136_v53  ;;  %2593 = vmatprep.subr.bf16.mxu1 %v3138_v54  ;;  %v769_v52 = vld [vmem:[%s3999_s26 + $0x2d8] sm:$0xff]  ;;  %v3171_v53 = vcombine.low %v784_v41, %v800_v42  ;;  %v3173_v54 = vcombine.low %v785_v43, %v801_v44  ;;  %v3208_v41 = vcombine.high %v818_v35, %v834_v36  ;;  %v786_v43 = vld [vmem:[%s3999_s26 + $0x360] sm:$0xff] }
 0x130   : > { %v3142_v56 = vcombine.high %v753_v51, %v769_v52  ;;  %v802_v44 = vld [vmem:[%s3999_s26 + $0x3e0] sm:$0xff] }
 0x132   : > { %2553 = vmatpush1.bf16.msra.mxu0 %v3135_v59  ;;  %2594 = vmatpush1.bf16.msra.mxu1 %v3137_v60  ;;  %v721_v59 = vld [vmem:[%s3999_s26 + $0x158] sm:$0xff] }
 0x133   : > { %2554 = vmatprep.subr.bf16.mxu0 %v3104_v61  ;;  %2595 = vmatprep.subr.bf16.mxu1 %v3106_v62  ;;  %v737_v60 = vld [vmem:[%s3999_s26 + $0x1d8] sm:$0xff]  ;;  %v3139_v61 = vcombine.low %v752_v49, %v768_v50  ;;  %v3141_v62 = vcombine.low %v753_v51, %v769_v52  ;;  %v3176_v49 = vcombine.high %v786_v43, %v802_v44  ;;  %v754_v51 = vld [vmem:[%s3999_s26 + $0x260] sm:$0xff] }
 0x134   : > { %v3110_v1 = vcombine.high %v721_v59, %v737_v60  ;;  %v770_v52 = vld [vmem:[%s3999_s26 + $0x2e0] sm:$0xff] }
 0x136   : > { %2555 = vmatpush1.bf16.msra.mxu0 %v3103_v4  ;;  %2596 = vmatpush1.bf16.msra.mxu1 %v3105_v5  ;;  %v689_v4 = vld [vmem:[%s3999_s26 + $0x58] sm:$0xff] }
 0x137   : > { %2556 = vmatprep.subr.bf16.mxu0 %v3072_v6  ;;  %2597 = vmatprep.subr.bf16.mxu1 %v3074_v7  ;;  %v705_v5 = vld [vmem:[%s3999_s26 + $0xd8] sm:$0xff]  ;;  %v3107_v6 = vcombine.low %v720_v57, %v736_v58  ;;  %v3109_v7 = vcombine.low %v721_v59, %v737_v60  ;;  %v3144_v57 = vcombine.high %v754_v51, %v770_v52  ;;  %v722_v59 = vld [vmem:[%s3999_s26 + $0x160] sm:$0xff] }
 0x138   : > { %v3078_v9 = vcombine.high %v689_v4, %v705_v5  ;;  %v738_v60 = vld [vmem:[%s3999_s26 + $0x1e0] sm:$0xff] }
 0x13a   : > { %2557 = vmatpush1.bf16.msra.mxu0 %v3071_v13  ;;  %2598 = vmatpush1.bf16.msra.mxu1 %v3073_v14  ;;  %v915_v13 = vld [vmem:[%s3999_s26 + $0x768] sm:$0xff] }
 0x13b   : > { %2624 = vmatprep.subr.bf16.mxu0 %v3300_v15  ;;  %2665 = vmatprep.subr.bf16.mxu1 %v3302_v16  ;;  %v931_v14 = vld [vmem:[%s3999_s26 + $0x7e8] sm:$0xff]  ;;  %v3075_v15 = vcombine.low %v688_v2, %v704_v3  ;;  %v3077_v16 = vcombine.low %v689_v4, %v705_v5  ;;  %v3112_v2 = vcombine.high %v722_v59, %v738_v60  ;;  %v690_v4 = vld [vmem:[%s3999_s26 + $0x60] sm:$0xff] }
 0x13c   : > { %v3306_v18 = vcombine.high %v915_v13, %v931_v14  ;;  %v706_v5 = vld [vmem:[%s3999_s26 + $0xe0] sm:$0xff] }
 0x13d   : > { %2575 = vmatmul.mubr.bf16.vlgmr.msra.gmra.mxu0 %v4044_v12  ;;  %2616 = vmatmul.mubr.bf16.vlgmr.msra.gmra.mxu1 %v4044_v12 }
 0x13e   : > { %2625 = vmatpush1.bf16.msra.mxu0 %v3299_v21  ;;  %2666 = vmatpush1.bf16.msra.mxu1 %v3301_v22  ;;  %v883_v21 = vld [vmem:[%s3999_s26 + $0x668] sm:$0xff] }
 0x13f   : > { %2626 = vmatprep.subr.bf16.mxu0 %v3268_v23  ;;  %2667 = vmatprep.subr.bf16.mxu1 %v3270_v24  ;;  %v899_v22 = vld [vmem:[%s3999_s26 + $0x6e8] sm:$0xff]  ;;  %v3303_v23 = vcombine.low %v914_v10, %v930_v11  ;;  %v3305_v24 = vcombine.low %v915_v13, %v931_v14  ;;  %v3080_v10 = vcombine.high %v690_v4, %v706_v5  ;;  %v916_v13 = vld [vmem:[%s3999_s26 + $0x770] sm:$0xff] }
 0x140   : > { %2656 = vmatprep.mubr.bf16.mxu0 %v3428_v0  ;;  %2697 = vmatprep.mubr.bf16.mxu1 %v3428_v0  ;;  %v3274_v26 = vcombine.high %v883_v21, %v899_v22  ;;  %v3273_v33 = vcombine.low %v883_v21, %v899_v22  ;;  %v932_v14 = vld [vmem:[%s3999_s26 + $0x7f0] sm:$0xff] }
 0x141   : > { %v884_v21 = vld [vmem:[%s3999_s26 + $0x670] sm:$0xff] }
 0x142   : > { %2627 = vmatpush1.bf16.msra.mxu0 %v3267_v29  ;;  %2668 = vmatpush1.bf16.msra.mxu1 %v3269_v30  ;;  %v851_v29 = vld [vmem:[%s3999_s26 + $0x568] sm:$0xff]  ;;  %v900_v22 = vld [vmem:[%s3999_s26 + $0x6f0] sm:$0xff] }
 0x143   : > { %2628 = vmatprep.subr.bf16.mxu0 %v3236_v31  ;;  %2669 = vmatprep.subr.bf16.mxu1 %v3238_v32  ;;  %v867_v30 = vld [vmem:[%s3999_s26 + $0x5e8] sm:$0xff]  ;;  %v4234_v31 = vld [vmem:[%s4336_s0] sm:$0x3]  ;;  %v3271_v32 = vcombine.low %v882_v19, %v898_v20  ;;  %v3308_v19 = vcombine.high %v916_v13, %v932_v14 }
 0x146   : > { %2629 = vmatpush1.bf16.msra.mxu0 %v3235_v37  ;;  %2670 = vmatpush1.bf16.msra.mxu1 %v3237_v38  ;;  %v819_v37 = vld [vmem:[%s3999_s26 + $0x468] sm:$0xff] }
 0x147   : > { %2630 = vmatprep.subr.bf16.mxu0 %v3204_v39  ;;  %2671 = vmatprep.subr.bf16.mxu1 %v3206_v40  ;;  %v835_v38 = vld [vmem:[%s3999_s26 + $0x4e8] sm:$0xff]  ;;  %v3239_v39 = vcombine.low %v850_v27, %v866_v28  ;;  %v3241_v40 = vcombine.low %v851_v29, %v867_v30  ;;  %v3276_v27 = vcombine.high %v884_v21, %v900_v22 }
 0x148   : > { %v3210_v42 = vcombine.high %v819_v37, %v835_v38 }
 0x14a   : > { %2631 = vmatpush1.bf16.msra.mxu0 %v3203_v45  ;;  %2672 = vmatpush1.bf16.msra.mxu1 %v3205_v46  ;;  %v787_v45 = vld [vmem:[%s3999_s26 + $0x368] sm:$0xff] }
 0x14b   : > { %2632 = vmatprep.subr.bf16.mxu0 %v3172_v47  ;;  %2673 = vmatprep.subr.bf16.mxu1 %v3174_v48  ;;  %v803_v46 = vld [vmem:[%s3999_s26 + $0x3e8] sm:$0xff]  ;;  %v3207_v47 = vcombine.low %v818_v35, %v834_v36  ;;  %v3209_v48 = vcombine.low %v819_v37, %v835_v38  ;;  %v3275_v35 = vcombine.low %v884_v21, %v900_v22  ;;  %v708_v21 = vld [vmem:[%s3999_s26 + $0xf0] sm:$0xff]  ;;  %v693_v22 = vld [vmem:[%s3999_s26 + $0x78] sm:$0xff] }
 0x14c   : > { %v3178_v50 = vcombine.high %v787_v45, %v803_v46 }
 0x14e   : > { %2633 = vmatpush1.bf16.msra.mxu0 %v3171_v53  ;;  %2674 = vmatpush1.bf16.msra.mxu1 %v3173_v54  ;;  %v755_v53 = vld [vmem:[%s3999_s26 + $0x268] sm:$0xff] }
 0x14f   : > { %2634 = vmatprep.subr.bf16.mxu0 %v3140_v55  ;;  %2675 = vmatprep.subr.bf16.mxu1 %v3142_v56  ;;  %v771_v54 = vld [vmem:[%s3999_s26 + $0x2e8] sm:$0xff]  ;;  %v3175_v55 = vcombine.low %v786_v43, %v802_v44  ;;  %v3177_v56 = vcombine.low %v787_v45, %v803_v46  ;;  %v821_v44 = vld [vmem:[%s3999_s26 + $0x478] sm:$0xff] }
 0x150   : > { %v3146_v58 = vcombine.high %v755_v53, %v771_v54  ;;  %v837_v45 = vld [vmem:[%s3999_s26 + $0x4f8] sm:$0xff] }
 0x152   : > { %2635 = vmatpush1.bf16.msra.mxu0 %v3139_v61  ;;  %2676 = vmatpush1.bf16.msra.mxu1 %v3141_v62  ;;  %v723_v61 = vld [vmem:[%s3999_s26 + $0x168] sm:$0xff] }
 0x153   : > { %2636 = vmatprep.subr.bf16.mxu0 %v3108_v63  ;;  %2677 = vmatprep.subr.bf16.mxu1 %v3110_v1  ;;  %v739_v62 = vld [vmem:[%s3999_s26 + $0x1e8] sm:$0xff]  ;;  %v3143_v63 = vcombine.low %v754_v51, %v770_v52  ;;  %v3145_v1 = vcombine.low %v755_v53, %v771_v54  ;;  %v3214_v52 = vcombine.high %v821_v44, %v837_v45  ;;  %v788_v53 = vld [vmem:[%s3999_s26 + $0x370] sm:$0xff]  ;;  %v789_v54 = vld [vmem:[%s3999_s26 + $0x378] sm:$0xff] }
 0x154   : > { %v3114_v3 = vcombine.high %v723_v61, %v739_v62 }
 0x156   : > { %2637 = vmatpush1.bf16.msra.mxu0 %v3107_v6  ;;  %2678 = vmatpush1.bf16.msra.mxu1 %v3109_v7  ;;  %v691_v6 = vld [vmem:[%s3999_s26 + $0x68] sm:$0xff] }
 0x157   : > { %2638 = vmatprep.subr.bf16.mxu0 %v3076_v8  ;;  %2679 = vmatprep.subr.bf16.mxu1 %v3078_v9  ;;  %v707_v7 = vld [vmem:[%s3999_s26 + $0xe8] sm:$0xff]  ;;  %v3111_v8 = vcombine.low %v722_v59, %v738_v60  ;;  %v3113_v9 = vcombine.low %v723_v61, %v739_v62  ;;  %v756_v60 = vld [vmem:[%s3999_s26 + $0x270] sm:$0xff]  ;;  %v757_v62 = vld [vmem:[%s3999_s26 + $0x278] sm:$0xff] }
 0x158   : > { %v3082_v11 = vcombine.high %v691_v6, %v707_v7  ;;  %v772_v61 = vld [vmem:[%s3999_s26 + $0x2f0] sm:$0xff] }
 0x15a   : > { %2639 = vmatpush1.bf16.msra.mxu0 %v3075_v15  ;;  %2680 = vmatpush1.bf16.msra.mxu1 %v3077_v16  ;;  %v917_v15 = vld [vmem:[%s3999_s26 + $0x778] sm:$0xff] }
 0x15b   : > { %2706 = vmatprep.subr.bf16.mxu0 %v3304_v17  ;;  %2747 = vmatprep.subr.bf16.mxu1 %v3306_v18  ;;  %v933_v16 = vld [vmem:[%s3999_s26 + $0x7f8] sm:$0xff]  ;;  %v3079_v17 = vcombine.low %v690_v4, %v706_v5  ;;  %v3081_v18 = vcombine.low %v691_v6, %v707_v7  ;;  %v3148_v4 = vcombine.high %v756_v60, %v772_v61  ;;  %v724_v7 = vld [vmem:[%s3999_s26 + $0x170] sm:$0xff] }
 0x15c   : > { %v3310_v20 = vcombine.high %v917_v15, %v933_v16 }
 0x15d   : > { %2657 = vmatmul.mubr.bf16.vlgmr.msra.gmra.mxu0 %v4044_v12  ;;  %2698 = vmatmul.mubr.bf16.vlgmr.msra.gmra.mxu1 %v4234_v31  ;;  %v3242_v12 = vcombine.high %v851_v29, %v867_v30  ;;  %v852_v29 = vld [vmem:[%s3999_s26 + $0x570] sm:$0xff] }
 0x15e   : > { %2707 = vmatpush1.bf16.msra.mxu0 %v3303_v23  ;;  %2748 = vmatpush1.bf16.msra.mxu1 %v3305_v24  ;;  %v885_v23 = vld [vmem:[%s3999_s26 + $0x678] sm:$0xff]  ;;  %v868_v30 = vld [vmem:[%s3999_s26 + $0x5f0] sm:$0xff] }
 0x15f   : > { %2708 = vmatprep.subr.bf16.mxu0 %v3272_v25  ;;  %2749 = vmatprep.subr.bf16.mxu1 %v3274_v26  ;;  %v901_v24 = vld [vmem:[%s3999_s26 + $0x6f8] sm:$0xff]  ;;  %v3307_v25 = vcombine.low %v916_v13, %v932_v14  ;;  %v3309_v26 = vcombine.low %v917_v15, %v933_v16  ;;  %v3244_v38 = vcombine.high %v852_v29, %v868_v30 }
 0x160   : > { %2738 = vmatprep.mubr.bf16.mxu0 %v3428_v0  ;;  %2779 = vmatprep.mubr.bf16.mxu1 %v3428_v0  ;;  %v3278_v28 = vcombine.high %v885_v23, %v901_v24  ;;  %v3277_v37 = vcombine.low %v885_v23, %v901_v24  ;;  %v3147_v15 = vcombine.low %v756_v60, %v772_v61  ;;  %v709_v23 = vld [vmem:[%s3999_s26 + $0xf8] sm:$0xff] }
 0x162   : > { %2709 = vmatpush1.bf16.msra.mxu0 %v3271_v32  ;;  %2750 = vmatpush1.bf16.msra.mxu1 %v3273_v33  ;;  %v853_v33 = vld [vmem:[%s3999_s26 + $0x578] sm:$0xff] }
 0x163   : > { %2710 = vmatprep.subr.bf16.mxu0 %v3240_v34  ;;  %2751 = vmatprep.subr.bf16.mxu1 %v3242_v12  ;;  %v869_v34 = vld [vmem:[%s3999_s26 + $0x5f8] sm:$0xff] }
 0x166   : > { %2711 = vmatpush1.bf16.msra.mxu0 %v3239_v39  ;;  %2752 = vmatpush1.bf16.msra.mxu1 %v3241_v40  ;;  %v3246_v40 = vcombine.high %v853_v33, %v869_v34 }
 0x167   : > { %2712 = vmatprep.subr.bf16.mxu0 %v3208_v41  ;;  %2753 = vmatprep.subr.bf16.mxu1 %v3210_v42  ;;  %v820_v41 = vld [vmem:[%s3999_s26 + $0x470] sm:$0xff] }
 0x168   : > { %v836_v42 = vld [vmem:[%s3999_s26 + $0x4f0] sm:$0xff] }
 0x16a   : > { %2713 = vmatpush1.bf16.msra.mxu0 %v3207_v47  ;;  %2754 = vmatpush1.bf16.msra.mxu1 %v3209_v48  ;;  %v3243_v47 = vcombine.low %v852_v29, %v868_v30  ;;  %v3085_v29 = vcombine.low %v693_v22, %v709_v23 }
 0x16b   : > { %2714 = vmatprep.subr.bf16.mxu0 %v3176_v49  ;;  %2755 = vmatprep.subr.bf16.mxu1 %v3178_v50  ;;  %v3245_v49 = vcombine.low %v853_v33, %v869_v34  ;;  %v3212_v50 = vcombine.high %v820_v41, %v836_v42 }
 0x16e   : > { %2715 = vmatpush1.bf16.msra.mxu0 %v3175_v55  ;;  %2756 = vmatpush1.bf16.msra.mxu1 %v3177_v56  ;;  %v805_v55 = vld [vmem:[%s3999_s26 + $0x3f8] sm:$0xff]  ;;  %v3211_v56 = vcombine.low %v820_v41, %v836_v42 }
 0x16f   : > { %2716 = vmatprep.subr.bf16.mxu0 %v3144_v57  ;;  %2757 = vmatprep.subr.bf16.mxu1 %v3146_v58  ;;  %v3213_v57 = vcombine.low %v821_v44, %v837_v45  ;;  %v3182_v59 = vcombine.high %v789_v54, %v805_v55 }
 0x172   : > { %2717 = vmatpush1.bf16.msra.mxu0 %v3143_v63  ;;  %2758 = vmatpush1.bf16.msra.mxu1 %v3145_v1  ;;  %v773_v63 = vld [vmem:[%s3999_s26 + $0x2f8] sm:$0xff] }
 0x173   : > { %2718 = vmatprep.subr.bf16.mxu0 %v3112_v2  ;;  %2759 = vmatprep.subr.bf16.mxu1 %v3114_v3  ;;  %v3181_v3 = vcombine.low %v789_v54, %v805_v55  ;;  %v3150_v6 = vcombine.high %v757_v62, %v773_v63 }
 0x176   : > { %2719 = vmatpush1.bf16.msra.mxu0 %v3111_v8  ;;  %2760 = vmatpush1.bf16.msra.mxu1 %v3113_v9  ;;  %v740_v8 = vld [vmem:[%s3999_s26 + $0x1f0] sm:$0xff] }
 0x177   : > { %2720 = vmatprep.subr.bf16.mxu0 %v3080_v10  ;;  %2761 = vmatprep.subr.bf16.mxu1 %v3082_v11  ;;  %v725_v10 = vld [vmem:[%s3999_s26 + $0x178] sm:$0xff]  ;;  %v3115_v24 = vcombine.low %v724_v7, %v740_v8 }
 0x178   : > { %v741_v11 = vld [vmem:[%s3999_s26 + $0x1f8] sm:$0xff] }
 0x17a   : > { %2721 = vmatpush1.bf16.msra.mxu0 %v3079_v17  ;;  %2762 = vmatpush1.bf16.msra.mxu1 %v3081_v18  ;;  %v3149_v17 = vcombine.low %v757_v62, %v773_v63  ;;  %v3116_v18 = vcombine.high %v724_v7, %v740_v8 }
 0x17b   : > { %2788 = vmatprep.subr.bf16.mxu0 %v3308_v19  ;;  %2829 = vmatprep.subr.bf16.mxu1 %v3310_v20  ;;  %v3118_v19 = vcombine.high %v725_v10, %v741_v11  ;;  %v692_v20 = vld [vmem:[%s3999_s26 + $0x70] sm:$0xff] }
 0x17d   : > { %v2248_v32 = vpop.f32.mrf.mxu0  ;;  %2739 = vmatmul.mubr.bf16.vlgmr.msra.gmra.mxu0 %v4234_v31  ;;  %v2289_v12 = vpop.f32.mrf.mxu1  ;;  %2780 = vmatmul.mubr.bf16.vlgmr.msra.gmra.mxu1 %v4234_v31 }
 0x17e   : > { %3339 = vtanh.f32 %v2248_v32  ;;  %2789 = vmatpush1.bf16.msra.mxu0 %v3307_v25  ;;  %2830 = vmatpush1.bf16.msra.mxu1 %v3309_v26  ;;  %v3117_v25 = vcombine.low %v725_v10, %v741_v11  ;;  %v3084_v26 = vcombine.high %v692_v20, %v708_v21 }
 0x17f   : > { %3341 = vtanh.f32 %v2289_v12  ;;  %v2250_v36 = vpop.f32.mrf.mxu0  ;;  %2790 = vmatprep.subr.bf16.mxu0 %v3276_v27  ;;  %v2291_v39 = vpop.f32.mrf.mxu1  ;;  %2831 = vmatprep.subr.bf16.mxu1 %v3278_v28  ;;  %v3086_v27 = vcombine.high %v693_v22, %v709_v23  ;;  %v3083_v28 = vcombine.low %v692_v20, %v708_v21 }
 0x180   : > { %3343 = vtanh.f32 %v2250_v36  ;;  %2820 = vmatprep.mubr.bf16.mxu0 %v3428_v0  ;;  %2861 = vmatprep.mubr.bf16.mxu1 %v3428_v0  ;;  %v804_v0 = vld [vmem:[%s3999_s26 + $0x3f0] sm:$0xff] }
 0x181   : > { %3345 = vtanh.f32 %v2291_v39  ;;  %v2252_v43 = vpop.f32.mrf.mxu0  ;;  %v2293_v46 = vpop.f32.mrf.mxu1  ;;  %v3180_v58 = vcombine.high %v788_v53, %v804_v0  ;;  %v3179_v1 = vcombine.low %v788_v53, %v804_v0 }
 0x182   : > { %2791 = vmatpush1.bf16.msra.mxu0 %v3275_v35  ;;  %2832 = vmatpush1.bf16.msra.mxu1 %v3277_v37 }
 0x183   : > { %v2253_v48 = vpop.f32.mrf.mxu0  ;;  %2792 = vmatprep.subr.bf16.mxu0 %v3244_v38  ;;  %v2294_v51 = vpop.f32.mrf.mxu1  ;;  %2833 = vmatprep.subr.bf16.mxu1 %v3246_v40 }
 0x186   : > { %2793 = vmatpush1.bf16.msra.mxu0 %v3243_v47  ;;  %2834 = vmatpush1.bf16.msra.mxu1 %v3245_v49 }
 0x187   : > { %2794 = vmatprep.subr.bf16.mxu0 %v3212_v50  ;;  %2835 = vmatprep.subr.bf16.mxu1 %v3214_v52 }
 0x18a   : > { %2795 = vmatpush1.bf16.msra.mxu0 %v3211_v56  ;;  %2836 = vmatpush1.bf16.msra.mxu1 %v3213_v57 }
 0x18b   : > { %v3340_v2 = vpop.eup %3339  ;;  %2796 = vmatprep.subr.bf16.mxu0 %v3180_v58  ;;  %2837 = vmatprep.subr.bf16.mxu1 %v3182_v59 }
 0x18c   : > { %v3342_v5 = vpop.eup %3341 }
 0x18d   : > { %v3344_v9 = vpop.eup %3343 }
 0x18e   : > { %v3346_v13 = vpop.eup %3345  ;;  %v2934_v14 = vcombine.low %v3340_v2, %v3344_v9  ;;  %2797 = vmatpush1.bf16.msra.mxu0 %v3179_v1  ;;  %2838 = vmatpush1.bf16.msra.mxu1 %v3181_v3 }
 0x18f   : > { %v2935_v16 = vcombine.low %v3342_v5, %v3346_v13  ;;  %2798 = vmatprep.subr.bf16.mxu0 %v3148_v4  ;;  %2839 = vmatprep.subr.bf16.mxu1 %v3150_v6 }
 0x190   : > { %2966 = vst [vmem:[%s4300_s7] sm:$0x77] %v2934_v14 }
 0x191   : > { %2967 = vst [vmem:[%s4300_s7 + $0x8] sm:$0x77] %v2935_v16 }
 0x192   : > { %2799 = vmatpush1.bf16.msra.mxu0 %v3147_v15  ;;  %2840 = vmatpush1.bf16.msra.mxu1 %v3149_v17 }
 0x193   : > { %2800 = vmatprep.subr.bf16.mxu0 %v3116_v18  ;;  %2841 = vmatprep.subr.bf16.mxu1 %v3118_v19 }
 0x196   : > { %2801 = vmatpush1.bf16.msra.mxu0 %v3115_v24  ;;  %2842 = vmatpush1.bf16.msra.mxu1 %v3117_v25 }
 0x197   : > { %2802 = vmatprep.subr.bf16.mxu0 %v3084_v26  ;;  %2843 = vmatprep.subr.bf16.mxu1 %v3086_v27 }
 0x19a   : > { %2803 = vmatpush1.bf16.msra.mxu0 %v3083_v28  ;;  %2844 = vmatpush1.bf16.msra.mxu1 %v3085_v29 }
 0x19d   : > { %v2330_v30 = vpop.f32.mrf.mxu0  ;;  %2821 = vmatmul.mubr.bf16.vlgmr.msra.gmra.mxu0 %v4234_v31  ;;  %v2371_v32 = vpop.f32.mrf.mxu1  ;;  %2862 = vmatmul.mubr.bf16.vlgmr.msra.gmra.mxu1 %v4234_v31 }
 0x19e   : > { %3347 = vtanh.f32 %v2330_v30 }
 0x19f   : > { %3349 = vtanh.f32 %v2371_v32  ;;  %v2332_v33 = vpop.f32.mrf.mxu0  ;;  %v2373_v34 = vpop.f32.mrf.mxu1 }
 0x1a0   : > { %3351 = vtanh.f32 %v2332_v33 }
 0x1a1   : > { %3353 = vtanh.f32 %v2373_v34  ;;  %v2334_v12 = vpop.f32.mrf.mxu0  ;;  %v2375_v35 = vpop.f32.mrf.mxu1 }
 0x1a3   : > { %v2335_v36 = vpop.f32.mrf.mxu0  ;;  %v2376_v37 = vpop.f32.mrf.mxu1 }
 0x1ab   : > { %v3348_v38 = vpop.eup %3347 }
 0x1ac   : > { %v3350_v39 = vpop.eup %3349 }
 0x1ad   : > { %v3352_v40 = vpop.eup %3351 }
 0x1ae   : > { %v3354_v41 = vpop.eup %3353  ;;  %v2936_v42 = vcombine.low %v3348_v38, %v3352_v40 }
 0x1af   : > { %v2937_v43 = vcombine.low %v3350_v39, %v3354_v41 }
 0x1b0   : > { %2968 = vst [vmem:[%s4300_s7 + $0x10] sm:$0x77] %v2936_v42 }
 0x1b1   : > { %2969 = vst [vmem:[%s4300_s7 + $0x18] sm:$0x77] %v2937_v43 }
 0x1bd   : > { %v2412_v31 = vpop.f32.mrf.mxu0  ;;  %v2453_v44 = vpop.f32.mrf.mxu1 }
 0x1be   : > { %3355 = vtanh.f32 %v2412_v31 }
 0x1bf   : > { %3357 = vtanh.f32 %v2453_v44  ;;  %v2414_v45 = vpop.f32.mrf.mxu0  ;;  %v2455_v46 = vpop.f32.mrf.mxu1 }
 0x1c0   : > { %3359 = vtanh.f32 %v2414_v45 }
 0x1c1   : > { %3361 = vtanh.f32 %v2455_v46  ;;  %v2416_v47 = vpop.f32.mrf.mxu0  ;;  %v2457_v48 = vpop.f32.mrf.mxu1 }
 0x1c3   : > { %v2417_v49 = vpop.f32.mrf.mxu0  ;;  %v2458_v50 = vpop.f32.mrf.mxu1 }
 0x1cb   : > { %v3356_v51 = vpop.eup %3355 }
 0x1cc   : > { %v3358_v52 = vpop.eup %3357 }
 0x1cd   : > { %v3360_v53 = vpop.eup %3359 }
 0x1ce   : > { %v3362_v0 = vpop.eup %3361  ;;  %v2938_v54 = vcombine.low %v3356_v51, %v3360_v53 }
 0x1cf   : > { %v2939_v55 = vcombine.low %v3358_v52, %v3362_v0 }
 0x1d0   : > { %2970 = vst [vmem:[%s4300_s7 + $0x20] sm:$0x77] %v2938_v54 }
 0x1d1   : > { %2971 = vst [vmem:[%s4300_s7 + $0x28] sm:$0x77] %v2939_v55 }
 0x1dd   : > { %v2494_v56 = vpop.f32.mrf.mxu0  ;;  %v2535_v57 = vpop.f32.mrf.mxu1 }
 0x1de   : > { %3363 = vtanh.f32 %v2494_v56 }
 0x1df   : > { %3365 = vtanh.f32 %v2535_v57  ;;  %v2496_v58 = vpop.f32.mrf.mxu0  ;;  %v2537_v59 = vpop.f32.mrf.mxu1 }
 0x1e0   : > { %3367 = vtanh.f32 %v2496_v58 }
 0x1e1   : > { %3369 = vtanh.f32 %v2537_v59  ;;  %v2498_v60 = vpop.f32.mrf.mxu0  ;;  %v2539_v61 = vpop.f32.mrf.mxu1 }
 0x1e3   : > { %v2499_v62 = vpop.f32.mrf.mxu0  ;;  %v2540_v63 = vpop.f32.mrf.mxu1 }
 0x1eb   : > { %v3364_v1 = vpop.eup %3363 }
 0x1ec   : > { %v3366_v2 = vpop.eup %3365 }
 0x1ed   : > { %v3368_v3 = vpop.eup %3367 }
 0x1ee   : > { %v3370_v4 = vpop.eup %3369  ;;  %v2940_v5 = vcombine.low %v3364_v1, %v3368_v3 }
 0x1ef   : > { %v2941_v6 = vcombine.low %v3366_v2, %v3370_v4 }
 0x1f0   : > { %2972 = vst [vmem:[%s4300_s7 + $0x30] sm:$0x77] %v2940_v5 }
 0x1f1   : > { %2973 = vst [vmem:[%s4300_s7 + $0x38] sm:$0x77] %v2941_v6 }
 0x1fd   : > { %v2576_v7 = vpop.f32.mrf.mxu0  ;;  %v2617_v8 = vpop.f32.mrf.mxu1 }
 0x1fe   : > { %3371 = vtanh.f32 %v2576_v7 }
 0x1ff   : > { %3373 = vtanh.f32 %v2617_v8  ;;  %v2578_v9 = vpop.f32.mrf.mxu0  ;;  %v2619_v10 = vpop.f32.mrf.mxu1 }
 0x200   : > { %3375 = vtanh.f32 %v2578_v9 }
 0x201   : > { %3377 = vtanh.f32 %v2619_v10  ;;  %v2580_v11 = vpop.f32.mrf.mxu0  ;;  %v2621_v13 = vpop.f32.mrf.mxu1 }
 0x203   : > { %v2581_v14 = vpop.f32.mrf.mxu0  ;;  %v2622_v15 = vpop.f32.mrf.mxu1 }
 0x20b   : > { %v3372_v16 = vpop.eup %3371 }
 0x20c   : > { %v3374_v17 = vpop.eup %3373 }
 0x20d   : > { %v3376_v18 = vpop.eup %3375 }
 0x20e   : > { %v3378_v19 = vpop.eup %3377  ;;  %v2942_v20 = vcombine.low %v3372_v16, %v3376_v18 }
 0x20f   : > { %v2943_v21 = vcombine.low %v3374_v17, %v3378_v19 }
 0x210   : > { %2974 = vst [vmem:[%s4300_s7 + $0x40] sm:$0x77] %v2942_v20 }
 0x211   : > { %2975 = vst [vmem:[%s4300_s7 + $0x48] sm:$0x77] %v2943_v21 }
 0x21d   : > { %v2658_v22 = vpop.f32.mrf.mxu0  ;;  %v2699_v23 = vpop.f32.mrf.mxu1 }
 0x21e   : > { %3379 = vtanh.f32 %v2658_v22 }
 0x21f   : > { %3381 = vtanh.f32 %v2699_v23  ;;  %v2660_v24 = vpop.f32.mrf.mxu0  ;;  %v2701_v25 = vpop.f32.mrf.mxu1 }
 0x220   : > { %3383 = vtanh.f32 %v2660_v24 }
 0x221   : > { %3385 = vtanh.f32 %v2701_v25  ;;  %v2662_v26 = vpop.f32.mrf.mxu0  ;;  %v2703_v27 = vpop.f32.mrf.mxu1 }
 0x223   : > { %v2663_v28 = vpop.f32.mrf.mxu0  ;;  %v2704_v29 = vpop.f32.mrf.mxu1 }
 0x22b   : > { %v3380_v30 = vpop.eup %3379 }
 0x22c   : > { %v3382_v32 = vpop.eup %3381 }
 0x22d   : > { %v3384_v33 = vpop.eup %3383 }
 0x22e   : > { %v3386_v34 = vpop.eup %3385  ;;  %v2944_v12 = vcombine.low %v3380_v30, %v3384_v33 }
 0x22f   : > { %v2945_v35 = vcombine.low %v3382_v32, %v3386_v34 }
 0x230   : > { %2976 = vst [vmem:[%s4300_s7 + $0x50] sm:$0x77] %v2944_v12 }
 0x231   : > { %2977 = vst [vmem:[%s4300_s7 + $0x58] sm:$0x77] %v2945_v35 }
 0x23d   : > { %v2740_v36 = vpop.f32.mrf.mxu0  ;;  %v2781_v37 = vpop.f32.mrf.mxu1 }
 0x23e   : > { %3387 = vtanh.f32 %v2740_v36 }
 0x23f   : > { %3389 = vtanh.f32 %v2781_v37  ;;  %v2742_v38 = vpop.f32.mrf.mxu0  ;;  %v2783_v39 = vpop.f32.mrf.mxu1 }
 0x240   : > { %3391 = vtanh.f32 %v2742_v38 }
 0x241   : > { %3393 = vtanh.f32 %v2783_v39  ;;  %v2744_v40 = vpop.f32.mrf.mxu0  ;;  %v2785_v41 = vpop.f32.mrf.mxu1 }
 0x243   : > { %v2745_v42 = vpop.f32.mrf.mxu0  ;;  %v2786_v43 = vpop.f32.mrf.mxu1 }
 0x24b   : > { %v3388_v31 = vpop.eup %3387 }
 0x24c   : > { %v3390_v44 = vpop.eup %3389 }
 0x24d   : > { %v3392_v45 = vpop.eup %3391 }
 0x24e   : > { %v3394_v46 = vpop.eup %3393  ;;  %v2946_v47 = vcombine.low %v3388_v31, %v3392_v45 }
 0x24f   : > { %v2947_v48 = vcombine.low %v3390_v44, %v3394_v46 }
 0x250   : > { %2978 = vst [vmem:[%s4300_s7 + $0x60] sm:$0x77] %v2946_v47 }
 0x251   : > { %2979 = vst [vmem:[%s4300_s7 + $0x68] sm:$0x77] %v2947_v48 }
 0x25d   : > { %v2822_v49 = vpop.f32.mrf.mxu0  ;;  %v2863_v50 = vpop.f32.mrf.mxu1 }
 0x25e   : > { %3395 = vtanh.f32 %v2822_v49 }
 0x25f   : > { %3397 = vtanh.f32 %v2863_v50  ;;  %v2824_v51 = vpop.f32.mrf.mxu0  ;;  %v2865_v52 = vpop.f32.mrf.mxu1 }
 0x260   : > { %3399 = vtanh.f32 %v2824_v51 }
 0x261   : > { %3401 = vtanh.f32 %v2865_v52  ;;  %v2826_v53 = vpop.f32.mrf.mxu0  ;;  %v2867_v0 = vpop.f32.mrf.mxu1 }
 0x263   : > { %v2827_v54 = vpop.f32.mrf.mxu0  ;;  %v2868_v55 = vpop.f32.mrf.mxu1 }
 0x26b   : > { %v3396_v56 = vpop.eup %3395 }
 0x26c   : > { %v3398_v57 = vpop.eup %3397 }
 0x26d   : > { %v3400_v58 = vpop.eup %3399 }
 0x26e   : > { %v3402_v59 = vpop.eup %3401  ;;  %v2948_v60 = vcombine.low %v3396_v56, %v3400_v58 }
 0x26f   : > { %v2949_v61 = vcombine.low %v3398_v57, %v3402_v59 }
 0x270   : > { %2980 = vst [vmem:[%s4300_s7 + $0x70] sm:$0x77] %v2948_v60 }
 0x271   : > { %2981 = vst [vmem:[%s4300_s7 + $0x78] sm:$0x77] %v2949_v61 }
 0x272 PF: > { %p9_p9 = scmp.ge.s32.totalorder %s3461_s13, 4   ;;  %s4339_s9 = smov %s3422_s10 }
 0x273   : > { %s4340_s10 = smov %s3470_s16  ;;  %s4341_s11 = smov %s3461_s13 }
 0x274   :  { %11 = sbr.rel (!%p9_p9) target bundleno = 2 (0x2), region = 86 }

</bundles_post_ra>
